<compile_context>
chip_gen: v7x
topology: tpu7x:2x2x1
jax: 0.10.0
libtpu: 0.0.40
codegen_flags: <defaults>
</compile_context>

<pallas_src>
import functools

import jax
import jax.numpy as jnp
from jax import lax
from jax.experimental import pallas as pl
from jax.experimental.pallas import tpu as pltpu


# ---------------------------------------------------------------------------
# Fused kernel: theta-MLP + dw1(+BN+DyReLU) + pw1(+BN+ReLU) + dw2(+BN+DyReLU) + pw2(+BN)
# ---------------------------------------------------------------------------
def fused_kernel(z_ref, x1_ref,
                 fc1w_ref, fc1b_ref, fc2w_ref, fc2b_ref, lam_ref, init_ref,
                 dw1w_ref, dw1b_ref, pw1w_ref, pw1b_ref,
                 dw2w_ref, dw2b_ref, pw2w_ref, pw2b_ref,
                 o_ref, pad2_ref,
                 *, ks, stride, pad, B, Ho, Wo, hid, out):
    # ---- theta MLP -> dyn-ReLU coefficients (fc2 columns pre-permuted so the output
    #      is grouped as [a1 | a2 | c1 | c2], each of width hid) ----
    z = z_ref[...]
    h = jnp.dot(z, fc1w_ref[...], preferred_element_type=jnp.float32) + fc1b_ref[...]
    h = jnp.maximum(h, 0.0)
    t = jnp.dot(h, fc2w_ref[...], preferred_element_type=jnp.float32) + fc2b_ref[...]
    t = jnp.tanh(0.5 * t)                               # == 2*sigmoid(t) - 1
    coefs = t * lam_ref[...] + init_ref[...]            # (B, 4*hid)
    a1 = coefs[:, 0 * hid:1 * hid][:, None, None, :]    # (B, 1, 1, hid)
    a2 = coefs[:, 1 * hid:2 * hid][:, None, None, :]
    c1 = coefs[:, 2 * hid:3 * hid][:, None, None, :]
    c2 = coefs[:, 3 * hid:4 * hid][:, None, None, :]

    def dyrelu(y):                                      # MyDyRelu(k=2)
        return jnp.maximum(y * a1 + c1, y * a2 + c2)

    def pw_mac(y, w_ref, b_ref):                        # 1x1 conv as VPU broadcast-MAC
        w = w_ref[...]                                  # (Cin, Cout), BN scale folded in
        cin = w.shape[0]
        acc = y[..., 0:1] * w[0:1, :]
        for ci in range(1, cin):
            acc = acc + y[..., ci:ci + 1] * w[ci:ci + 1, :]
        return acc + b_ref[...]

    # ---- stage 1: depthwise conv (stride) + folded BN + DyReLU ----
    # x1_ref: (stride*stride, B, Hh, Wh, hid)  -- stride-phase-decomposed padded input.
    w1 = dw1w_ref[...]                                  # (ks*ks, hid), BN scale folded in
    acc = None
    for dy in range(ks):
        for dx in range(ks):
            ph = (dy % stride) * stride + (dx % stride)
            qy, qx = dy // stride, dx // stride
            tap = x1_ref[ph, :, qy:qy + Ho, qx:qx + Wo, :]          # (B, Ho, Wo, hid)
            t_i = dy * ks + dx
            term = tap * w1[t_i:t_i + 1, :]
            acc = term if acc is None else acc + term
    y = dyrelu(acc + dw1b_ref[...])

    # ---- pw1 (1x1 conv) + folded BN + ReLU (grouped-conv channel expansion folded in) ----
    y = jnp.maximum(pw_mac(y, pw1w_ref, pw1b_ref), 0.0)             # (B, Ho, Wo, hid)

    # ---- stage 2: depthwise conv (stride 1) on a VMEM-padded copy of the activations ----
    pad2_ref[...] = jnp.zeros_like(pad2_ref)
    pad2_ref[:, pad:pad + Ho, pad:pad + Wo, :] = y
    w2 = dw2w_ref[...]
    acc = None
    for dy in range(ks):
        for dx in range(ks):
            tap = pad2_ref[:, dy:dy + Ho, dx:dx + Wo, :]            # (B, Ho, Wo, hid)
            t_i = dy * ks + dx
            term = tap * w2[t_i:t_i + 1, :]
            acc = term if acc is None else acc + term
    y = dyrelu(acc + dw2b_ref[...])

    # ---- pw2 (1x1 conv) + folded BN ----
    o_ref[...] = pw_mac(y, pw2w_ref, pw2b_ref)                      # (B, Ho, Wo, out)


# ---------------------------------------------------------------------------
# Wrapper: parameter folding + layout plumbing + one pallas_call
# ---------------------------------------------------------------------------
@functools.partial(jax.jit, static_argnames=("ks", "inp", "hid", "out", "stride",
                                             "dim", "reduction", "k"))
def mobile_down_forward(x_nchw, z, p, *, ks, inp, hid, out, stride, dim,
                        reduction=4, k=2):
    assert k == 2, "MyDyRelu in MobileDown is hard-coded to k=2"
    f32 = jnp.float32
    B, _, H, W = x_nchw.shape
    dr = dim // reduction
    mult = hid // inp
    pad = ks // 2
    T = ks * ks
    Ho = (H + 2 * pad - ks) // stride + 1
    Wo = (W + 2 * pad - ks) // stride + 1

    # ---- fold inference-mode BatchNorm into the conv weights / biases ----
    def fold(g, b, m, v, eps=1e-5):
        s = g / jnp.sqrt(v + eps)
        return s, b - m * s

    s1, b1 = fold(p['dw_bn1_g'], p['dw_bn1_b'], p['dw_bn1_m'], p['dw_bn1_v'])
    dw1_w = (p['dw1_w'] * s1[None, :]).astype(f32)                  # (T, hid)
    dw1_b = b1.reshape(1, hid).astype(f32)

    sp1, bp1 = fold(p['pw_bn1_g'], p['pw_bn1_b'], p['pw_bn1_m'], p['pw_bn1_v'])
    # fold BN scale AND the grouped-conv channel expansion (repeat by `mult`) into pw1
    rep = jnp.arange(hid) // mult                 # expanded channel c reads inp channel c//mult
    pw1_w = ((p['pw1_w'] * sp1[None, :])[:, rep]).astype(f32)       # (hid, hid)
    pw1_b = bp1[rep].reshape(1, hid).astype(f32)

    s2, b2 = fold(p['dw_bn2_g'], p['dw_bn2_b'], p['dw_bn2_m'], p['dw_bn2_v'])
    dw2_w = (p['dw2_w'] * s2[None, :]).astype(f32)                  # (T, hid)
    dw2_b = b2.reshape(1, hid).astype(f32)

    sp2, bp2 = fold(p['pw_bn2_g'], p['pw_bn2_b'], p['pw_bn2_m'], p['pw_bn2_v'])
    pw2_w = (p['pw2_w'] * sp2[None, :]).astype(f32)                 # (hid, out)
    pw2_b = bp2.reshape(1, out).astype(f32)

    # ---- regroup fc2 columns so the MLP emits [a1 | a2 | c1 | c2] channel blocks ----
    perm = (2 * k * jnp.arange(hid)[None, :] + jnp.arange(2 * k)[:, None]).reshape(-1)
    fc2_w = p['fc2_w'][:, perm].astype(f32)
    fc2_b = p['fc2_b'][:, perm].astype(f32)
    lambdas = jnp.array([1.0] * k + [0.5] * k, f32)
    init_v = jnp.array([1.0] + [0.0] * (2 * k - 1), f32)
    lam = jnp.repeat(lambdas, hid).reshape(1, 2 * k * hid)
    init = jnp.repeat(init_v, hid).reshape(1, 2 * k * hid)

    # ---- layout plumbing (tiny XLA glue, read once by the kernel):
    #      NCHW->NHWC, grouped-conv channel repeat, zero pad, stride-phase decomposition.
    x = jnp.transpose(x_nchw, (0, 2, 3, 1)).astype(f32)             # (B, H, W, inp)
    x = jnp.repeat(x, mult, axis=-1)                                # (B, H, W, hid)
    Hp, Wp = H + 2 * pad, W + 2 * pad
    Hp_r = -(-Hp // stride) * stride
    Wp_r = -(-Wp // stride) * stride
    xp = jnp.pad(x, ((0, 0), (pad, pad + Hp_r - Hp), (pad, pad + Wp_r - Wp), (0, 0)))
    Hh, Wh = Hp_r // stride, Wp_r // stride
    # phase p = py*stride+px holds xp[:, py::stride, px::stride, :]
    xph = xp.reshape(B, Hh, stride, Wh, stride, hid).transpose(2, 4, 0, 1, 3, 5)
    xph = xph.reshape(stride * stride, B, Hh, Wh, hid)

    z0 = z[:, 0, :].astype(f32)

    kern = functools.partial(fused_kernel, ks=ks, stride=stride, pad=pad,
                             B=B, Ho=Ho, Wo=Wo, hid=hid, out=out)
    # At production MobileFormer sizes, tile Ho / batch via the grid and set
    # vmem_limit_bytes; at these shapes everything fits in VMEM in one block.
    y = pl.pallas_call(
        kern,
        out_shape=jax.ShapeDtypeStruct((B, Ho, Wo, out), f32),
        grid=(1,),
        in_specs=[
            pl.BlockSpec((B, dim), lambda i: (0, 0)),
            pl.BlockSpec(xph.shape, lambda i: (0, 0, 0, 0, 0)),
            pl.BlockSpec((dim, dr), lambda i: (0, 0)),
            pl.BlockSpec((1, dr), lambda i: (0, 0)),
            pl.BlockSpec((dr, 2 * k * hid), lambda i: (0, 0)),
            pl.BlockSpec((1, 2 * k * hid), lambda i: (0, 0)),
            pl.BlockSpec((1, 2 * k * hid), lambda i: (0, 0)),
            pl.BlockSpec((1, 2 * k * hid), lambda i: (0, 0)),
            pl.BlockSpec((T, hid), lambda i: (0, 0)),
            pl.BlockSpec((1, hid), lambda i: (0, 0)),
            pl.BlockSpec((hid, hid), lambda i: (0, 0)),
            pl.BlockSpec((1, hid), lambda i: (0, 0)),
            pl.BlockSpec((T, hid), lambda i: (0, 0)),
            pl.BlockSpec((1, hid), lambda i: (0, 0)),
            pl.BlockSpec((hid, out), lambda i: (0, 0)),
            pl.BlockSpec((1, out), lambda i: (0, 0)),
        ],
        out_specs=pl.BlockSpec((B, Ho, Wo, out), lambda i: (0, 0, 0, 0)),
        scratch_shapes=[pltpu.VMEM((B, Ho + 2 * pad, Wo + 2 * pad, hid), f32)],
        compiler_params=pltpu.CompilerParams(dimension_semantics=("arbitrary",)),
    )(z0, xph, p['fc1_w'], p['fc1_b'], fc2_w, fc2_b, lam, init,
      dw1_w, dw1_b, pw1_w, pw1_b, dw2_w, dw2_b, pw2_w, pw2_b)

    return jnp.transpose(y, (0, 3, 1, 2))        # NHWC -> NCHW


# ---------------------------------------------------------------------------
# Pure-JAX reference (mirrors the PyTorch forward, eval-mode BatchNorm)
# ---------------------------------------------------------------------------
def torch_style_reference(x, z, p, *, ks, inp, hid, out_ch, stride, dim, reduction, k):
    eps = 1e-5

    def bn(y, g, b, m, v):
        return ((y - m[None, :, None, None]) / jnp.sqrt(v + eps)[None, :, None, None]
                * g[None, :, None, None] + b[None, :, None, None])

    def dyrelu(y, coefs):
        a = coefs[:, :, :k]
        c = coefs[:, :, k:]
        o = y[:, :, :, :, None] * a[:, :, None, None, :] + c[:, :, None, None, :]
        return o.max(axis=-1)

    theta = jnp.maximum(z[:, 0, :] @ p['fc1_w'] + p['fc1_b'][0], 0.0)
    theta = theta @ p['fc2_w'] + p['fc2_b'][0]
    theta = 2.0 * jax.nn.sigmoid(theta) - 1.0
    lambdas = jnp.array([1.0] * k + [0.5] * k, jnp.float32)
    init_v = jnp.array([1.0] + [0.0] * (2 * k - 1), jnp.float32)
    coefs = theta.reshape(-1, hid, 2 * k) * lambdas + init_v

    pad = ks // 2
    dn = ('NCHW', 'OIHW', 'NCHW')
    w_dw1 = p['dw1_w'].T.reshape(hid, 1, ks, ks)
    w_dw2 = p['dw2_w'].T.reshape(hid, 1, ks, ks)
    w_pw1 = p['pw1_w'].T.reshape(inp, hid, 1, 1)
    w_pw2 = p['pw2_w'].T.reshape(out_ch, hid, 1, 1)

    y = lax.conv_general_dilated(x, w_dw1, (stride, stride), ((pad, pad), (pad, pad)),
                                 dimension_numbers=dn, feature_group_count=inp)
    y = bn(y, p['dw_bn1_g'], p['dw_bn1_b'], p['dw_bn1_m'], p['dw_bn1_v'])
    y = dyrelu(y, coefs)
    y = lax.conv_general_dilated(y, w_pw1, (1, 1), ((0, 0), (0, 0)), dimension_numbers=dn)
    y = bn(y, p['pw_bn1_g'], p['pw_bn1_b'], p['pw_bn1_m'], p['pw_bn1_v'])
    y = jnp.maximum(y, 0.0)
    y = lax.conv_general_dilated(y, w_dw2, (1, 1), ((pad, pad), (pad, pad)),
                                 dimension_numbers=dn, feature_group_count=inp)
    y = bn(y, p['dw_bn2_g'], p['dw_bn2_b'], p['dw_bn2_m'], p['dw_bn2_v'])
    y = dyrelu(y, coefs)
    y = lax.conv_general_dilated(y, w_pw2, (1, 1), ((0, 0), (0, 0)), dimension_numbers=dn)
    y = bn(y, p['pw_bn2_g'], p['pw_bn2_b'], p['pw_bn2_m'], p['pw_bn2_v'])
    return y


# ---------------------------------------------------------------------------
if __name__ == "__main__":
    B, inp, hid, out_ch = 2, 4, 8, 8
    H = W = 16
    ks, stride = 3, 2
    dim, reduction, k = 32, 4, 2
    M = 8   # number of tokens in z

    key = jax.random.PRNGKey(0)
    subkeys = iter(jax.random.split(key, 32))

    def nrm(shape, scale=0.2):
        return (scale * jax.random.normal(next(subkeys), shape)).astype(jnp.float32)

    def pos(shape):
        return (0.5 + jax.random.uniform(next(subkeys), shape)).astype(jnp.float32)

    dr = dim // reduction
    params = dict(
        fc1_w=nrm((dim, dr)), fc1_b=nrm((1, dr)),
        fc2_w=nrm((dr, 2 * k * hid)), fc2_b=nrm((1, 2 * k * hid)),
        dw1_w=nrm((ks * ks, hid)),                           # taps of (hid,1,ks,ks)
        dw_bn1_g=pos((hid,)), dw_bn1_b=nrm((hid,)), dw_bn1_m=nrm((hid,)), dw_bn1_v=pos((hid,)),
        pw1_w=nrm((hid, inp)),                               # (Cin, Cout) of 1x1 conv
        pw_bn1_g=pos((inp,)), pw_bn1_b=nrm((inp,)), pw_bn1_m=nrm((inp,)), pw_bn1_v=pos((inp,)),
        dw2_w=nrm((ks * ks, hid)),
        dw_bn2_g=pos((hid,)), dw_bn2_b=nrm((hid,)), dw_bn2_m=nrm((hid,)), dw_bn2_v=pos((hid,)),
        pw2_w=nrm((hid, out_ch)),
        pw_bn2_g=pos((out_ch,)), pw_bn2_b=nrm((out_ch,)), pw_bn2_m=nrm((out_ch,)), pw_bn2_v=pos((out_ch,)),
    )

    x = nrm((B, inp, H, W), scale=1.0)      # NCHW input, like the PyTorch module
    z = nrm((B, M, dim), scale=1.0)         # token tensor

    y = mobile_down_forward(x, z, params, ks=ks, inp=inp, hid=hid, out=out_ch,
                            stride=stride, dim=dim, reduction=reduction, k=k)
    y = jax.block_until_ready(y)

    y_ref = torch_style_reference(x, z, params, ks=ks, inp=inp, hid=hid, out_ch=out_ch,
                                  stride=stride, dim=dim, reduction=reduction, k=k)

    assert y.shape == (B, out_ch, H // stride, W // stride), y.shape
    assert jnp.allclose(y, y_ref, atol=2e-4, rtol=2e-4), float(jnp.max(jnp.abs(y - y_ref)))
    print("KERNEL_OK")
</pallas_src>

<mosaic_0001>
module attributes {stable_mosaic.version = 11 : i64} {
  func.func @fused_kernel(%arg0: i32, %arg1: memref<2x32xf32, #tpu.memory_space<vmem>>, %arg2: memref<4x2x9x9x8xf32, #tpu.memory_space<vmem>>, %arg3: memref<32x8xf32, #tpu.memory_space<vmem>>, %arg4: memref<1x8xf32, #tpu.memory_space<vmem>>, %arg5: memref<8x32xf32, #tpu.memory_space<vmem>>, %arg6: memref<1x32xf32, #tpu.memory_space<vmem>>, %arg7: memref<1x32xf32, #tpu.memory_space<vmem>>, %arg8: memref<1x32xf32, #tpu.memory_space<vmem>>, %arg9: memref<9x8xf32, #tpu.memory_space<vmem>>, %arg10: memref<1x8xf32, #tpu.memory_space<vmem>>, %arg11: memref<8x8xf32, #tpu.memory_space<vmem>>, %arg12: memref<1x8xf32, #tpu.memory_space<vmem>>, %arg13: memref<9x8xf32, #tpu.memory_space<vmem>>, %arg14: memref<1x8xf32, #tpu.memory_space<vmem>>, %arg15: memref<8x8xf32, #tpu.memory_space<vmem>>, %arg16: memref<1x8xf32, #tpu.memory_space<vmem>>, %arg17: memref<2x8x8x8xf32, #tpu.memory_space<vmem>>, %arg18: memref<2x10x10x8xf32, #tpu.memory_space<vmem>>) attributes {dimension_semantics = [#tpu.dimension_semantics<arbitrary>], iteration_bounds = array<i64: 1>, scalar_prefetch = 0 : i64, scratch_operands = 1 : i64, tpu.core_type = #tpu.core_type<tc>, window_params = [{pipeline_mode = #tpu.pipeline_mode<synchronous>, transform_indices = @transform_0, window_bounds = array<i64: 2, 32>}, {pipeline_mode = #tpu.pipeline_mode<synchronous>, transform_indices = @transform_1, window_bounds = array<i64: 4, 2, 9, 9, 8>}, {pipeline_mode = #tpu.pipeline_mode<synchronous>, transform_indices = @transform_2, window_bounds = array<i64: 32, 8>}, {pipeline_mode = #tpu.pipeline_mode<synchronous>, transform_indices = @transform_3, window_bounds = array<i64: 1, 8>}, {pipeline_mode = #tpu.pipeline_mode<synchronous>, transform_indices = @transform_4, window_bounds = array<i64: 8, 32>}, {pipeline_mode = #tpu.pipeline_mode<synchronous>, transform_indices = @transform_5, window_bounds = array<i64: 1, 32>}, {pipeline_mode = #tpu.pipeline_mode<synchronous>, transform_indices = @transform_6, window_bounds = array<i64: 1, 32>}, {pipeline_mode = #tpu.pipeline_mode<synchronous>, transform_indices = @transform_7, window_bounds = array<i64: 1, 32>}, {pipeline_mode = #tpu.pipeline_mode<synchronous>, transform_indices = @transform_8, window_bounds = array<i64: 9, 8>}, {pipeline_mode = #tpu.pipeline_mode<synchronous>, transform_indices = @transform_9, window_bounds = array<i64: 1, 8>}, {pipeline_mode = #tpu.pipeline_mode<synchronous>, transform_indices = @transform_10, window_bounds = array<i64: 8, 8>}, {pipeline_mode = #tpu.pipeline_mode<synchronous>, transform_indices = @transform_11, window_bounds = array<i64: 1, 8>}, {pipeline_mode = #tpu.pipeline_mode<synchronous>, transform_indices = @transform_12, window_bounds = array<i64: 9, 8>}, {pipeline_mode = #tpu.pipeline_mode<synchronous>, transform_indices = @transform_13, window_bounds = array<i64: 1, 8>}, {pipeline_mode = #tpu.pipeline_mode<synchronous>, transform_indices = @transform_14, window_bounds = array<i64: 8, 8>}, {pipeline_mode = #tpu.pipeline_mode<synchronous>, transform_indices = @transform_15, window_bounds = array<i64: 1, 8>}, {pipeline_mode = #tpu.pipeline_mode<synchronous>, transform_indices = @transform_16, window_bounds = array<i64: 2, 8, 8, 8>}]} {
    %c0 = arith.constant 0 : index
    %c0_0 = arith.constant 0 : index
    %0 = vector.load %arg1[%c0, %c0_0] : memref<2x32xf32, #tpu.memory_space<vmem>>, vector<2x32xf32>
    %c0_1 = arith.constant 0 : index
    %c0_2 = arith.constant 0 : index
    %1 = vector.load %arg3[%c0_1, %c0_2] : memref<32x8xf32, #tpu.memory_space<vmem>>, vector<32x8xf32>
    %cst = arith.constant dense<0.000000e+00> : vector<2x8xf32>
    %2 = tpu.matmul %0, %1, %cst {dimension_numbers = #tpu.dot_dimension_numbers<[1], [0], [0], [1], [0, 0, 1, 1], [], []>} : vector<2x32xf32>, vector<32x8xf32>, vector<2x8xf32> -> vector<2x8xf32>
    %c0_3 = arith.constant 0 : index
    %c0_4 = arith.constant 0 : index
    %3 = vector.load %arg4[%c0_3, %c0_4] : memref<1x8xf32, #tpu.memory_space<vmem>>, vector<1x8xf32>
    %4 = vector.broadcast %3 : vector<1x8xf32> to vector<2x8xf32>
    %5 = arith.addf %2, %4 : vector<2x8xf32>
    %cst_5 = arith.constant 0.000000e+00 : f32
    %6 = vector.broadcast %cst_5 : f32 to vector<2x8xf32>
    %7 = arith.maximumf %5, %6 : vector<2x8xf32>
    %c0_6 = arith.constant 0 : index
    %c0_7 = arith.constant 0 : index
    %8 = vector.load %arg5[%c0_6, %c0_7] : memref<8x32xf32, #tpu.memory_space<vmem>>, vector<8x32xf32>
    %cst_8 = arith.constant dense<0.000000e+00> : vector<2x32xf32>
    %9 = tpu.matmul %7, %8, %cst_8 {dimension_numbers = #tpu.dot_dimension_numbers<[1], [0], [0], [1], [0, 0, 1, 1], [], []>} : vector<2x8xf32>, vector<8x32xf32>, vector<2x32xf32> -> vector<2x32xf32>
    %c0_9 = arith.constant 0 : index
    %c0_10 = arith.constant 0 : index
    %10 = vector.load %arg6[%c0_9, %c0_10] : memref<1x32xf32, #tpu.memory_space<vmem>>, vector<1x32xf32>
    %11 = vector.broadcast %10 : vector<1x32xf32> to vector<2x32xf32>
    %12 = arith.addf %9, %11 : vector<2x32xf32>
    %cst_11 = arith.constant 5.000000e-01 : f32
    %13 = vector.broadcast %cst_11 : f32 to vector<2x32xf32>
    %14 = arith.mulf %13, %12 : vector<2x32xf32>
    %15 = math.tanh %14 : vector<2x32xf32>
    %c0_12 = arith.constant 0 : index
    %c0_13 = arith.constant 0 : index
    %16 = vector.load %arg7[%c0_12, %c0_13] : memref<1x32xf32, #tpu.memory_space<vmem>>, vector<1x32xf32>
    %17 = vector.broadcast %16 : vector<1x32xf32> to vector<2x32xf32>
    %18 = arith.mulf %15, %17 : vector<2x32xf32>
    %c0_14 = arith.constant 0 : index
    %c0_15 = arith.constant 0 : index
    %19 = vector.load %arg8[%c0_14, %c0_15] : memref<1x32xf32, #tpu.memory_space<vmem>>, vector<1x32xf32>
    %20 = vector.broadcast %19 : vector<1x32xf32> to vector<2x32xf32>
    %21 = arith.addf %18, %20 : vector<2x32xf32>
    %22 = vector.extract_strided_slice %21 {offsets = [0, 0], sizes = [2, 8], strides = [1, 1]} : vector<2x32xf32> to vector<2x8xf32>
    %23 = vector.shape_cast %22 : vector<2x8xf32> to vector<2x1x1x8xf32>
    %24 = vector.extract_strided_slice %21 {offsets = [0, 8], sizes = [2, 8], strides = [1, 1]} : vector<2x32xf32> to vector<2x8xf32>
    %25 = vector.shape_cast %24 : vector<2x8xf32> to vector<2x1x1x8xf32>
    %26 = vector.extract_strided_slice %21 {offsets = [0, 16], sizes = [2, 8], strides = [1, 1]} : vector<2x32xf32> to vector<2x8xf32>
    %27 = vector.shape_cast %26 : vector<2x8xf32> to vector<2x1x1x8xf32>
    %28 = vector.extract_strided_slice %21 {offsets = [0, 24], sizes = [2, 8], strides = [1, 1]} : vector<2x32xf32> to vector<2x8xf32>
    %29 = vector.shape_cast %28 : vector<2x8xf32> to vector<2x1x1x8xf32>
    %c0_16 = arith.constant 0 : index
    %c0_17 = arith.constant 0 : index
    %30 = vector.load %arg9[%c0_16, %c0_17] : memref<9x8xf32, #tpu.memory_space<vmem>>, vector<9x8xf32>
    %c0_18 = arith.constant 0 : index
    %c0_19 = arith.constant 0 : index
    %c0_20 = arith.constant 0 : index
    %c0_21 = arith.constant 0 : index
    %c0_22 = arith.constant 0 : index
    %31 = vector.load %arg2[%c0_18, %c0_19, %c0_20, %c0_21, %c0_22] : memref<4x2x9x9x8xf32, #tpu.memory_space<vmem>>, vector<1x2x8x8x8xf32>
    %32 = vector.shape_cast %31 : vector<1x2x8x8x8xf32> to vector<2x8x8x8xf32>
    %33 = vector.extract_strided_slice %30 {offsets = [0, 0], sizes = [1, 8], strides = [1, 1]} : vector<9x8xf32> to vector<1x8xf32>
    %34 = vector.shape_cast %33 : vector<1x8xf32> to vector<1x1x1x8xf32>
    %35 = vector.broadcast %34 : vector<1x1x1x8xf32> to vector<2x8x8x8xf32>
    %36 = arith.mulf %32, %35 : vector<2x8x8x8xf32>
    %c1 = arith.constant 1 : index
    %c0_23 = arith.constant 0 : index
    %c0_24 = arith.constant 0 : index
    %c0_25 = arith.constant 0 : index
    %c0_26 = arith.constant 0 : index
    %37 = vector.load %arg2[%c1, %c0_23, %c0_24, %c0_25, %c0_26] : memref<4x2x9x9x8xf32, #tpu.memory_space<vmem>>, vector<1x2x8x8x8xf32>
    %38 = vector.shape_cast %37 : vector<1x2x8x8x8xf32> to vector<2x8x8x8xf32>
    %39 = vector.extract_strided_slice %30 {offsets = [1, 0], sizes = [1, 8], strides = [1, 1]} : vector<9x8xf32> to vector<1x8xf32>
    %40 = vector.shape_cast %39 : vector<1x8xf32> to vector<1x1x1x8xf32>
    %41 = vector.broadcast %40 : vector<1x1x1x8xf32> to vector<2x8x8x8xf32>
    %42 = arith.mulf %38, %41 : vector<2x8x8x8xf32>
    %43 = arith.addf %36, %42 : vector<2x8x8x8xf32>
    %c0_27 = arith.constant 0 : index
    %c0_28 = arith.constant 0 : index
    %c0_29 = arith.constant 0 : index
    %c1_30 = arith.constant 1 : index
    %c0_31 = arith.constant 0 : index
    %44 = vector.load %arg2[%c0_27, %c0_28, %c0_29, %c1_30, %c0_31] : memref<4x2x9x9x8xf32, #tpu.memory_space<vmem>>, vector<1x2x8x8x8xf32>
    %45 = vector.shape_cast %44 : vector<1x2x8x8x8xf32> to vector<2x8x8x8xf32>
    %46 = vector.extract_strided_slice %30 {offsets = [2, 0], sizes = [1, 8], strides = [1, 1]} : vector<9x8xf32> to vector<1x8xf32>
    %47 = vector.shape_cast %46 : vector<1x8xf32> to vector<1x1x1x8xf32>
    %48 = vector.broadcast %47 : vector<1x1x1x8xf32> to vector<2x8x8x8xf32>
    %49 = arith.mulf %45, %48 : vector<2x8x8x8xf32>
    %50 = arith.addf %43, %49 : vector<2x8x8x8xf32>
    %c2 = arith.constant 2 : index
    %c0_32 = arith.constant 0 : index
    %c0_33 = arith.constant 0 : index
    %c0_34 = arith.constant 0 : index
    %c0_35 = arith.constant 0 : index
    %51 = vector.load %arg2[%c2, %c0_32, %c0_33, %c0_34, %c0_35] : memref<4x2x9x9x8xf32, #tpu.memory_space<vmem>>, vector<1x2x8x8x8xf32>
    %52 = vector.shape_cast %51 : vector<1x2x8x8x8xf32> to vector<2x8x8x8xf32>
    %53 = vector.extract_strided_slice %30 {offsets = [3, 0], sizes = [1, 8], strides = [1, 1]} : vector<9x8xf32> to vector<1x8xf32>
    %54 = vector.shape_cast %53 : vector<1x8xf32> to vector<1x1x1x8xf32>
    %55 = vector.broadcast %54 : vector<1x1x1x8xf32> to vector<2x8x8x8xf32>
    %56 = arith.mulf %52, %55 : vector<2x8x8x8xf32>
    %57 = arith.addf %50, %56 : vector<2x8x8x8xf32>
    %c3 = arith.constant 3 : index
    %c0_36 = arith.constant 0 : index
    %c0_37 = arith.constant 0 : index
    %c0_38 = arith.constant 0 : index
    %c0_39 = arith.constant 0 : index
    %58 = vector.load %arg2[%c3, %c0_36, %c0_37, %c0_38, %c0_39] : memref<4x2x9x9x8xf32, #tpu.memory_space<vmem>>, vector<1x2x8x8x8xf32>
    %59 = vector.shape_cast %58 : vector<1x2x8x8x8xf32> to vector<2x8x8x8xf32>
    %60 = vector.extract_strided_slice %30 {offsets = [4, 0], sizes = [1, 8], strides = [1, 1]} : vector<9x8xf32> to vector<1x8xf32>
    %61 = vector.shape_cast %60 : vector<1x8xf32> to vector<1x1x1x8xf32>
    %62 = vector.broadcast %61 : vector<1x1x1x8xf32> to vector<2x8x8x8xf32>
    %63 = arith.mulf %59, %62 : vector<2x8x8x8xf32>
    %64 = arith.addf %57, %63 : vector<2x8x8x8xf32>
    %c2_40 = arith.constant 2 : index
    %c0_41 = arith.constant 0 : index
    %c0_42 = arith.constant 0 : index
    %c1_43 = arith.constant 1 : index
    %c0_44 = arith.constant 0 : index
    %65 = vector.load %arg2[%c2_40, %c0_41, %c0_42, %c1_43, %c0_44] : memref<4x2x9x9x8xf32, #tpu.memory_space<vmem>>, vector<1x2x8x8x8xf32>
    %66 = vector.shape_cast %65 : vector<1x2x8x8x8xf32> to vector<2x8x8x8xf32>
    %67 = vector.extract_strided_slice %30 {offsets = [5, 0], sizes = [1, 8], strides = [1, 1]} : vector<9x8xf32> to vector<1x8xf32>
    %68 = vector.shape_cast %67 : vector<1x8xf32> to vector<1x1x1x8xf32>
    %69 = vector.broadcast %68 : vector<1x1x1x8xf32> to vector<2x8x8x8xf32>
    %70 = arith.mulf %66, %69 : vector<2x8x8x8xf32>
    %71 = arith.addf %64, %70 : vector<2x8x8x8xf32>
    %c0_45 = arith.constant 0 : index
    %c0_46 = arith.constant 0 : index
    %c1_47 = arith.constant 1 : index
    %c0_48 = arith.constant 0 : index
    %c0_49 = arith.constant 0 : index
    %72 = vector.load %arg2[%c0_45, %c0_46, %c1_47, %c0_48, %c0_49] : memref<4x2x9x9x8xf32, #tpu.memory_space<vmem>>, vector<1x2x8x8x8xf32>
    %73 = vector.shape_cast %72 : vector<1x2x8x8x8xf32> to vector<2x8x8x8xf32>
    %74 = vector.extract_strided_slice %30 {offsets = [6, 0], sizes = [1, 8], strides = [1, 1]} : vector<9x8xf32> to vector<1x8xf32>
    %75 = vector.shape_cast %74 : vector<1x8xf32> to vector<1x1x1x8xf32>
    %76 = vector.broadcast %75 : vector<1x1x1x8xf32> to vector<2x8x8x8xf32>
    %77 = arith.mulf %73, %76 : vector<2x8x8x8xf32>
    %78 = arith.addf %71, %77 : vector<2x8x8x8xf32>
    %c1_50 = arith.constant 1 : index
    %c0_51 = arith.constant 0 : index
    %c1_52 = arith.constant 1 : index
    %c0_53 = arith.constant 0 : index
    %c0_54 = arith.constant 0 : index
    %79 = vector.load %arg2[%c1_50, %c0_51, %c1_52, %c0_53, %c0_54] : memref<4x2x9x9x8xf32, #tpu.memory_space<vmem>>, vector<1x2x8x8x8xf32>
    %80 = vector.shape_cast %79 : vector<1x2x8x8x8xf32> to vector<2x8x8x8xf32>
    %81 = vector.extract_strided_slice %30 {offsets = [7, 0], sizes = [1, 8], strides = [1, 1]} : vector<9x8xf32> to vector<1x8xf32>
    %82 = vector.shape_cast %81 : vector<1x8xf32> to vector<1x1x1x8xf32>
    %83 = vector.broadcast %82 : vector<1x1x1x8xf32> to vector<2x8x8x8xf32>
    %84 = arith.mulf %80, %83 : vector<2x8x8x8xf32>
    %85 = arith.addf %78, %84 : vector<2x8x8x8xf32>
    %c0_55 = arith.constant 0 : index
    %c0_56 = arith.constant 0 : index
    %c1_57 = arith.constant 1 : index
    %c1_58 = arith.constant 1 : index
    %c0_59 = arith.constant 0 : index
    %86 = vector.load %arg2[%c0_55, %c0_56, %c1_57, %c1_58, %c0_59] : memref<4x2x9x9x8xf32, #tpu.memory_space<vmem>>, vector<1x2x8x8x8xf32>
    %87 = vector.shape_cast %86 : vector<1x2x8x8x8xf32> to vector<2x8x8x8xf32>
    %88 = vector.extract_strided_slice %30 {offsets = [8, 0], sizes = [1, 8], strides = [1, 1]} : vector<9x8xf32> to vector<1x8xf32>
    %89 = vector.shape_cast %88 : vector<1x8xf32> to vector<1x1x1x8xf32>
    %90 = vector.broadcast %89 : vector<1x1x1x8xf32> to vector<2x8x8x8xf32>
    %91 = arith.mulf %87, %90 : vector<2x8x8x8xf32>
    %92 = arith.addf %85, %91 : vector<2x8x8x8xf32>
    %c0_60 = arith.constant 0 : index
    %c0_61 = arith.constant 0 : index
    %93 = vector.load %arg10[%c0_60, %c0_61] : memref<1x8xf32, #tpu.memory_space<vmem>>, vector<1x8xf32>
    %94 = vector.shape_cast %93 : vector<1x8xf32> to vector<1x1x1x8xf32>
    %95 = vector.broadcast %94 : vector<1x1x1x8xf32> to vector<2x8x8x8xf32>
    %96 = arith.addf %92, %95 : vector<2x8x8x8xf32>
    %97 = vector.broadcast %23 : vector<2x1x1x8xf32> to vector<2x8x8x8xf32>
    %98 = arith.mulf %96, %97 : vector<2x8x8x8xf32>
    %99 = vector.broadcast %27 : vector<2x1x1x8xf32> to vector<2x8x8x8xf32>
    %100 = arith.addf %98, %99 : vector<2x8x8x8xf32>
    %101 = vector.broadcast %25 : vector<2x1x1x8xf32> to vector<2x8x8x8xf32>
    %102 = arith.mulf %96, %101 : vector<2x8x8x8xf32>
    %103 = vector.broadcast %29 : vector<2x1x1x8xf32> to vector<2x8x8x8xf32>
    %104 = arith.addf %102, %103 : vector<2x8x8x8xf32>
    %105 = arith.maximumf %100, %104 : vector<2x8x8x8xf32>
    %c0_62 = arith.constant 0 : index
    %c0_63 = arith.constant 0 : index
    %106 = vector.load %arg11[%c0_62, %c0_63] : memref<8x8xf32, #tpu.memory_space<vmem>>, vector<8x8xf32>
    %107 = vector.extract_strided_slice %105 {offsets = [0, 0, 0, 0], sizes = [2, 8, 8, 1], strides = [1, 1, 1, 1]} : vector<2x8x8x8xf32> to vector<2x8x8x1xf32>
    %108 = vector.extract_strided_slice %106 {offsets = [0, 0], sizes = [1, 8], strides = [1, 1]} : vector<8x8xf32> to vector<1x8xf32>
    %109 = vector.shape_cast %108 : vector<1x8xf32> to vector<1x1x1x8xf32>
    %110 = vector.broadcast %107 : vector<2x8x8x1xf32> to vector<2x8x8x8xf32>
    %111 = vector.broadcast %109 : vector<1x1x1x8xf32> to vector<2x8x8x8xf32>
    %112 = arith.mulf %110, %111 : vector<2x8x8x8xf32>
    %113 = vector.extract_strided_slice %105 {offsets = [0, 0, 0, 1], sizes = [2, 8, 8, 1], strides = [1, 1, 1, 1]} : vector<2x8x8x8xf32> to vector<2x8x8x1xf32>
    %114 = vector.extract_strided_slice %106 {offsets = [1, 0], sizes = [1, 8], strides = [1, 1]} : vector<8x8xf32> to vector<1x8xf32>
    %115 = vector.shape_cast %114 : vector<1x8xf32> to vector<1x1x1x8xf32>
    %116 = vector.broadcast %113 : vector<2x8x8x1xf32> to vector<2x8x8x8xf32>
    %117 = vector.broadcast %115 : vector<1x1x1x8xf32> to vector<2x8x8x8xf32>
    %118 = arith.mulf %116, %117 : vector<2x8x8x8xf32>
    %119 = arith.addf %112, %118 : vector<2x8x8x8xf32>
    %120 = vector.extract_strided_slice %105 {offsets = [0, 0, 0, 2], sizes = [2, 8, 8, 1], strides = [1, 1, 1, 1]} : vector<2x8x8x8xf32> to vector<2x8x8x1xf32>
    %121 = vector.extract_strided_slice %106 {offsets = [2, 0], sizes = [1, 8], strides = [1, 1]} : vector<8x8xf32> to vector<1x8xf32>
    %122 = vector.shape_cast %121 : vector<1x8xf32> to vector<1x1x1x8xf32>
    %123 = vector.broadcast %120 : vector<2x8x8x1xf32> to vector<2x8x8x8xf32>
    %124 = vector.broadcast %122 : vector<1x1x1x8xf32> to vector<2x8x8x8xf32>
    %125 = arith.mulf %123, %124 : vector<2x8x8x8xf32>
    %126 = arith.addf %119, %125 : vector<2x8x8x8xf32>
    %127 = vector.extract_strided_slice %105 {offsets = [0, 0, 0, 3], sizes = [2, 8, 8, 1], strides = [1, 1, 1, 1]} : vector<2x8x8x8xf32> to vector<2x8x8x1xf32>
    %128 = vector.extract_strided_slice %106 {offsets = [3, 0], sizes = [1, 8], strides = [1, 1]} : vector<8x8xf32> to vector<1x8xf32>
    %129 = vector.shape_cast %128 : vector<1x8xf32> to vector<1x1x1x8xf32>
    %130 = vector.broadcast %127 : vector<2x8x8x1xf32> to vector<2x8x8x8xf32>
    %131 = vector.broadcast %129 : vector<1x1x1x8xf32> to vector<2x8x8x8xf32>
    %132 = arith.mulf %130, %131 : vector<2x8x8x8xf32>
    %133 = arith.addf %126, %132 : vector<2x8x8x8xf32>
    %134 = vector.extract_strided_slice %105 {offsets = [0, 0, 0, 4], sizes = [2, 8, 8, 1], strides = [1, 1, 1, 1]} : vector<2x8x8x8xf32> to vector<2x8x8x1xf32>
    %135 = vector.extract_strided_slice %106 {offsets = [4, 0], sizes = [1, 8], strides = [1, 1]} : vector<8x8xf32> to vector<1x8xf32>
    %136 = vector.shape_cast %135 : vector<1x8xf32> to vector<1x1x1x8xf32>
    %137 = vector.broadcast %134 : vector<2x8x8x1xf32> to vector<2x8x8x8xf32>
    %138 = vector.broadcast %136 : vector<1x1x1x8xf32> to vector<2x8x8x8xf32>
    %139 = arith.mulf %137, %138 : vector<2x8x8x8xf32>
    %140 = arith.addf %133, %139 : vector<2x8x8x8xf32>
    %141 = vector.extract_strided_slice %105 {offsets = [0, 0, 0, 5], sizes = [2, 8, 8, 1], strides = [1, 1, 1, 1]} : vector<2x8x8x8xf32> to vector<2x8x8x1xf32>
    %142 = vector.extract_strided_slice %106 {offsets = [5, 0], sizes = [1, 8], strides = [1, 1]} : vector<8x8xf32> to vector<1x8xf32>
    %143 = vector.shape_cast %142 : vector<1x8xf32> to vector<1x1x1x8xf32>
    %144 = vector.broadcast %141 : vector<2x8x8x1xf32> to vector<2x8x8x8xf32>
    %145 = vector.broadcast %143 : vector<1x1x1x8xf32> to vector<2x8x8x8xf32>
    %146 = arith.mulf %144, %145 : vector<2x8x8x8xf32>
    %147 = arith.addf %140, %146 : vector<2x8x8x8xf32>
    %148 = vector.extract_strided_slice %105 {offsets = [0, 0, 0, 6], sizes = [2, 8, 8, 1], strides = [1, 1, 1, 1]} : vector<2x8x8x8xf32> to vector<2x8x8x1xf32>
    %149 = vector.extract_strided_slice %106 {offsets = [6, 0], sizes = [1, 8], strides = [1, 1]} : vector<8x8xf32> to vector<1x8xf32>
    %150 = vector.shape_cast %149 : vector<1x8xf32> to vector<1x1x1x8xf32>
    %151 = vector.broadcast %148 : vector<2x8x8x1xf32> to vector<2x8x8x8xf32>
    %152 = vector.broadcast %150 : vector<1x1x1x8xf32> to vector<2x8x8x8xf32>
    %153 = arith.mulf %151, %152 : vector<2x8x8x8xf32>
    %154 = arith.addf %147, %153 : vector<2x8x8x8xf32>
    %155 = vector.extract_strided_slice %105 {offsets = [0, 0, 0, 7], sizes = [2, 8, 8, 1], strides = [1, 1, 1, 1]} : vector<2x8x8x8xf32> to vector<2x8x8x1xf32>
    %156 = vector.extract_strided_slice %106 {offsets = [7, 0], sizes = [1, 8], strides = [1, 1]} : vector<8x8xf32> to vector<1x8xf32>
    %157 = vector.shape_cast %156 : vector<1x8xf32> to vector<1x1x1x8xf32>
    %158 = vector.broadcast %155 : vector<2x8x8x1xf32> to vector<2x8x8x8xf32>
    %159 = vector.broadcast %157 : vector<1x1x1x8xf32> to vector<2x8x8x8xf32>
    %160 = arith.mulf %158, %159 : vector<2x8x8x8xf32>
    %161 = arith.addf %154, %160 : vector<2x8x8x8xf32>
    %c0_64 = arith.constant 0 : index
    %c0_65 = arith.constant 0 : index
    %162 = vector.load %arg12[%c0_64, %c0_65] : memref<1x8xf32, #tpu.memory_space<vmem>>, vector<1x8xf32>
    %163 = vector.shape_cast %162 : vector<1x8xf32> to vector<1x1x1x8xf32>
    %164 = vector.broadcast %163 : vector<1x1x1x8xf32> to vector<2x8x8x8xf32>
    %165 = arith.addf %161, %164 : vector<2x8x8x8xf32>
    %cst_66 = arith.constant 0.000000e+00 : f32
    %166 = vector.broadcast %cst_66 : f32 to vector<2x8x8x8xf32>
    %167 = arith.maximumf %165, %166 : vector<2x8x8x8xf32>
    %cst_67 = arith.constant 0.000000e+00 : f32
    %168 = vector.broadcast %cst_67 : f32 to vector<2x10x10x8xf32>
    %c0_68 = arith.constant 0 : index
    %c0_69 = arith.constant 0 : index
    %c0_70 = arith.constant 0 : index
    %c0_71 = arith.constant 0 : index
    %169 = vector.load %arg18[%c0_68, %c0_69, %c0_70, %c0_71] : memref<2x10x10x8xf32, #tpu.memory_space<vmem>>, vector<2x10x10x8xf32>
    tpu.vector_store %arg18[%c0_68, %c0_69, %c0_70, %c0_71], %168 {strides = array<i32>} : memref<2x10x10x8xf32, #tpu.memory_space<vmem>>, vector<2x10x10x8xf32>,
    %c0_72 = arith.constant 0 : index
    %c1_73 = arith.constant 1 : index
    %c1_74 = arith.constant 1 : index
    %c0_75 = arith.constant 0 : index
    %170 = vector.load %arg18[%c0_72, %c1_73, %c1_74, %c0_75] : memref<2x10x10x8xf32, #tpu.memory_space<vmem>>, vector<2x8x8x8xf32>
    tpu.vector_store %arg18[%c0_72, %c1_73, %c1_74, %c0_75], %167 {strides = array<i32>} : memref<2x10x10x8xf32, #tpu.memory_space<vmem>>, vector<2x8x8x8xf32>,
    %c0_76 = arith.constant 0 : index
    %c0_77 = arith.constant 0 : index
    %171 = vector.load %arg13[%c0_76, %c0_77] : memref<9x8xf32, #tpu.memory_space<vmem>>, vector<9x8xf32>
    %c0_78 = arith.constant 0 : index
    %c0_79 = arith.constant 0 : index
    %c0_80 = arith.constant 0 : index
    %c0_81 = arith.constant 0 : index
    %172 = vector.load %arg18[%c0_78, %c0_79, %c0_80, %c0_81] : memref<2x10x10x8xf32, #tpu.memory_space<vmem>>, vector<2x8x8x8xf32>
    %173 = vector.extract_strided_slice %171 {offsets = [0, 0], sizes = [1, 8], strides = [1, 1]} : vector<9x8xf32> to vector<1x8xf32>
    %174 = vector.shape_cast %173 : vector<1x8xf32> to vector<1x1x1x8xf32>
    %175 = vector.broadcast %174 : vector<1x1x1x8xf32> to vector<2x8x8x8xf32>
    %176 = arith.mulf %172, %175 : vector<2x8x8x8xf32>
    %c0_82 = arith.constant 0 : index
    %c0_83 = arith.constant 0 : index
    %c1_84 = arith.constant 1 : index
    %c0_85 = arith.constant 0 : index
    %177 = vector.load %arg18[%c0_82, %c0_83, %c1_84, %c0_85] : memref<2x10x10x8xf32, #tpu.memory_space<vmem>>, vector<2x8x8x8xf32>
    %178 = vector.extract_strided_slice %171 {offsets = [1, 0], sizes = [1, 8], strides = [1, 1]} : vector<9x8xf32> to vector<1x8xf32>
    %179 = vector.shape_cast %178 : vector<1x8xf32> to vector<1x1x1x8xf32>
    %180 = vector.broadcast %179 : vector<1x1x1x8xf32> to vector<2x8x8x8xf32>
    %181 = arith.mulf %177, %180 : vector<2x8x8x8xf32>
    %182 = arith.addf %176, %181 : vector<2x8x8x8xf32>
    %c0_86 = arith.constant 0 : index
    %c0_87 = arith.constant 0 : index
    %c2_88 = arith.constant 2 : index
    %c0_89 = arith.constant 0 : index
    %183 = vector.load %arg18[%c0_86, %c0_87, %c2_88, %c0_89] : memref<2x10x10x8xf32, #tpu.memory_space<vmem>>, vector<2x8x8x8xf32>
    %184 = vector.extract_strided_slice %171 {offsets = [2, 0], sizes = [1, 8], strides = [1, 1]} : vector<9x8xf32> to vector<1x8xf32>
    %185 = vector.shape_cast %184 : vector<1x8xf32> to vector<1x1x1x8xf32>
    %186 = vector.broadcast %185 : vector<1x1x1x8xf32> to vector<2x8x8x8xf32>
    %187 = arith.mulf %183, %186 : vector<2x8x8x8xf32>
    %188 = arith.addf %182, %187 : vector<2x8x8x8xf32>
    %c0_90 = arith.constant 0 : index
    %c1_91 = arith.constant 1 : index
    %c0_92 = arith.constant 0 : index
    %c0_93 = arith.constant 0 : index
    %189 = vector.load %arg18[%c0_90, %c1_91, %c0_92, %c0_93] : memref<2x10x10x8xf32, #tpu.memory_space<vmem>>, vector<2x8x8x8xf32>
    %190 = vector.extract_strided_slice %171 {offsets = [3, 0], sizes = [1, 8], strides = [1, 1]} : vector<9x8xf32> to vector<1x8xf32>
    %191 = vector.shape_cast %190 : vector<1x8xf32> to vector<1x1x1x8xf32>
    %192 = vector.broadcast %191 : vector<1x1x1x8xf32> to vector<2x8x8x8xf32>
    %193 = arith.mulf %189, %192 : vector<2x8x8x8xf32>
    %194 = arith.addf %188, %193 : vector<2x8x8x8xf32>
    %c0_94 = arith.constant 0 : index
    %c1_95 = arith.constant 1 : index
    %c1_96 = arith.constant 1 : index
    %c0_97 = arith.constant 0 : index
    %195 = vector.load %arg18[%c0_94, %c1_95, %c1_96, %c0_97] : memref<2x10x10x8xf32, #tpu.memory_space<vmem>>, vector<2x8x8x8xf32>
    %196 = vector.extract_strided_slice %171 {offsets = [4, 0], sizes = [1, 8], strides = [1, 1]} : vector<9x8xf32> to vector<1x8xf32>
    %197 = vector.shape_cast %196 : vector<1x8xf32> to vector<1x1x1x8xf32>
    %198 = vector.broadcast %197 : vector<1x1x1x8xf32> to vector<2x8x8x8xf32>
    %199 = arith.mulf %195, %198 : vector<2x8x8x8xf32>
    %200 = arith.addf %194, %199 : vector<2x8x8x8xf32>
    %c0_98 = arith.constant 0 : index
    %c1_99 = arith.constant 1 : index
    %c2_100 = arith.constant 2 : index
    %c0_101 = arith.constant 0 : index
    %201 = vector.load %arg18[%c0_98, %c1_99, %c2_100, %c0_101] : memref<2x10x10x8xf32, #tpu.memory_space<vmem>>, vector<2x8x8x8xf32>
    %202 = vector.extract_strided_slice %171 {offsets = [5, 0], sizes = [1, 8], strides = [1, 1]} : vector<9x8xf32> to vector<1x8xf32>
    %203 = vector.shape_cast %202 : vector<1x8xf32> to vector<1x1x1x8xf32>
    %204 = vector.broadcast %203 : vector<1x1x1x8xf32> to vector<2x8x8x8xf32>
    %205 = arith.mulf %201, %204 : vector<2x8x8x8xf32>
    %206 = arith.addf %200, %205 : vector<2x8x8x8xf32>
    %c0_102 = arith.constant 0 : index
    %c2_103 = arith.constant 2 : index
    %c0_104 = arith.constant 0 : index
    %c0_105 = arith.constant 0 : index
    %207 = vector.load %arg18[%c0_102, %c2_103, %c0_104, %c0_105] : memref<2x10x10x8xf32, #tpu.memory_space<vmem>>, vector<2x8x8x8xf32>
    %208 = vector.extract_strided_slice %171 {offsets = [6, 0], sizes = [1, 8], strides = [1, 1]} : vector<9x8xf32> to vector<1x8xf32>
    %209 = vector.shape_cast %208 : vector<1x8xf32> to vector<1x1x1x8xf32>
    %210 = vector.broadcast %209 : vector<1x1x1x8xf32> to vector<2x8x8x8xf32>
    %211 = arith.mulf %207, %210 : vector<2x8x8x8xf32>
    %212 = arith.addf %206, %211 : vector<2x8x8x8xf32>
    %c0_106 = arith.constant 0 : index
    %c2_107 = arith.constant 2 : index
    %c1_108 = arith.constant 1 : index
    %c0_109 = arith.constant 0 : index
    %213 = vector.load %arg18[%c0_106, %c2_107, %c1_108, %c0_109] : memref<2x10x10x8xf32, #tpu.memory_space<vmem>>, vector<2x8x8x8xf32>
    %214 = vector.extract_strided_slice %171 {offsets = [7, 0], sizes = [1, 8], strides = [1, 1]} : vector<9x8xf32> to vector<1x8xf32>
    %215 = vector.shape_cast %214 : vector<1x8xf32> to vector<1x1x1x8xf32>
    %216 = vector.broadcast %215 : vector<1x1x1x8xf32> to vector<2x8x8x8xf32>
    %217 = arith.mulf %213, %216 : vector<2x8x8x8xf32>
    %218 = arith.addf %212, %217 : vector<2x8x8x8xf32>
    %c0_110 = arith.constant 0 : index
    %c2_111 = arith.constant 2 : index
    %c2_112 = arith.constant 2 : index
    %c0_113 = arith.constant 0 : index
    %219 = vector.load %arg18[%c0_110, %c2_111, %c2_112, %c0_113] : memref<2x10x10x8xf32, #tpu.memory_space<vmem>>, vector<2x8x8x8xf32>
    %220 = vector.extract_strided_slice %171 {offsets = [8, 0], sizes = [1, 8], strides = [1, 1]} : vector<9x8xf32> to vector<1x8xf32>
    %221 = vector.shape_cast %220 : vector<1x8xf32> to vector<1x1x1x8xf32>
    %222 = vector.broadcast %221 : vector<1x1x1x8xf32> to vector<2x8x8x8xf32>
    %223 = arith.mulf %219, %222 : vector<2x8x8x8xf32>
    %224 = arith.addf %218, %223 : vector<2x8x8x8xf32>
    %c0_114 = arith.constant 0 : index
    %c0_115 = arith.constant 0 : index
    %225 = vector.load %arg14[%c0_114, %c0_115] : memref<1x8xf32, #tpu.memory_space<vmem>>, vector<1x8xf32>
    %226 = vector.shape_cast %225 : vector<1x8xf32> to vector<1x1x1x8xf32>
    %227 = vector.broadcast %226 : vector<1x1x1x8xf32> to vector<2x8x8x8xf32>
    %228 = arith.addf %224, %227 : vector<2x8x8x8xf32>
    %229 = vector.broadcast %23 : vector<2x1x1x8xf32> to vector<2x8x8x8xf32>
    %230 = arith.mulf %228, %229 : vector<2x8x8x8xf32>
    %231 = vector.broadcast %27 : vector<2x1x1x8xf32> to vector<2x8x8x8xf32>
    %232 = arith.addf %230, %231 : vector<2x8x8x8xf32>
    %233 = vector.broadcast %25 : vector<2x1x1x8xf32> to vector<2x8x8x8xf32>
    %234 = arith.mulf %228, %233 : vector<2x8x8x8xf32>
    %235 = vector.broadcast %29 : vector<2x1x1x8xf32> to vector<2x8x8x8xf32>
    %236 = arith.addf %234, %235 : vector<2x8x8x8xf32>
    %237 = arith.maximumf %232, %236 : vector<2x8x8x8xf32>
    %c0_116 = arith.constant 0 : index
    %c0_117 = arith.constant 0 : index
    %238 = vector.load %arg15[%c0_116, %c0_117] : memref<8x8xf32, #tpu.memory_space<vmem>>, vector<8x8xf32>
    %239 = vector.extract_strided_slice %237 {offsets = [0, 0, 0, 0], sizes = [2, 8, 8, 1], strides = [1, 1, 1, 1]} : vector<2x8x8x8xf32> to vector<2x8x8x1xf32>
    %240 = vector.extract_strided_slice %238 {offsets = [0, 0], sizes = [1, 8], strides = [1, 1]} : vector<8x8xf32> to vector<1x8xf32>
    %241 = vector.shape_cast %240 : vector<1x8xf32> to vector<1x1x1x8xf32>
    %242 = vector.broadcast %239 : vector<2x8x8x1xf32> to vector<2x8x8x8xf32>
    %243 = vector.broadcast %241 : vector<1x1x1x8xf32> to vector<2x8x8x8xf32>
    %244 = arith.mulf %242, %243 : vector<2x8x8x8xf32>
    %245 = vector.extract_strided_slice %237 {offsets = [0, 0, 0, 1], sizes = [2, 8, 8, 1], strides = [1, 1, 1, 1]} : vector<2x8x8x8xf32> to vector<2x8x8x1xf32>
    %246 = vector.extract_strided_slice %238 {offsets = [1, 0], sizes = [1, 8], strides = [1, 1]} : vector<8x8xf32> to vector<1x8xf32>
    %247 = vector.shape_cast %246 : vector<1x8xf32> to vector<1x1x1x8xf32>
    %248 = vector.broadcast %245 : vector<2x8x8x1xf32> to vector<2x8x8x8xf32>
    %249 = vector.broadcast %247 : vector<1x1x1x8xf32> to vector<2x8x8x8xf32>
    %250 = arith.mulf %248, %249 : vector<2x8x8x8xf32>
    %251 = arith.addf %244, %250 : vector<2x8x8x8xf32>
    %252 = vector.extract_strided_slice %237 {offsets = [0, 0, 0, 2], sizes = [2, 8, 8, 1], strides = [1, 1, 1, 1]} : vector<2x8x8x8xf32> to vector<2x8x8x1xf32>
    %253 = vector.extract_strided_slice %238 {offsets = [2, 0], sizes = [1, 8], strides = [1, 1]} : vector<8x8xf32> to vector<1x8xf32>
    %254 = vector.shape_cast %253 : vector<1x8xf32> to vector<1x1x1x8xf32>
    %255 = vector.broadcast %252 : vector<2x8x8x1xf32> to vector<2x8x8x8xf32>
    %256 = vector.broadcast %254 : vector<1x1x1x8xf32> to vector<2x8x8x8xf32>
    %257 = arith.mulf %255, %256 : vector<2x8x8x8xf32>
    %258 = arith.addf %251, %257 : vector<2x8x8x8xf32>
    %259 = vector.extract_strided_slice %237 {offsets = [0, 0, 0, 3], sizes = [2, 8, 8, 1], strides = [1, 1, 1, 1]} : vector<2x8x8x8xf32> to vector<2x8x8x1xf32>
    %260 = vector.extract_strided_slice %238 {offsets = [3, 0], sizes = [1, 8], strides = [1, 1]} : vector<8x8xf32> to vector<1x8xf32>
    %261 = vector.shape_cast %260 : vector<1x8xf32> to vector<1x1x1x8xf32>
    %262 = vector.broadcast %259 : vector<2x8x8x1xf32> to vector<2x8x8x8xf32>
    %263 = vector.broadcast %261 : vector<1x1x1x8xf32> to vector<2x8x8x8xf32>
    %264 = arith.mulf %262, %263 : vector<2x8x8x8xf32>
    %265 = arith.addf %258, %264 : vector<2x8x8x8xf32>
    %266 = vector.extract_strided_slice %237 {offsets = [0, 0, 0, 4], sizes = [2, 8, 8, 1], strides = [1, 1, 1, 1]} : vector<2x8x8x8xf32> to vector<2x8x8x1xf32>
    %267 = vector.extract_strided_slice %238 {offsets = [4, 0], sizes = [1, 8], strides = [1, 1]} : vector<8x8xf32> to vector<1x8xf32>
    %268 = vector.shape_cast %267 : vector<1x8xf32> to vector<1x1x1x8xf32>
    %269 = vector.broadcast %266 : vector<2x8x8x1xf32> to vector<2x8x8x8xf32>
    %270 = vector.broadcast %268 : vector<1x1x1x8xf32> to vector<2x8x8x8xf32>
    %271 = arith.mulf %269, %270 : vector<2x8x8x8xf32>
    %272 = arith.addf %265, %271 : vector<2x8x8x8xf32>
    %273 = vector.extract_strided_slice %237 {offsets = [0, 0, 0, 5], sizes = [2, 8, 8, 1], strides = [1, 1, 1, 1]} : vector<2x8x8x8xf32> to vector<2x8x8x1xf32>
    %274 = vector.extract_strided_slice %238 {offsets = [5, 0], sizes = [1, 8], strides = [1, 1]} : vector<8x8xf32> to vector<1x8xf32>
    %275 = vector.shape_cast %274 : vector<1x8xf32> to vector<1x1x1x8xf32>
    %276 = vector.broadcast %273 : vector<2x8x8x1xf32> to vector<2x8x8x8xf32>
    %277 = vector.broadcast %275 : vector<1x1x1x8xf32> to vector<2x8x8x8xf32>
    %278 = arith.mulf %276, %277 : vector<2x8x8x8xf32>
    %279 = arith.addf %272, %278 : vector<2x8x8x8xf32>
    %280 = vector.extract_strided_slice %237 {offsets = [0, 0, 0, 6], sizes = [2, 8, 8, 1], strides = [1, 1, 1, 1]} : vector<2x8x8x8xf32> to vector<2x8x8x1xf32>
    %281 = vector.extract_strided_slice %238 {offsets = [6, 0], sizes = [1, 8], strides = [1, 1]} : vector<8x8xf32> to vector<1x8xf32>
    %282 = vector.shape_cast %281 : vector<1x8xf32> to vector<1x1x1x8xf32>
    %283 = vector.broadcast %280 : vector<2x8x8x1xf32> to vector<2x8x8x8xf32>
    %284 = vector.broadcast %282 : vector<1x1x1x8xf32> to vector<2x8x8x8xf32>
    %285 = arith.mulf %283, %284 : vector<2x8x8x8xf32>
    %286 = arith.addf %279, %285 : vector<2x8x8x8xf32>
    %287 = vector.extract_strided_slice %237 {offsets = [0, 0, 0, 7], sizes = [2, 8, 8, 1], strides = [1, 1, 1, 1]} : vector<2x8x8x8xf32> to vector<2x8x8x1xf32>
    %288 = vector.extract_strided_slice %238 {offsets = [7, 0], sizes = [1, 8], strides = [1, 1]} : vector<8x8xf32> to vector<1x8xf32>
    %289 = vector.shape_cast %288 : vector<1x8xf32> to vector<1x1x1x8xf32>
    %290 = vector.broadcast %287 : vector<2x8x8x1xf32> to vector<2x8x8x8xf32>
    %291 = vector.broadcast %289 : vector<1x1x1x8xf32> to vector<2x8x8x8xf32>
    %292 = arith.mulf %290, %291 : vector<2x8x8x8xf32>
    %293 = arith.addf %286, %292 : vector<2x8x8x8xf32>
    %c0_118 = arith.constant 0 : index
    %c0_119 = arith.constant 0 : index
    %294 = vector.load %arg16[%c0_118, %c0_119] : memref<1x8xf32, #tpu.memory_space<vmem>>, vector<1x8xf32>
    %295 = vector.shape_cast %294 : vector<1x8xf32> to vector<1x1x1x8xf32>
    %296 = vector.broadcast %295 : vector<1x1x1x8xf32> to vector<2x8x8x8xf32>
    %297 = arith.addf %293, %296 : vector<2x8x8x8xf32>
    %c0_120 = arith.constant 0 : index
    %c0_121 = arith.constant 0 : index
    %c0_122 = arith.constant 0 : index
    %c0_123 = arith.constant 0 : index
    %298 = vector.load %arg17[%c0_120, %c0_121, %c0_122, %c0_123] : memref<2x8x8x8xf32, #tpu.memory_space<vmem>>, vector<2x8x8x8xf32>
    tpu.vector_store %arg17[%c0_120, %c0_121, %c0_122, %c0_123], %297 {strides = array<i32>} : memref<2x8x8x8xf32, #tpu.memory_space<vmem>>, vector<2x8x8x8xf32>,
    return
  }
  func.func @transform_0(%arg0: i32) -> (i32, i32) {
    %c0_i32 = arith.constant 0 : i32
    %c0_i32_0 = arith.constant 0 : i32
    %c0_i32_1 = arith.constant 0 : i32
    return %c0_i32, %c0_i32_0 : i32, i32
  }
  func.func @transform_1(%arg0: i32) -> (i32, i32, i32, i32, i32) {
    %c0_i32 = arith.constant 0 : i32
    %c0_i32_0 = arith.constant 0 : i32
    %c0_i32_1 = arith.constant 0 : i32
    %c0_i32_2 = arith.constant 0 : i32
    %c0_i32_3 = arith.constant 0 : i32
    %c0_i32_4 = arith.constant 0 : i32
    return %c0_i32, %c0_i32_0, %c0_i32_1, %c0_i32_2, %c0_i32_3 : i32, i32, i32, i32, i32
  }
  func.func @transform_2(%arg0: i32) -> (i32, i32) {
    %c0_i32 = arith.constant 0 : i32
    %c0_i32_0 = arith.constant 0 : i32
    %c0_i32_1 = arith.constant 0 : i32
    return %c0_i32, %c0_i32_0 : i32, i32
  }
  func.func @transform_3(%arg0: i32) -> (i32, i32) {
    %c0_i32 = arith.constant 0 : i32
    %c0_i32_0 = arith.constant 0 : i32
    %c0_i32_1 = arith.constant 0 : i32
    return %c0_i32, %c0_i32_0 : i32, i32
  }
  func.func @transform_4(%arg0: i32) -> (i32, i32) {
    %c0_i32 = arith.constant 0 : i32
    %c0_i32_0 = arith.constant 0 : i32
    %c0_i32_1 = arith.constant 0 : i32
    return %c0_i32, %c0_i32_0 : i32, i32
  }
  func.func @transform_5(%arg0: i32) -> (i32, i32) {
    %c0_i32 = arith.constant 0 : i32
    %c0_i32_0 = arith.constant 0 : i32
    %c0_i32_1 = arith.constant 0 : i32
    return %c0_i32, %c0_i32_0 : i32, i32
  }
  func.func @transform_6(%arg0: i32) -> (i32, i32) {
    %c0_i32 = arith.constant 0 : i32
    %c0_i32_0 = arith.constant 0 : i32
    %c0_i32_1 = arith.constant 0 : i32
    return %c0_i32, %c0_i32_0 : i32, i32
  }
  func.func @transform_7(%arg0: i32) -> (i32, i32) {
    %c0_i32 = arith.constant 0 : i32
    %c0_i32_0 = arith.constant 0 : i32
    %c0_i32_1 = arith.constant 0 : i32
    return %c0_i32, %c0_i32_0 : i32, i32
  }
  func.func @transform_8(%arg0: i32) -> (i32, i32) {
    %c0_i32 = arith.constant 0 : i32
    %c0_i32_0 = arith.constant 0 : i32
    %c0_i32_1 = arith.constant 0 : i32
    return %c0_i32, %c0_i32_0 : i32, i32
  }
  func.func @transform_9(%arg0: i32) -> (i32, i32) {
    %c0_i32 = arith.constant 0 : i32
    %c0_i32_0 = arith.constant 0 : i32
    %c0_i32_1 = arith.constant 0 : i32
    return %c0_i32, %c0_i32_0 : i32, i32
  }
  func.func @transform_10(%arg0: i32) -> (i32, i32) {
    %c0_i32 = arith.constant 0 : i32
    %c0_i32_0 = arith.constant 0 : i32
    %c0_i32_1 = arith.constant 0 : i32
    return %c0_i32, %c0_i32_0 : i32, i32
  }
  func.func @transform_11(%arg0: i32) -> (i32, i32) {
    %c0_i32 = arith.constant 0 : i32
    %c0_i32_0 = arith.constant 0 : i32
    %c0_i32_1 = arith.constant 0 : i32
    return %c0_i32, %c0_i32_0 : i32, i32
  }
  func.func @transform_12(%arg0: i32) -> (i32, i32) {
    %c0_i32 = arith.constant 0 : i32
    %c0_i32_0 = arith.constant 0 : i32
    %c0_i32_1 = arith.constant 0 : i32
    return %c0_i32, %c0_i32_0 : i32, i32
  }
  func.func @transform_13(%arg0: i32) -> (i32, i32) {
    %c0_i32 = arith.constant 0 : i32
    %c0_i32_0 = arith.constant 0 : i32
    %c0_i32_1 = arith.constant 0 : i32
    return %c0_i32, %c0_i32_0 : i32, i32
  }
  func.func @transform_14(%arg0: i32) -> (i32, i32) {
    %c0_i32 = arith.constant 0 : i32
    %c0_i32_0 = arith.constant 0 : i32
    %c0_i32_1 = arith.constant 0 : i32
    return %c0_i32, %c0_i32_0 : i32, i32
  }
  func.func @transform_15(%arg0: i32) -> (i32, i32) {
    %c0_i32 = arith.constant 0 : i32
    %c0_i32_0 = arith.constant 0 : i32
    %c0_i32_1 = arith.constant 0 : i32
    return %c0_i32, %c0_i32_0 : i32, i32
  }
  func.func @transform_16(%arg0: i32) -> (i32, i32, i32, i32) {
    %c0_i32 = arith.constant 0 : i32
    %c0_i32_0 = arith.constant 0 : i32
    %c0_i32_1 = arith.constant 0 : i32
    %c0_i32_2 = arith.constant 0 : i32
    %c0_i32_3 = arith.constant 0 : i32
    return %c0_i32, %c0_i32_0, %c0_i32_1, %c0_i32_2 : i32, i32, i32, i32
  }
}

</mosaic_0001>

<bundles_post_ra>
// kernel: mobile_down_forward.1
= control target key start
LH: loop header
LB: loop body
LE: loop exit
PB: predicated region body
PF: predicated region fallthrough
CT: control target
= control target key end

     0   :  { %v3406_v0 = vmov 0.0|0.0   ;;  %vm3407_vm0 = vmmov 0   ;;  %v6263_v4 = vmov 0.0   ;;  %vm65_vm1 = vcmask 261120   ;;  %s6245_s2 = inlined_call_operand.vmem [shape: f32[32,8], index: 2, kind: input, shape index: {}]   ;;  %s6246_s0 = inlined_call_operand.vmem [shape: f32[2,32], index: 0, kind: input, shape index: {}]   ;;  %s6247_s4 = inlined_call_operand.vmem [shape: f32[8,32], index: 4, kind: input, shape index: {}]   ;;  %s6248_s3 = inlined_call_operand.vmem [shape: f32[1,8], index: 3, kind: input, shape index: {}]   ;;  %s6249_s8 = inlined_call_operand.vmem [shape: f32[9,8], index: 8, kind: input, shape index: {}]   ;;  %s6250_s1 = inlined_call_operand.vmem [shape: f32[4,2,9,9,8], index: 1, kind: input, shape index: {}]   ;;  %s6251_s5 = inlined_call_operand.vmem [shape: f32[1,32], index: 5, kind: input, shape index: {}]   ;;  %s6252_s6 = inlined_call_operand.vmem [shape: f32[1,32], index: 6, kind: input, shape index: {}]   ;;  %s6253_s7 = inlined_call_operand.vmem [shape: f32[1,32], index: 7, kind: input, shape index: {}]   ;;  %s6254_s9 = inlined_call_operand.vmem [shape: f32[1,8], index: 9, kind: input, shape index: {}]   ;;  %s6255_s10 = inlined_call_operand.vmem [shape: f32[8,8], index: 10, kind: input, shape index: {}]   ;;  %s6256_s12 = inlined_call_operand.vmem [shape: f32[9,8], index: 12, kind: input, shape index: {}]   ;;  %s6257_s11 = inlined_call_operand.vmem [shape: f32[1,8], index: 11, kind: input, shape index: {}]   ;;  %s6258_s13 = inlined_call_operand.vmem [shape: f32[1,8], index: 13, kind: input, shape index: {}]   ;;  %s6259_s14 = inlined_call_operand.vmem [shape: f32[8,8], index: 14, kind: input, shape index: {}]   ;;  %s6260_s15 = inlined_call_operand.vmem [shape: f32[1,8], index: 15, kind: input, shape index: {}]   ;;  %s6261_s16 = inlined_call_operand.vmem [shape: f32[2,8,8,8], index: 16, kind: output, shape index: {}]  }
   0x1   :  { %6348 = sst [smem:[#allocation45_spill]] %s6245_s2  ;;  %3300 = vmatprep.subr.bf16.mxu0 %v3406_v0  ;;  %3292 = vmatprep.mubr.msk.f32.mxu0 %vm3407_vm0, %v6263_v4  ;;  %v53_v8 = vld [vmem:[%s6246_s0] sm:$0x3]  ;;  %vm148_vm2 = vcmask 64512   ;;  %v244_v15 = vlaneseq  ;;  %v3658_v43 = vld [vmem:[%s6249_s8 + $0x8] ss:$0 sm:$0xff] }
   0x2   :  { %s6349_s23 = sld [smem:[#allocation45_spill]]  ;;  %3295 = vmatprep.subr.mxu1 %v6263_v4  ;;  %3297 = vmatprep.mubr.msk.f32.mxu1 %vm3407_vm0, %v6263_v4  ;;  %v140_v9 = vld [vmem:[%s6247_s4] sm:$0xff]  ;;  %1693 = vst.msk [vmem:[#allocation2] sm:$0xff] %vm148_vm2, %v6263_v4  ;;  %1696 = vst.msk [vmem:[#allocation2 + $0x10] sm:$0xff] %vm148_vm2, %v6263_v4  ;;  %v3672_v47 = vld [vmem:[%s6250_s1 + $0xb1] sm:$0xff]  ;;  %vm1694_vm3 = vcmask 58368  }
   0x3   :  { %3296 = vmatpush3.msra.mxu1 %v140_v9  ;;  %1698 = vst.msk [vmem:[#allocation2 + $0x20] sm:$0xff] %vm148_vm2, %v6263_v4  ;;  %1700 = vst.msk [vmem:[#allocation2 + $0x30] sm:$0xff] %vm148_vm2, %v6263_v4  ;;  %v3153_v10 = vld [vmem:[%s6248_s3] ss:$0 sm:$0xff]  ;;  %v3571_v16 = vshrl.u32 %v244_v15, 7  ;;  %v3601_v24 = vld [vmem:[%s6250_s1 + $0xa1] sm:$0xff]  ;;  %v3677_v50 = vmul.f32 %v3658_v43, %v3672_v47 }
   0x4   :  { %1702 = vst.msk [vmem:[#allocation2 + $0x40] sm:$0xff] %vm148_vm2, %v6263_v4  ;;  %1704 = vst.msk [vmem:[#allocation2 + $0x50] sm:$0xff] %vm148_vm2, %v6263_v4  ;;  %v263_v20 = vld [vmem:[%s6249_s8] sm:$0xff]  ;;  %v3708_v61 = vld [vmem:[%s6250_s1 + $0xb0] sm:$0xff] }
   0x5   :  { %1706 = vst.msk [vmem:[#allocation2 + $0x60] sm:$0xff] %vm148_vm2, %v6263_v4  ;;  %1708 = vst.msk [vmem:[#allocation2 + $0x70] sm:$0xff] %vm148_vm2, %v6263_v4  ;;  %v3574_v17 = vsub.s32 0, %v3571_v16  ;;  %v3577_v18 = vsub.s32 1, %v3571_v16  ;;  %v3580_v19 = vsub.s32 2, %v3571_v16  ;;  %v3586_v21 = vsub.s32 3, %v3571_v16 }
   0x6   :  { %1710 = vst.msk [vmem:[#allocation2 + $0x80] sm:$0xff] %vm148_vm2, %v6263_v4  ;;  %1712 = vst.msk [vmem:[#allocation2 + $0x90] sm:$0xff] %vm148_vm2, %v6263_v4  ;;  %v3591_v22 = vld [vmem:[%s6250_s1 + $0xa0] sm:$0xff]  ;;  %v3613_v28 = vsub.s32 4, %v3571_v16  ;;  %v3616_v29 = vsub.s32 5, %v3571_v16  ;;  %v3642_v38 = vsub.s32 6, %v3571_v16 }
   0x7   :  { %1714 = vst.msk [vmem:[#allocation2 + $0xa0] sm:$0xff] %vm148_vm2, %v6263_v4  ;;  %1716 = vst.msk [vmem:[#allocation2 + $0xb0] sm:$0xff] %vm148_vm2, %v6263_v4  ;;  %v3596_v23 = vld [vmem:[%s6250_s1 + $0x1c0] sm:$0xff]  ;;  %v3604_v25 = vrot.slane %v263_v20, %v3574_v17  ;;  %v3607_v26 = vrot.slane %v263_v20, %v3577_v18  ;;  %v3610_v27 = vrot.slane %v263_v20, %v3580_v19  ;;  %v3664_v45 = vsub.s32 7, %v3571_v16  ;;  %v3739_v9 = vld [vmem:[%s6250_s1 + $0x1d0] sm:$0xff] }
   0x8   :  { %v54_v1 = vld [vmem:[%s6349_s23] sm:$0xff]  ;;  %v55_v2 = vld [vmem:[%s6349_s23 + $0x8] sm:$0xff]  ;;  %v56_v3 = vld [vmem:[%s6349_s23 + $0x10] sm:$0xff]  ;;  %1718 = vst.msk [vmem:[#allocation2 + $0xc0] sm:$0xff] %vm148_vm2, %v6263_v4  ;;  %v3622_v31 = vrot.slane %v263_v20, %v3586_v21  ;;  %v3639_v37 = vrot.slane %v263_v20, %v3613_v28  ;;  %v3661_v44 = vrot.slane %v263_v20, %v3616_v29  ;;  %v3689_v55 = vrot.slane %v263_v20, %v3642_v38 }
   0x9   :  { %v3301_v5 = vpack.c.bf16 %v55_v2, %v54_v1  ;;  %v57_v6 = vld [vmem:[%s6349_s23 + $0x18] sm:$0xff]  ;;  %1720 = vst.msk [vmem:[#allocation2 + $0xd0] sm:$0xff] %vm148_vm2, %v6263_v4  ;;  %1722 = vst.msk [vmem:[#allocation2 + $0xe0] sm:$0xff] %vm148_vm2, %v6263_v4  ;;  %v3184_v30 = vld [vmem:[%s6250_s1 + $0x2e0] sm:$0xff]  ;;  %v294_v32 = vmul.f32 %v3604_v25, %v3591_v22  ;;  %v331_v33 = vmul.f32 %v3596_v23, %v3607_v26 }
   0xa   :  { %v3304_v7 = vpack.c.bf16 %v57_v6, %v56_v3  ;;  %1724 = vst.msk [vmem:[#allocation2 + $0xf0] sm:$0xff] %vm148_vm2, %v6263_v4  ;;  %1726 = vst.msk [vmem:[#allocation2 + $0x100] sm:$0xff] %vm148_vm2, %v6263_v4  ;;  %v383_v34 = vmul.f32 %v3610_v27, %v3601_v24  ;;  %v3200_v35 = vld [vmem:[%s6250_s1 + $0x400] sm:$0xff]  ;;  %v436_v40 = vmul.f32 %v3184_v30, %v3622_v31 }
   0xb   :  { %3302 = vmatpush3.bf16.msra.mxu0 %v3301_v5  ;;  %1728 = vst.msk [vmem:[#allocation2 + $0x110] sm:$0xff] %vm148_vm2, %v6263_v4  ;;  %1730 = vst.msk [vmem:[#allocation2 + $0x120] sm:$0xff] %vm148_vm2, %v6263_v4  ;;  %v3636_v36 = vld [vmem:[%s6250_s1 + $0xc0] sm:$0xff]  ;;  %v347_v39 = vadd.f32 %v331_v33, %v294_v32  ;;  %v489_v49 = vmul.f32 %v3200_v35, %v3639_v37  ;;  %v3722_v2 = vrot.slane %v263_v20, %v3664_v45  ;;  %v3751_v20 = vld [vmem:[%s6250_s1 + $0xd0] sm:$0xff] }
   0xc   :  { %3303 = vmatprep.subr.bf16.mxu0 %v3406_v0  ;;  %1732 = vst.msk [vmem:[#allocation2 + $0x130] sm:$0xff] %vm148_vm2, %v6263_v4  ;;  %6350 = vst [vmem:[#allocation3_spill] sm:$0xff] %v3574_v17  ;;  %v3648_v41 = vld [vmem:[%s6250_s1 + $0x1e0] sm:$0xff]  ;;  %v296_v51 = vmul.f32 %v3604_v25, %v3636_v36  ;;  %v3714_v0 = vld [vmem:[%s6250_s1 + $0xd1] sm:$0xff]  ;;  %v594_v5 = vmul.f32 %v3708_v61, %v3689_v55 }
   0xd   :  { %6351 = vst [vmem:[#allocation4_spill] sm:$0xff] %v3577_v18  ;;  %6352 = vst [vmem:[#allocation5_spill] sm:$0xff] %v3580_v19  ;;  %v3653_v42 = vld [vmem:[%s6250_s1 + $0xc1] sm:$0xff]  ;;  %v399_v48 = vadd.f32 %v383_v34, %v347_v39  ;;  %v333_v53 = vmul.f32 %v3648_v41, %v3607_v26  ;;  %v647_v15 = vmul.f32 %v3739_v9, %v3722_v2 }
   0xe   :  { %6353 = vst [vmem:[#allocation6_spill] sm:$0xff] %v3586_v21  ;;  %6354 = vst [vmem:[#allocation7_spill] sm:$0xff] %v3613_v28  ;;  %v3216_v46 = vld [vmem:[%s6250_s1 + $0x2e1] sm:$0xff]  ;;  %v385_v54 = vmul.f32 %v3610_v27, %v3653_v42 }
   0xf   :  { %3305 = vmatpush3.bf16.msra.mxu0 %v3304_v7  ;;  %6355 = vst [vmem:[#allocation8_spill] sm:$0xff] %v3616_v29  ;;  %6356 = vst [vmem:[#allocation9_spill] sm:$0xff] %v3642_v38  ;;  %v3186_v52 = vld [vmem:[%s6250_s1 + $0x300] sm:$0xff]  ;;  %v452_v56 = vadd.f32 %v436_v40, %v399_v48  ;;  %v541_v57 = vmul.f32 %v3216_v46, %v3661_v44  ;;  %v349_v62 = vadd.f32 %v333_v53, %v296_v51  ;;  %v3768_v46 = vld [vmem:[%s6250_s1 + $0xf1] sm:$0xff] }
  0x10   :  { %6357 = vst [vmem:[#allocation10_spill] sm:$0xff] %v3664_v45  ;;  %v3202_v58 = vld [vmem:[%s6250_s1 + $0x420] sm:$0xff]  ;;  %v438_v63 = vmul.f32 %v3186_v52, %v3622_v31  ;;  %v3731_v7 = vmul.f32 %v3658_v43, %v3714_v0  ;;  %v596_v52 = vmul.f32 %v3751_v20, %v3689_v55  ;;  %v3238_v45 = vld [vmem:[%s6250_s1 + $0x110] sm:$0xff] }
  0x11   :  { %v3698_v59 = vld [vmem:[%s6250_s1 + $0xe0] sm:$0xff]  ;;  %v505_v3 = vadd.f32 %v489_v49, %v452_v56 }
  0x12   :  { %3293 = vmatmul.mubr.msk.f32.vlgmr.msra.gmra.mrb[0].mxu0 %vm65_vm1, %v53_v8  ;;  %v3703_v60 = vld [vmem:[%s6250_s1 + $0x200] sm:$0xff] }
  0x13   :  { %v3719_v1 = vld [vmem:[%s6250_s1 + $0xe1] sm:$0xff] }
  0x14   :  { %v3218_v6 = vld [vmem:[%s6250_s1 + $0x301] sm:$0xff]  ;;  %v387_v30 = vmul.f32 %v3610_v27, %v3719_v1 }
  0x15   :  { %v3188_v8 = vld [vmem:[%s6250_s1 + $0x320] sm:$0xff]  ;;  %v543_v35 = vmul.f32 %v3218_v6, %v3661_v44  ;;  %v3803_v6 = vld [vmem:[%s6250_s1 + $0xf0] sm:$0xff] }
  0x16   :  { %v3204_v32 = vld [vmem:[%s6250_s1 + $0x440] sm:$0xff]  ;;  %v440_v40 = vmul.f32 %v3188_v8, %v3622_v31 }
  0x17   :  { %v3761_v33 = vld [vmem:[%s6250_s1 + $0x100] sm:$0xff] }
  0x18   :  { %v3773_v48 = vld [vmem:[%s6250_s1 + $0x220] sm:$0xff] }
  0x19   :  { %v3778_v49 = vld [vmem:[%s6250_s1 + $0x101] sm:$0xff]  ;;  %v337_v8 = vmul.f32 %v3773_v48, %v3607_v26 }
  0x1a   :  { %v3220_v53 = vld [vmem:[%s6250_s1 + $0x321] sm:$0xff] }
  0xe5   :  { %v135_v11 = vpop.f32.mrb[0].mxu0 }
  0xe6   :  { %v136_v12 = vadd.f32 %v3153_v10, %v135_v11  ;;  %v3294_v13 = vpop.f32.mrb[1].mxu0  ;;  %v401_v10 = vadd.f32 %v385_v54, %v349_v62  ;;  %v491_v11 = vmul.f32 %v3202_v58, %v3639_v37  ;;  %v3787_v54 = vmul.f32 %v3658_v43, %v3768_v46 }
  0xe7   :  { %v335_v13 = vmul.f32 %v3703_v60, %v3607_v26  ;;  %v493_v62 = vmul.f32 %v3204_v32, %v3639_v37  ;;  %v3206_v32 = vld [vmem:[%s6250_s1 + $0x460] sm:$0xff] }
  0xe8   :  { %v139_v14 = vmax.f32 %v136_v12, 0.0  ;;  %v298_v12 = vmul.f32 %v3604_v25, %v3698_v59  ;;  %v454_v34 = vadd.f32 %v438_v63, %v401_v10  ;;  %v300_v63 = vmul.f32 %v3604_v25, %v3761_v33 }
  0xe9   :  { %v389_v10 = vmul.f32 %v3610_v27, %v3778_v49 }
  0xea   :  { %3298 = vmatmul.mubr.msk.f32.vlgmr.msra.gmra.mrb[0].mxu1 %vm148_vm2, %v139_v14  ;;  %v557_v14 = vadd.f32 %v541_v57, %v505_v3  ;;  %v351_v39 = vadd.f32 %v335_v13, %v298_v12  ;;  %v507_v56 = vadd.f32 %v491_v11, %v454_v34  ;;  %v3792_v57 = vld [vmem:[%s6250_s1 + $0x1f0] sm:$0xff]  ;;  %v3190_v3 = vld [vmem:[%s6250_s1 + $0x340] sm:$0xff] }
  0xeb   :  { %v3270_v11 = vld [vmem:[%s6250_s1 + $0x111] sm:$0xff] }
  0xec   :  { %v610_v51 = vadd.f32 %v594_v5, %v557_v14  ;;  %v403_v58 = vadd.f32 %v387_v30, %v351_v39  ;;  %v273_v12 = vld [vmem:[%s6250_s1 + $0x90] sm:$0xff]  ;;  %v559_v13 = vadd.f32 %v543_v35, %v507_v56  ;;  %v649_v14 = vmul.f32 %v3792_v57, %v3722_v2  ;;  %v3222_v56 = vld [vmem:[%s6250_s1 + $0x341] sm:$0xff] }
  0xed   :  { %v545_v30 = vmul.f32 %v3220_v53, %v3661_v44  ;;  %v3167_v34 = vld [vmem:[%s6250_s1 + $0x1b0] sm:$0xff]  ;;  %v442_v53 = vmul.f32 %v3190_v3, %v3622_v31  ;;  %v705_v38 = vmul.f32 %v3658_v43, %v3270_v11  ;;  %v547_v29 = vmul.f32 %v3222_v56, %v3661_v44 }
  0xee   :  { %v663_v5 = vadd.f32 %v647_v15, %v610_v51  ;;  %v456_v15 = vadd.f32 %v440_v40, %v403_v58  ;;  %v362_v39 = vld [vmem:[%s6250_s1 + $0x91] sm:$0xff]  ;;  %v598_v40 = vmul.f32 %v3803_v6, %v3689_v55  ;;  %v353_v51 = vadd.f32 %v337_v8, %v300_v63 }
  0xef   :  { %v612_v58 = vadd.f32 %v596_v52, %v559_v13  ;;  %v3183_v63 = vld [vmem:[%s6250_s1 + $0x2d0] sm:$0xff]  ;;  %v495_v52 = vmul.f32 %v3206_v32, %v3639_v37  ;;  %v382_v8 = vmul.f32 %v3610_v27, %v362_v39 }
  0xf0   :  { %v3828_v35 = vadd.f32 %v3677_v50, %v663_v5  ;;  %v509_v4 = vadd.f32 %v493_v62, %v456_v15  ;;  %v293_v50 = vmul.f32 %v3604_v25, %v273_v12  ;;  %v3847_v3 = vld [vmem:[%s6250_s1 + $0x210] sm:$0xff]  ;;  %v405_v5 = vadd.f32 %v389_v10, %v353_v51 }
  0xf1   :  { %v330_v62 = vmul.f32 %v3167_v34, %v3607_v26  ;;  %v3199_v11 = vld [vmem:[%s6250_s1 + $0x3f0] sm:$0xff]  ;;  %v665_v12 = vadd.f32 %v649_v14, %v612_v58  ;;  %v651_v15 = vmul.f32 %v3847_v3, %v3722_v2  ;;  %v600_v10 = vmul.f32 %v3238_v45, %v3689_v55 }
  0xf2   :  { %v561_v13 = vadd.f32 %v545_v30, %v509_v4  ;;  %v458_v28 = vadd.f32 %v442_v53, %v405_v5  ;;  %v3254_v32 = vld [vmem:[%s6250_s1 + $0x230] sm:$0xff]  ;;  %v435_v39 = vmul.f32 %v3183_v63, %v3622_v31  ;;  %v488_v51 = vmul.f32 %v3199_v11, %v3639_v37 }
  0xf3   :  { %v346_v34 = vadd.f32 %v330_v62, %v293_v50  ;;  %v3215_v14 = vld [vmem:[%s6250_s1 + $0x2d1] sm:$0xff]  ;;  %v3867_v4 = vadd.f32 %v3731_v7, %v665_v12  ;;  %v698_v45 = vmul.f32 %v3658_v43, %v3601_v24  ;;  %v295_v50 = vmul.f32 %v3708_v61, %v3604_v25 }
  0xf4   :  { %v614_v30 = vadd.f32 %v598_v40, %v561_v13  ;;  %v3185_v53 = vld [vmem:[%s6250_s1 + $0x2f0] sm:$0xff]  ;;  %v511_v56 = vadd.f32 %v495_v52, %v458_v28  ;;  %v332_v63 = vmul.f32 %v3739_v9, %v3607_v26  ;;  %v653_v5 = vmul.f32 %v3254_v32, %v3722_v2 }
  0xf5   :  { %v398_v58 = vadd.f32 %v382_v8, %v346_v34  ;;  %v3201_v7 = vld [vmem:[%s6250_s1 + $0x410] sm:$0xff]  ;;  %v540_v24 = vmul.f32 %v3215_v14, %v3661_v44  ;;  %v384_v62 = vmul.f32 %v3672_v47, %v3610_v27  ;;  %v437_v61 = vmul.f32 %v3185_v53, %v3622_v31 }
  0xf6   :  { %v667_v40 = vadd.f32 %v651_v15, %v614_v30  ;;  %v563_v28 = vadd.f32 %v547_v29, %v511_v56  ;;  %v348_v8 = vadd.f32 %v332_v63, %v295_v50  ;;  %v593_v9 = vmul.f32 %v3689_v55, %v3591_v22  ;;  %v3217_v13 = vld [vmem:[%s6250_s1 + $0x2f1] sm:$0xff] }
  0xf7   :  { %v451_v52 = vadd.f32 %v435_v39, %v398_v58  ;;  %v490_v12 = vmul.f32 %v3201_v7, %v3639_v37  ;;  %v700_v29 = vmul.f32 %v3658_v43, %v3653_v42  ;;  %v646_v34 = vmul.f32 %v3596_v23, %v3722_v2  ;;  %v3203_v42 = vld [vmem:[%s6250_s1 + $0x430] sm:$0xff] }
  0xf8   :  { %v3888_v11 = vadd.f32 %v3787_v54, %v667_v40  ;;  %v616_v15 = vadd.f32 %v600_v10, %v563_v28  ;;  %v400_v47 = vadd.f32 %v384_v62, %v348_v8  ;;  %v3187_v54 = vld [vmem:[%s6250_s1 + $0x310] sm:$0xff]  ;;  %v297_v22 = vmul.f32 %v3751_v20, %v3604_v25 }
  0xf9   :  { %v504_v32 = vadd.f32 %v488_v51, %v451_v52  ;;  %v334_v39 = vmul.f32 %v3792_v57, %v3607_v26  ;;  %v386_v10 = vmul.f32 %v3714_v0, %v3610_v27  ;;  %v542_v53 = vmul.f32 %v3217_v13, %v3661_v44  ;;  %v3219_v63 = vld [vmem:[%s6250_s1 + $0x311] sm:$0xff] }
  0xfa   :  { %v669_v14 = vadd.f32 %v653_v5, %v616_v15  ;;  %v453_v51 = vadd.f32 %v437_v61, %v400_v47  ;;  %v595_v23 = vmul.f32 %v3689_v55, %v3636_v36  ;;  %v439_v20 = vmul.f32 %v3187_v54, %v3622_v31  ;;  %v3189_v7 = vld [vmem:[%s6250_s1 + $0x330] sm:$0xff] }
  0xfb   :  { %v556_v30 = vadd.f32 %v540_v24, %v504_v32  ;;  %v350_v56 = vadd.f32 %v334_v39, %v297_v22  ;;  %v492_v0 = vmul.f32 %v3203_v42, %v3639_v37  ;;  %v702_v36 = vmul.f32 %v3658_v43, %v3719_v1  ;;  %v3205_v8 = vld [vmem:[%s6250_s1 + $0x450] sm:$0xff] }
  0xfc   :  { %v3916_v58 = vadd.f32 %v705_v38, %v669_v14  ;;  %v506_v50 = vadd.f32 %v490_v12, %v453_v51  ;;  %v299_v38 = vmul.f32 %v3803_v6, %v3604_v25  ;;  %v336_v5 = vmul.f32 %v3847_v3, %v3607_v26 }
  0xfd   :  { %v609_v57 = vadd.f32 %v593_v9, %v556_v30  ;;  %v402_v40 = vadd.f32 %v386_v10, %v350_v56  ;;  %v648_v28 = vmul.f32 %v3648_v41, %v3722_v2  ;;  %v388_v52 = vmul.f32 %v3768_v46, %v3610_v27  ;;  %v3221_v41 = vld [vmem:[%s6250_s1 + $0x331] sm:$0xff] }
  0xfe   :  { %v558_v62 = vadd.f32 %v542_v53, %v506_v50  ;;  %v544_v1 = vmul.f32 %v3219_v63, %v3661_v44  ;;  %v352_v9 = vadd.f32 %v336_v5, %v299_v38  ;;  %v441_v6 = vmul.f32 %v3189_v7, %v3622_v31 }
  0xff   :  { %v662_v24 = vadd.f32 %v646_v34, %v609_v57  ;;  %v455_v61 = vadd.f32 %v439_v20, %v402_v40  ;;  %v597_v13 = vmul.f32 %v3689_v55, %v3698_v59  ;;  %v494_v32 = vmul.f32 %v3205_v8, %v3639_v37 }
 0x100   :  { %v611_v3 = vadd.f32 %v595_v23, %v558_v62  ;;  %v404_v15 = vadd.f32 %v388_v52, %v352_v9  ;;  %v704_v47 = vmul.f32 %v3658_v43, %v3778_v49  ;;  %v546_v39 = vmul.f32 %v3221_v41, %v3661_v44  ;;  %v3990_v9 = vld [vmem:[%s6250_s1 + $0x10] sm:$0xff] }
 0x101   :  { %v3940_v12 = vadd.f32 %v698_v45, %v662_v24  ;;  %v508_v46 = vadd.f32 %v492_v0, %v455_v61  ;;  %v650_v45 = vmul.f32 %v3703_v60, %v3722_v2  ;;  %v599_v14 = vmul.f32 %v3689_v55, %v3761_v33 }
 0x102   :  { %v664_v54 = vadd.f32 %v648_v28, %v611_v3  ;;  %v457_v22 = vadd.f32 %v441_v6, %v404_v15  ;;  %v652_v49 = vmul.f32 %v3773_v48, %v3722_v2  ;;  %v3409_v33 = vmov 1966171168   ;;  %v3157_v48 = vld [vmem:[%s6252_s6] ss:$0 sm:$0xff]  ;;  %s3412_s6 = smov 112   ;;  %v3995_v6 = vld [vmem:[%s6250_s1 + $0x130] sm:$0xff] }
 0x103   :  { %6358 = vst [vmem:[#allocation11_spill] sm:$0xff] %v3940_v12  ;;  %v560_v34 = vadd.f32 %v544_v1, %v508_v46  ;;  %v242_v63 = vunpack.c.l.s4 %v3409_v33  ;;  %v6273_v24 = vmov 0   ;;  %v265_v3 = vld [vmem:[%s6250_s1] sm:$0xff]  ;;  %v286_v41 = vmul.f32 %v3604_v25, %v3990_v9  ;;  %v4010_v15 = vld [vmem:[%s6250_s1 + $0x11] sm:$0xff] }
 0x104   :  { %v3953_v59 = vadd.f32 %v700_v29, %v664_v54  ;;  %v510_v42 = vadd.f32 %v494_v32, %v457_v22  ;;  %v3155_v29 = vld [vmem:[%s6251_s5] ss:$0 sm:$0xff]  ;;  %3322 = vset.pattern.permute.xlu1 %v6273_v24  ;;  %3321 = vset.pattern.permute.xlu0 %v6273_v24  ;;  %s3411_s5 = smov 120   ;;  %v323_v46 = vmul.f32 %v3995_v6, %v3607_v26  ;;  %v4030_v22 = vld [vmem:[%s6250_s1 + $0x30] sm:$0xff] }
 0x105   :  { %v613_v10 = vadd.f32 %v597_v13, %v560_v34  ;;  %v243_v7 = vunpack.c.0.s8 %v242_v63  ;;  %v3159_v13 = vld [vmem:[%s6250_s1 + $0x120] sm:$0xff]  ;;  %v285_v54 = vmul.f32 %v3604_v25, %v265_v3  ;;  %v4074_v33 = vld [vmem:[%s6250_s1 + $0x170] sm:$0xff] }
 0x106   :  { %6359 = vst [vmem:[#allocation12_spill] sm:$0xff] %v3953_v59  ;;  %v562_v51 = vadd.f32 %v546_v39, %v510_v42  ;;  %v4015_v32 = vld [vmem:[%s6250_s1 + $0x20] sm:$0xff]  ;;  %v322_v34 = vmul.f32 %v3159_v13, %v3607_v26  ;;  %v4035_v39 = vld [vmem:[%s6250_s1 + $0x150] sm:$0xff]  ;;  %v375_v42 = vmul.f32 %v3610_v27, %v4010_v15 }
 0x107   :  { %v666_v30 = vadd.f32 %v650_v45, %v613_v10  ;;  %v246_v5 = vsub.s32 %v243_v7, %v3571_v16  ;;  %v354_v45 = vld [vmem:[%s6250_s1 + $0x1] sm:$0xff]  ;;  %v339_v10 = vadd.f32 %v323_v46, %v286_v41  ;;  %v4082_v7 = vld [vmem:[%s6250_s1 + $0x31] sm:$0xff] }
 0x108   :  { %v615_v23 = vadd.f32 %v599_v14, %v562_v51  ;;  %v287_v14 = vmul.f32 %v4015_v32, %v3604_v25  ;;  %v3176_v51 = vld [vmem:[%s6250_s1 + $0x250] sm:$0xff]  ;;  %v3175_v63 = vld [vmem:[%s6250_s1 + $0x240] sm:$0xff]  ;;  %v377_v46 = vmul.f32 %v4082_v7, %v3610_v27 }
 0x109   :  { %v3959_v53 = vadd.f32 %v702_v36, %v666_v30  ;;  %v3158_v36 = vld [vmem:[%s6253_s7] ss:$0 sm:$0xff]  ;;  %s3413_s7 = smov 104   ;;  %v427_v13 = vmul.f32 %v3175_v63, %v3622_v31  ;;  %v3208_v63 = vld [vmem:[%s6250_s1 + $0x251] sm:$0xff] }
 0x10a   :  { %v668_v56 = vadd.f32 %v652_v49, %v615_v23  ;;  %v4049_v49 = vld [vmem:[%s6250_s1 + $0x21] sm:$0xff]  ;;  %v3196_v12 = vld [vmem:[%s6250_s1 + $0x3b0] sm:$0xff] }
 0x10b   :  { %6360 = vst [vmem:[#allocation13_spill] sm:$0xff] %v3959_v53  ;;  %v4054_v23 = vld [vmem:[%s6250_s1 + $0x40] sm:$0xff]  ;;  %v4184_v53 = vld [vmem:[%s6250_s1 + $0x71] sm:$0xff] }
 0x10c   :  { %v3961_v60 = vadd.f32 %v704_v47, %v668_v56  ;;  %v4020_v47 = vld [vmem:[%s6250_s1 + $0x140] sm:$0xff]  ;;  %v338_v56 = vadd.f32 %v322_v34, %v285_v54  ;;  %v4112_v34 = vld [vmem:[%s6250_s1 + $0x51] sm:$0xff] }
 0x10d   :  { %v324_v30 = vmul.f32 %v4020_v47, %v3607_v26  ;;  %v4107_v54 = vld [vmem:[%s6250_s1 + $0x41] sm:$0xff] }
 0x10e   :  { %6361 = vst [vmem:[#allocation14_spill] sm:$0xff] %v3961_v60  ;;  %v4179_v60 = vld [vmem:[%s6250_s1 + $0x61] sm:$0xff] }
 0x1bd   :  { %v218_v20 = vpop.f32.mrb[0].mxu1 }
 0x1be   :  { %v219_v57 = vadd.f32 %v3155_v29, %v218_v20  ;;  %v3299_v50 = vpop.f32.mrb[1].mxu1  ;;  %v374_v29 = vmul.f32 %v3610_v27, %v354_v45  ;;  %v288_v20 = vmul.f32 %v4030_v22, %v3604_v25  ;;  %v3191_v45 = vld [vmem:[%s6250_s1 + $0x360] sm:$0xff] }
 0x1bf   :  { %v4064_v50 = vld [vmem:[%s6250_s1 + $0x160] sm:$0xff]  ;;  %v480_v24 = vmul.f32 %v3191_v45, %v3639_v37  ;;  %v533_v45 = vmul.f32 %v3208_v63, %v3661_v44 }
 0x1c0   :  { %v222_v0 = vmul.f32 0.5, %v219_v57  ;;  %v325_v57 = vmul.f32 %v4035_v39, %v3607_v26  ;;  %v390_v3 = vadd.f32 %v374_v29, %v338_v56  ;;  %v4130_v29 = vld [vmem:[%s6250_s1 + $0x180] sm:$0xff] }
 0x1c2   :  { %3401 = vtanh.f32 %v222_v0  ;;  %v4069_v0 = vld [vmem:[%s6250_s1 + $0x50] sm:$0xff]  ;;  %v341_v41 = vadd.f32 %v325_v57, %v288_v20 }
 0x1c3   :  { %v4135_v20 = vld [vmem:[%s6250_s1 + $0x70] sm:$0xff] }
 0x1c4   :  { %v4140_v57 = vld [vmem:[%s6250_s1 + $0x190] sm:$0xff]  ;;  %v393_v21 = vadd.f32 %v377_v46, %v341_v41 }
 0x1c5   :  { %v329_v41 = vmul.f32 %v4140_v57, %v3607_v26 }
 0x1cc   :  { %v3402_v40 = vpop.eup %3401 }
 0x1cd   :  { %v231_v38 = vmul.f32 %v3402_v40, %v3157_v48  ;;  %v391_v48 = vadd.f32 %v375_v42, %v339_v10  ;;  %v428_v40 = vmul.f32 %v3176_v51, %v3622_v31  ;;  %v3178_v10 = vld [vmem:[%s6250_s1 + $0x270] sm:$0xff]  ;;  %v4123_v42 = vld [vmem:[%s6250_s1 + $0x60] sm:$0xff] }
 0x1ce   :  { %v430_v19 = vmul.f32 %v3178_v10, %v3622_v31 }
 0x1cf   :  { %v239_v62 = vadd.f32 %v3158_v36, %v231_v38  ;;  %v340_v36 = vadd.f32 %v324_v30, %v287_v14  ;;  %v376_v38 = vmul.f32 %v4049_v49, %v3610_v27  ;;  %v444_v14 = vadd.f32 %v428_v40, %v391_v48  ;;  %v3193_v48 = vld [vmem:[%s6250_s1 + $0x380] sm:$0xff] }
 0x1d0   :  { %v482_v18 = vmul.f32 %v3193_v48, %v3639_v37  ;;  %v3195_v48 = vld [vmem:[%s6250_s1 + $0x3a0] sm:$0xff] }
 0x1d1   :  { %v247_v28 = vrot.slane %v239_v62, %v246_v5  ;;  %v3177_v62 = vld [vmem:[%s6250_s1 + $0x260] sm:$0xff]  ;;  %v392_v51 = vadd.f32 %v376_v38, %v340_v36  ;;  %v378_v36 = vmul.f32 %v4107_v54, %v3610_v27 }
 0x1d2   :  { %v429_v56 = vmul.f32 %v3177_v62, %v3622_v31  ;;  %v443_v62 = vadd.f32 %v427_v13, %v390_v3  ;;  %v328_v3 = vmul.f32 %v4130_v29, %v3607_v26  ;;  %v292_v13 = vmul.f32 %v4135_v20, %v3604_v25 }
 0x1d3   :  { %v248_v52 = vcombine.high %v247_v28, %v247_v28  ;;  %v255_v8 = vrot.slane %v247_v28, %v246_v5  ;;  %v289_v28 = vmul.f32 %v4054_v23, %v3604_v25 }
 0x1d4   :  { %v445_v10 = vadd.f32 %v429_v56, %v392_v51  ;;  %v446_v56 = vadd.f32 %v430_v19, %v393_v21  ;;  %v380_v19 = vmul.f32 %v4179_v60, %v3610_v27  ;;  %v345_v21 = vadd.f32 %v329_v41, %v292_v13 }
 0x1d5   :  { %v262_v61 = vrot.slane %v248_v52, %v246_v5  ;;  %v3976_v1 = vrot.slane %v255_v8, %v3574_v17  ;;  %v3192_v5 = vld [vmem:[%s6250_s1 + $0x370] sm:$0xff]  ;;  %v326_v52 = vmul.f32 %v4064_v50, %v3607_v26  ;;  %v290_v8 = vmul.f32 %v4069_v0, %v3604_v25 }
 0x1d6   :  { %v481_v30 = vmul.f32 %v3192_v5, %v3639_v37  ;;  %v379_v5 = vmul.f32 %v4112_v34, %v3610_v27  ;;  %v485_v13 = vmul.f32 %v3196_v12, %v3639_v37 }
 0x1d7   :  { %6362 = vst [vmem:[#allocation15_spill] sm:$0xff] %v3976_v1  ;;  %793 = vrot.lane.b32.xlu1 %v3976_v1, %s3411_s5  ;;  %771 = vrot.lane.b32.xlu0 %v3976_v1, %s3412_s6  ;;  %v3981_v16 = vrot.slane %v262_v61, %v3574_v17  ;;  %v327_v61 = vmul.f32 %v4074_v33, %v3607_v26  ;;  %v3179_v17 = vld [vmem:[%s6250_s1 + $0x280] sm:$0xff] }
 0x1d8   :  { %v342_v40 = vadd.f32 %v326_v52, %v289_v28  ;;  %v3180_v28 = vld [vmem:[%s6250_s1 + $0x290] sm:$0xff]  ;;  %v3207_v52 = vld [vmem:[%s6250_s1 + $0x241] sm:$0xff]  ;;  %v497_v46 = vadd.f32 %v481_v30, %v444_v14  ;;  %v431_v59 = vmul.f32 %v3179_v17, %v3622_v31  ;;  %v496_v30 = vadd.f32 %v480_v24, %v443_v62 }
 0x1d9   :  { %6363 = vst [vmem:[#allocation16_spill] sm:$0xff] %v3981_v16  ;;  %v343_v38 = vadd.f32 %v327_v61, %v290_v8  ;;  %v3194_v8 = vld [vmem:[%s6250_s1 + $0x390] sm:$0xff]  ;;  %v291_v61 = vmul.f32 %v4123_v42, %v3604_v25  ;;  %v432_v14 = vmul.f32 %v3180_v28, %v3622_v31  ;;  %v532_v51 = vmul.f32 %v3207_v52, %v3661_v44  ;;  %v3209_v17 = vld [vmem:[%s6250_s1 + $0x261] sm:$0xff] }
 0x1da   :  { %v394_v25 = vadd.f32 %v378_v36, %v342_v40  ;;  %v483_v63 = vmul.f32 %v3194_v8, %v3639_v37  ;;  %v3210_v24 = vld [vmem:[%s6250_s1 + $0x271] sm:$0xff]  ;;  %v381_v36 = vmul.f32 %v4184_v53, %v3610_v27  ;;  %v585_v62 = vmul.f32 %v3689_v55, %v3990_v9  ;;  %v3181_v52 = vld [vmem:[%s6250_s1 + $0x2a0] sm:$0xff] }
 0x1db   :  { %815 = vrot.lane.b32.xlu0 %v3976_v1, %s3413_s7  ;;  %795 = vrot.lane.b32.xlu1 %v3981_v16, %s3411_s5  ;;  %v395_v26 = vadd.f32 %v379_v5, %v343_v38  ;;  %v344_v40 = vadd.f32 %v328_v3, %v291_v61  ;;  %v549_v38 = vadd.f32 %v533_v45, %v497_v46  ;;  %v3182_v8 = vld [vmem:[%s6250_s1 + $0x2b0] sm:$0xff]  ;;  %v3211_v9 = vld [vmem:[%s6250_s1 + $0x281] sm:$0xff] }
 0x1dc   :  { %v586_v5 = vmul.f32 %v4015_v32, %v3689_v55  ;;  %v498_v28 = vadd.f32 %v482_v18, %v445_v10  ;;  %v447_v61 = vadd.f32 %v431_v59, %v394_v25  ;;  %v484_v3 = vmul.f32 %v3195_v48, %v3639_v37  ;;  %v3212_v45 = vld [vmem:[%s6250_s1 + $0x291] sm:$0xff] }
 0x1dd   :  { %v448_v27 = vadd.f32 %v432_v14, %v395_v26  ;;  %v548_v41 = vadd.f32 %v532_v51, %v496_v30  ;;  %v534_v32 = vmul.f32 %v3209_v17, %v3661_v44  ;;  %v499_v46 = vadd.f32 %v483_v63, %v446_v56  ;;  %v3197_v56 = vld [vmem:[%s6250_s1 + $0x3c0] sm:$0xff]  ;;  %v3198_v63 = vld [vmem:[%s6250_s1 + $0x3d0] sm:$0xff] }
 0x1de   :  { %v535_v18 = vmul.f32 %v3210_v24, %v3661_v44  ;;  %v396_v59 = vadd.f32 %v380_v19, %v344_v40  ;;  %v433_v10 = vmul.f32 %v3181_v52, %v3622_v31  ;;  %v397_v25 = vadd.f32 %v381_v36, %v345_v21 }
 0x1df   :  { %817 = vrot.lane.b32.xlu1 %v3981_v16, %s3413_s7  ;;  %773 = vrot.lane.b32.xlu0 %v3981_v16, %s3412_s6  ;;  %v434_v12 = vmul.f32 %v3182_v8, %v3622_v31  ;;  %v602_v26 = vadd.f32 %v586_v5, %v549_v38  ;;  %v639_v14 = vmul.f32 %v4020_v47, %v3722_v2 }
 0x1e0   :  { %v638_v30 = vmul.f32 %v3995_v6, %v3722_v2  ;;  %v587_v51 = vmul.f32 %v4030_v22, %v3689_v55  ;;  %v500_v48 = vadd.f32 %v484_v3, %v447_v61  ;;  %v536_v31 = vmul.f32 %v3211_v9, %v3661_v44 }
 0x1e1   :  { %v501_v17 = vadd.f32 %v485_v13, %v448_v27  ;;  %v537_v47 = vmul.f32 %v3212_v45, %v3661_v44  ;;  %v601_v24 = vadd.f32 %v585_v62, %v548_v41  ;;  %v550_v40 = vadd.f32 %v534_v32, %v498_v28  ;;  %v3214_v28 = vld [vmem:[%s6250_s1 + $0x2b1] sm:$0xff] }
 0x1e2   :  { %v551_v6 = vadd.f32 %v535_v18, %v499_v46  ;;  %v588_v22 = vmul.f32 %v4054_v23, %v3689_v55  ;;  %v449_v19 = vadd.f32 %v433_v10, %v396_v59  ;;  %v486_v21 = vmul.f32 %v3197_v56, %v3639_v37  ;;  %v3213_v23 = vld [vmem:[%s6250_s1 + $0x2a1] sm:$0xff] }
 0x1e3   :  { %v450_v36 = vadd.f32 %v434_v12, %v397_v25  ;;  %v487_v38 = vmul.f32 %v3198_v63, %v3639_v37  ;;  %v655_v5 = vadd.f32 %v639_v14, %v602_v26  ;;  %v691_v52 = vmul.f32 %v3658_v43, %v4049_v49 }
 0x1e4   :  { %v690_v8 = vmul.f32 %v3658_v43, %v4010_v15  ;;  %v640_v62 = vmul.f32 %v4035_v39, %v3722_v2  ;;  %v552_v61 = vadd.f32 %v536_v31, %v500_v48  ;;  %v589_v37 = vmul.f32 %v4069_v0, %v3689_v55 }
 0x1e5   :  { %v553_v3 = vadd.f32 %v537_v47, %v501_v17  ;;  %v590_v49 = vmul.f32 %v4123_v42, %v3689_v55  ;;  %v654_v15 = vadd.f32 %v638_v30, %v601_v24  ;;  %v603_v27 = vadd.f32 %v587_v51, %v550_v40  ;;  %v3230_v42 = vld [vmem:[%s6250_s1 + $0x80] sm:$0xff] }
 0x1e6   :  { %v604_v13 = vadd.f32 %v588_v22, %v551_v6  ;;  %v641_v39 = vmul.f32 %v4064_v50, %v3722_v2  ;;  %v502_v41 = vadd.f32 %v486_v21, %v449_v19  ;;  %v538_v32 = vmul.f32 %v3213_v23, %v3661_v44 }
 0x1e7   :  { %v503_v46 = vadd.f32 %v487_v38, %v450_v36  ;;  %v539_v18 = vmul.f32 %v3214_v28, %v3661_v44  ;;  %v707_v9 = vadd.f32 %v691_v52, %v655_v5  ;;  %v692_v0 = vmul.f32 %v3658_v43, %v4082_v7  ;;  %v4280_v7 = vld [vmem:[%s6254_s9] ss:$0 sm:$0xff] }
 0x1e8   :  { %v605_v45 = vadd.f32 %v589_v37, %v552_v61  ;;  %v642_v59 = vmul.f32 %v4074_v33, %v3722_v2  ;;  %v606_v10 = vadd.f32 %v590_v49, %v553_v3  ;;  %v643_v50 = vmul.f32 %v4130_v29, %v3722_v2  ;;  %v3246_v29 = vld [vmem:[%s6250_s1 + $0x1a0] sm:$0xff] }
 0x1e9   :  { %v706_v25 = vadd.f32 %v690_v8, %v654_v15  ;;  %v656_v12 = vadd.f32 %v640_v62, %v603_v27  ;;  %v657_v26 = vadd.f32 %v641_v39, %v604_v13  ;;  %v693_v44 = vmul.f32 %v3658_v43, %v4107_v54 }
 0x1ea   :  { %v554_v14 = vadd.f32 %v538_v32, %v502_v41  ;;  %v591_v30 = vmul.f32 %v4135_v20, %v3689_v55  ;;  %v555_v33 = vadd.f32 %v539_v18, %v503_v46  ;;  %v592_v51 = vmul.f32 %v3230_v42, %v3689_v55 }
 0x1eb   :  { %v658_v56 = vadd.f32 %v642_v59, %v605_v45  ;;  %v694_v54 = vmul.f32 %v3658_v43, %v4112_v34  ;;  %v659_v63 = vadd.f32 %v643_v50, %v606_v10  ;;  %v695_v48 = vmul.f32 %v3658_v43, %v4179_v60  ;;  %v3262_v34 = vld [vmem:[%s6250_s1 + $0x81] sm:$0xff] }
 0x1ec   :  { %v730_v31 = vadd.f32 %v4280_v7, %v707_v9  ;;  %v729_v17 = vadd.f32 %v4280_v7, %v706_v25  ;;  %v708_v20 = vadd.f32 %v692_v0, %v656_v12  ;;  %v709_v47 = vadd.f32 %v693_v44, %v657_v26 }
 0x1ed   :  { %v607_v24 = vadd.f32 %v591_v30, %v554_v14  ;;  %v644_v55 = vmul.f32 %v4140_v57, %v3722_v2  ;;  %v608_v40 = vadd.f32 %v592_v51, %v555_v33  ;;  %v645_v6 = vmul.f32 %v3246_v29, %v3722_v2 }
 0x1ee   :  { %v710_v19 = vadd.f32 %v694_v54, %v658_v56  ;;  %v711_v21 = vadd.f32 %v695_v48, %v659_v63  ;;  %v731_v36 = vadd.f32 %v4280_v7, %v708_v20  ;;  %v732_v38 = vadd.f32 %v4280_v7, %v709_v47 }
 0x1ef   :  { %v696_v57 = vmul.f32 %v3658_v43, %v4184_v53  ;;  %v697_v5 = vmul.f32 %v3658_v43, %v3262_v34  ;;  %v756_v2 = vmul.f32 %v3976_v1, %v730_v31  ;;  %v755_v52 = vmul.f32 %v3976_v1, %v729_v17 }
 0x1f0   :  { %v660_v8 = vadd.f32 %v644_v55, %v607_v24  ;;  %v661_v62 = vadd.f32 %v645_v6, %v608_v40  ;;  %v733_v53 = vadd.f32 %v4280_v7, %v710_v19  ;;  %v734_v43 = vadd.f32 %v4280_v7, %v711_v21 }
 0x1f1   :  { %v757_v39 = vmul.f32 %v3976_v1, %v731_v36  ;;  %v758_v41 = vmul.f32 %v3976_v1, %v732_v38  ;;  %v6287_v19 = vmov 1   ;;  %v6283_v21 = vmov 2  }
 0x1f2   :  { %v712_v32 = vadd.f32 %v696_v57, %v660_v8  ;;  %v713_v46 = vadd.f32 %v697_v5, %v661_v62  ;;  %v759_v25 = vmul.f32 %v3976_v1, %v733_v53  ;;  %v760_v12 = vmul.f32 %v3976_v1, %v734_v43 }
 0x1f3   :  { %v6291_v57 = vmov 5   ;;  %v6293_v5 = vmov 6   ;;  %v738_v8 = vadd.f32 %v4280_v7, %v3828_v35 }
 0x1f4   :  { %v735_v26 = vadd.f32 %v4280_v7, %v712_v32  ;;  %v736_v44 = vadd.f32 %v4280_v7, %v713_v46 }
 0x1f6   :  { %v761_v48 = vmul.f32 %v3976_v1, %v735_v26 }
 0x249   :  { %v4300_v22 = vpop.permute.xlu1 %793  ;;  %v4302_v60 = vpop.permute.xlu0 %771 }
 0x24a   :  { %6364 = vst [vmem:[#allocation17_spill] sm:$0xff] %v4300_v22  ;;  %6365 = vst [vmem:[#allocation18_spill] sm:$0xff] %v4302_v60  ;;  %v800_v23 = vmul.f32 %v4300_v22, %v730_v31  ;;  %v799_v28 = vmul.f32 %v4300_v22, %v729_v17  ;;  %v778_v37 = vadd.f32 %v4302_v60, %v756_v2 }
 0x24b   :  { %v777_v3 = vadd.f32 %v4302_v60, %v755_v52  ;;  %v801_v27 = vmul.f32 %v4300_v22, %v731_v36  ;;  %v802_v13 = vmul.f32 %v4300_v22, %v732_v38  ;;  %v779_v45 = vadd.f32 %v4302_v60, %v757_v39 }
 0x24c   :  { %v780_v59 = vadd.f32 %v4302_v60, %v758_v41  ;;  %v803_v10 = vmul.f32 %v4300_v22, %v733_v53  ;;  %v804_v50 = vmul.f32 %v4300_v22, %v734_v43  ;;  %v781_v29 = vadd.f32 %v4302_v60, %v759_v25 }
 0x24d   :  { %v4313_v61 = vpop.permute.xlu0 %815  ;;  %v782_v56 = vadd.f32 %v4302_v60, %v760_v12  ;;  %v805_v54 = vmul.f32 %v4300_v22, %v735_v26  ;;  %v806_v63 = vmul.f32 %v4300_v22, %v736_v44  ;;  %v762_v31 = vmul.f32 %v3976_v1, %v736_v44  ;;  %v4424_v2 = vpop.permute.xlu1 %795  ;;  %v6390_v1 = vld [vmem:[#allocation5_spill] sm:$0xff] }
 0x24e   :  { %6366 = vst [vmem:[#allocation19_spill] sm:$0xff] %v4313_v61  ;;  %v822_v49 = vadd.f32 %v4313_v61, %v800_v23  ;;  %v821_v15 = vadd.f32 %v4313_v61, %v799_v28  ;;  %v823_v0 = vadd.f32 %v4313_v61, %v801_v27  ;;  %v824_v42 = vadd.f32 %v4313_v61, %v802_v13 }
 0x24f   :  { %v825_v33 = vadd.f32 %v4313_v61, %v803_v10  ;;  %v826_v51 = vadd.f32 %v4313_v61, %v804_v50  ;;  %v827_v47 = vadd.f32 %v4313_v61, %v805_v54  ;;  %v828_v24 = vadd.f32 %v4313_v61, %v806_v63  ;;  %6367 = vst [vmem:[#allocation20_spill] sm:$0xff] %v4424_v2  ;;  %v6372_v10 = vld [vmem:[#allocation11_spill] sm:$0xff] }
 0x250   :  { %v4325_v18 = vmax.f32 %v778_v37, %v822_v49  ;;  %v4327_v9 = vmax.f32 %v777_v3, %v821_v15  ;;  %v4341_v14 = vmax.f32 %v779_v45, %v823_v0  ;;  %v4343_v30 = vmax.f32 %v780_v59, %v824_v42 }
 0x251   :  { %v4355_v17 = vmax.f32 %v781_v29, %v825_v33  ;;  %v4357_v20 = vmax.f32 %v782_v56, %v826_v51  ;;  %v783_v55 = vadd.f32 %v4302_v60, %v761_v48  ;;  %v784_v40 = vadd.f32 %v4302_v60, %v762_v31  ;;  %v4432_v62 = vpop.permute.xlu1 %817  ;;  %v4434_v23 = vpop.permute.xlu0 %773  ;;  %v6373_v29 = vld [vmem:[#allocation12_spill] sm:$0xff]  ;;  %v6389_v60 = vld [vmem:[#allocation3_spill] sm:$0xff] }
 0x252   :  { %861 = vperm.xlu1 %3322, %v4325_v18   ;;  %856 = vperm.xlu0 %3321, %v4327_v9   ;;  %v6285_v36 = vmov 3   ;;  %v6305_v38 = vmov 4   ;;  %v6289_v52 = vmov 7   ;;  %6368 = vst [vmem:[#allocation21_spill] sm:$0xff] %v4432_v62  ;;  %6369 = vst [vmem:[#allocation22_spill] sm:$0xff] %v4434_v23  ;;  %v764_v28 = vmul.f32 %v3981_v16, %v738_v8 }
 0x253   :  { %v4365_v6 = vmax.f32 %v783_v55, %v827_v47  ;;  %v4367_v34 = vmax.f32 %v784_v40, %v828_v24  ;;  %v808_v37 = vmul.f32 %v4424_v2, %v738_v8  ;;  %v740_v3 = vadd.f32 %v4280_v7, %v3867_v4  ;;  %v6374_v55 = vld [vmem:[#allocation13_spill] sm:$0xff] }
 0x254   :  { %v6370_v53 = vmov 0.0   ;;  %v786_v35 = vadd.f32 %v4434_v23, %v764_v28  ;;  %v742_v15 = vadd.f32 %v4280_v7, %v3888_v11  ;;  %v6371_v41 = vmov 0  }
 0x255   :  { %1699 = vst.msk [vmem:[#allocation2 + $0x28] sm:$0x3] %vm1694_vm3, %v6370_v53  ;;  %1695 = vst.msk [vmem:[#allocation2 + $0x8] sm:$0x3] %vm1694_vm3, %v6370_v53  ;;  %v830_v4 = vadd.f32 %v4432_v62, %v808_v37  ;;  %v766_v43 = vmul.f32 %v3981_v16, %v740_v3  ;;  %v810_v49 = vmul.f32 %v4424_v2, %v740_v3 }
 0x256   :  { %866 = vperm.xlu1 %3322, %v4341_v14   ;;  %871 = vperm.xlu0 %3321, %v4343_v30   ;;  %1697 = vst.msk [vmem:[#allocation2 + $0x18] sm:$0x3] %vm1694_vm3, %v6370_v53  ;;  %1701 = vst.msk [vmem:[#allocation2 + $0x38] sm:$0x3] %vm1694_vm3, %v6370_v53  ;;  %v768_v32 = vmul.f32 %v3981_v16, %v742_v15  ;;  %v812_v46 = vmul.f32 %v4424_v2, %v742_v15 }
 0x257   :  { %1703 = vst.msk [vmem:[#allocation2 + $0x48] sm:$0x3] %vm1694_vm3, %v6370_v53  ;;  %1705 = vst.msk [vmem:[#allocation2 + $0x58] sm:$0x3] %vm1694_vm3, %v6370_v53  ;;  %v4491_v27 = vmax.f32 %v786_v35, %v830_v4  ;;  %v788_v13 = vadd.f32 %v4434_v23, %v766_v43  ;;  %v832_v39 = vadd.f32 %v4432_v62, %v810_v49  ;;  %v6375_v35 = vld [vmem:[#allocation14_spill] sm:$0xff] }
 0x258   :  { %1707 = vst.msk [vmem:[#allocation2 + $0x68] sm:$0x3] %vm1694_vm3, %v6370_v53  ;;  %1709 = vst.msk [vmem:[#allocation2 + $0x78] sm:$0x3] %vm1694_vm3, %v6370_v53  ;;  %v790_v0 = vadd.f32 %v4434_v23, %v768_v32  ;;  %v834_v42 = vadd.f32 %v4432_v62, %v812_v46  ;;  %v737_v50 = vadd.f32 %v4280_v7, %v6372_v10 }
 0x259   :  { %1711 = vst.msk [vmem:[#allocation2 + $0x88] sm:$0x3] %vm1694_vm3, %v6370_v53  ;;  %1713 = vst.msk [vmem:[#allocation2 + $0x98] sm:$0x3] %vm1694_vm3, %v6370_v53  ;;  %v4502_v11 = vmax.f32 %v788_v13, %v832_v39  ;;  %v739_v56 = vadd.f32 %v4280_v7, %v6373_v29  ;;  %v741_v40 = vadd.f32 %v4280_v7, %v6374_v55 }
 0x25a   :  { %876 = vperm.xlu1 %3322, %v4355_v17   ;;  %881 = vperm.xlu0 %3321, %v4357_v20   ;;  %1715 = vst.msk [vmem:[#allocation2 + $0xa8] sm:$0x3] %vm1694_vm3, %v6370_v53  ;;  %1717 = vst.msk [vmem:[#allocation2 + $0xb8] sm:$0x3] %vm1694_vm3, %v6370_v53  ;;  %v763_v33 = vmul.f32 %v3981_v16, %v737_v50  ;;  %v807_v51 = vmul.f32 %v4424_v2, %v737_v50 }
 0x25b   :  { %1719 = vst.msk [vmem:[#allocation2 + $0xc8] sm:$0x3] %vm1694_vm3, %v6370_v53  ;;  %1721 = vst.msk [vmem:[#allocation2 + $0xd8] sm:$0x3] %vm1694_vm3, %v6370_v53  ;;  %v765_v47 = vmul.f32 %v3981_v16, %v739_v56  ;;  %v809_v24 = vmul.f32 %v4424_v2, %v739_v56  ;;  %v767_v3 = vmul.f32 %v3981_v16, %v741_v40 }
 0x25c   :  { %1723 = vst.msk [vmem:[#allocation2 + $0xe8] sm:$0x3] %vm1694_vm3, %v6370_v53  ;;  %1725 = vst.msk [vmem:[#allocation2 + $0xf8] sm:$0x3] %vm1694_vm3, %v6370_v53  ;;  %v785_v31 = vadd.f32 %v4434_v23, %v763_v33 }
 0x25d   :  { %1727 = vst.msk [vmem:[#allocation2 + $0x108] sm:$0x3] %vm1694_vm3, %v6370_v53  ;;  %1729 = vst.msk [vmem:[#allocation2 + $0x118] sm:$0x3] %vm1694_vm3, %v6370_v53  ;;  %v787_v28 = vadd.f32 %v4434_v23, %v765_v47  ;;  %v831_v37 = vadd.f32 %v4432_v62, %v809_v24  ;;  %v789_v15 = vadd.f32 %v4434_v23, %v767_v3 }
 0x25e   :  { %886 = vperm.xlu1 %3322, %v4365_v6   ;;  %891 = vperm.xlu0 %3321, %v4367_v34   ;;  %1731 = vst.msk [vmem:[#allocation2 + $0x128] sm:$0x3] %vm1694_vm3, %v6370_v53  ;;  %1733 = vst.msk [vmem:[#allocation2 + $0x138] sm:$0x3] %vm1694_vm3, %v6370_v53  ;;  %v811_v53 = vmul.f32 %v4424_v2, %v741_v40 }
 0x25f   :  { %v4560_v49 = vmax.f32 %v787_v28, %v831_v37 }
 0x260   :  { %v833_v13 = vadd.f32 %v4432_v62, %v811_v53 }
 0x262   :  { %3323 = vset.pattern.permute.xlu1 %v6287_v19  ;;  %3324 = vset.pattern.permute.xlu0 %v6287_v19 }
 0x263   :  { %955 = vperm.xlu1 %3323, %v4327_v9   ;;  %959 = vperm.xlu0 %3324, %v4325_v18  }
 0x267   :  { %963 = vperm.xlu1 %3323, %v4341_v14   ;;  %971 = vperm.xlu0 %3324, %v4355_v17  }
 0x26b   :  { %967 = vperm.xlu1 %3323, %v4343_v30   ;;  %979 = vperm.xlu0 %3324, %v4365_v6  }
 0x26f   :  { %975 = vperm.xlu1 %3323, %v4357_v20   ;;  %3325 = vset.pattern.permute.xlu0 %v6283_v21 }
 0x270   :  { %1055 = vperm.xlu0 %3325, %v4327_v9  }
 0x273   :  { %983 = vperm.xlu1 %3323, %v4367_v34  }
 0x274   :  { %1067 = vperm.xlu0 %3325, %v4343_v30  }
 0x277   :  { %3326 = vset.pattern.permute.xlu1 %v6283_v21 }
 0x278   :  { %1059 = vperm.xlu1 %3326, %v4325_v18   ;;  %1075 = vperm.xlu0 %3325, %v4357_v20  }
 0x27c   :  { %1063 = vperm.xlu1 %3326, %v4341_v14   ;;  %1083 = vperm.xlu0 %3325, %v4367_v34  }
 0x280   :  { %1071 = vperm.xlu1 %3326, %v4355_v17   ;;  %3328 = vset.pattern.permute.xlu0 %v6285_v36 }
 0x281   :  { %1159 = vperm.xlu0 %3328, %v4325_v18  }
 0x284   :  { %1079 = vperm.xlu1 %3326, %v4365_v6  }
 0x285   :  { %1171 = vperm.xlu0 %3328, %v4355_v17  }
 0x288   :  { %3327 = vset.pattern.permute.xlu1 %v6285_v36 }
 0x289   :  { %1155 = vperm.xlu1 %3327, %v4327_v9   ;;  %1179 = vperm.xlu0 %3328, %v4365_v6  }
 0x28d   :  { %1163 = vperm.xlu1 %3327, %v4341_v14   ;;  %3329 = vset.pattern.permute.xlu0 %v6305_v38 }
 0x28e   :  { %1255 = vperm.xlu0 %3329, %v4327_v9  }
 0x291   :  { %1167 = vperm.xlu1 %3327, %v4343_v30  }
 0x292   :  { %1267 = vperm.xlu0 %3329, %v4343_v30  }
 0x295   :  { %1175 = vperm.xlu1 %3327, %v4357_v20  }
 0x296   :  { %1275 = vperm.xlu0 %3329, %v4357_v20  }
 0x299   :  { %1183 = vperm.xlu1 %3327, %v4367_v34  }
 0x29a   :  { %1283 = vperm.xlu0 %3329, %v4367_v34  }
 0x29d   :  { %3330 = vset.pattern.permute.xlu1 %v6305_v38 }
 0x29e   :  { %1259 = vperm.xlu1 %3330, %v4325_v18   ;;  %3332 = vset.pattern.permute.xlu0 %v6291_v57 }
 0x29f   :  { %1359 = vperm.xlu0 %3332, %v4325_v18  }
 0x2a2   :  { %1263 = vperm.xlu1 %3330, %v4341_v14  }
 0x2a3   :  { %1371 = vperm.xlu0 %3332, %v4355_v17  }
 0x2a6   :  { %1271 = vperm.xlu1 %3330, %v4355_v17  }
 0x2a7   :  { %1379 = vperm.xlu0 %3332, %v4365_v6  }
 0x2aa   :  { %1279 = vperm.xlu1 %3330, %v4365_v6  }
 0x2ab   :  { %3333 = vset.pattern.permute.xlu0 %v6293_v5 }
 0x2ac   :  { %1455 = vperm.xlu0 %3333, %v4327_v9  }
 0x2ae   :  { %3331 = vset.pattern.permute.xlu1 %v6291_v57 }
 0x2af   :  { %1355 = vperm.xlu1 %3331, %v4327_v9  }
 0x2b0   :  { %1467 = vperm.xlu0 %3333, %v4343_v30  }
 0x2b3   :  { %1363 = vperm.xlu1 %3331, %v4341_v14  }
 0x2b4   :  { %1475 = vperm.xlu0 %3333, %v4357_v20  }
 0x2b7   :  { %1367 = vperm.xlu1 %3331, %v4343_v30  }
 0x2b8   :  { %1483 = vperm.xlu0 %3333, %v4367_v34  }
 0x2bb   :  { %1375 = vperm.xlu1 %3331, %v4357_v20  }
 0x2bc   :  { %3336 = vset.pattern.permute.xlu0 %v6289_v52 }
 0x2bd   :  { %1559 = vperm.xlu0 %3336, %v4325_v18  }
 0x2bf   :  { %1383 = vperm.xlu1 %3331, %v4367_v34  }
 0x2c1   :  { %1571 = vperm.xlu0 %3336, %v4355_v17  }
 0x2c3   :  { %3334 = vset.pattern.permute.xlu1 %v6293_v5 }
 0x2c4   :  { %1459 = vperm.xlu1 %3334, %v4325_v18   ;;  %v744_v18 = vadd.f32 %v4280_v7, %v3916_v58  ;;  %v4512_v58 = vmax.f32 %v790_v0, %v834_v42 }
 0x2c5   :  { %1579 = vperm.xlu0 %3336, %v4365_v6  }
 0x2c6   :  { %v770_v45 = vmul.f32 %v3981_v16, %v744_v18  ;;  %v814_v59 = vmul.f32 %v4424_v2, %v744_v18 }
 0x2c8   :  { %1463 = vperm.xlu1 %3334, %v4341_v14   ;;  %v792_v25 = vadd.f32 %v4434_v23, %v770_v45  ;;  %v836_v12 = vadd.f32 %v4432_v62, %v814_v59 }
 0x2c9   :  { %3338 = vset.pattern.permute.xlu0 %v6371_v41 }
 0x2ca   :  { %901 = vperm.xlu0 %3338, %v4491_v27   ;;  %v4526_v54 = vmax.f32 %v792_v25, %v836_v12 }
 0x2cc   :  { %1471 = vperm.xlu1 %3334, %v4355_v17   ;;  %v829_v17 = vadd.f32 %v4432_v62, %v807_v51 }
 0x2ce   :  { %911 = vperm.xlu0 %3338, %v4502_v11   ;;  %v4545_v8 = vmax.f32 %v785_v31, %v829_v17 }
 0x2d0   :  { %1479 = vperm.xlu1 %3334, %v4365_v6  }
 0x2d1   :  { %v4516_v26 = vpop.permute.xlu1 %861  ;;  %v4518_v44 = vpop.permute.xlu0 %856 }
 0x2d2   :  { %921 = vperm.xlu0 %3338, %v4512_v58  }
 0x2d4   :  { %3335 = vset.pattern.permute.xlu1 %v6289_v52 }
 0x2d5   :  { %1555 = vperm.xlu1 %3335, %v4327_v9   ;;  %v4529_v63 = vpop.permute.xlu1 %866  ;;  %v4531_v48 = vpop.permute.xlu0 %871 }
 0x2d6   :  { %931 = vperm.xlu0 %3338, %v4526_v54  }
 0x2d9   :  { %1563 = vperm.xlu1 %3335, %v4341_v14   ;;  %v4541_v9 = vpop.permute.xlu1 %876  ;;  %v4543_v6 = vpop.permute.xlu0 %881  ;;  %v743_v14 = vadd.f32 %v4280_v7, %v6375_v35  ;;  %v4568_v7 = vmax.f32 %v789_v15, %v833_v13 }
 0x2da   :  { %3339 = vset.pattern.permute.xlu0 %v6287_v19 }
 0x2db   :  { %987 = vperm.xlu0 %3339, %v4545_v8   ;;  %v769_v39 = vmul.f32 %v3981_v16, %v743_v14  ;;  %v813_v32 = vmul.f32 %v4424_v2, %v743_v14  ;;  %v6386_v2 = vld [vmem:[#allocation4_spill] sm:$0xff] }
 0x2dd   :  { %1567 = vperm.xlu1 %3335, %v4343_v30   ;;  %v4556_v4 = vpop.permute.xlu1 %886  ;;  %v4558_v43 = vpop.permute.xlu0 %891  ;;  %v791_v30 = vadd.f32 %v4434_v23, %v769_v39  ;;  %v835_v46 = vadd.f32 %v4432_v62, %v813_v32  ;;  %v6385_v62 = vmov 6   ;;  %v853_v23 = vld [vmem:[%s6255_s10] sm:$0xff] }
 0x2de   :  { %v4697_v16 = vrot.slane %v853_v23, %v6386_v2  ;;  %v4705_v22 = vrot.slane %v853_v23, %v6389_v60 }
 0x2df   :  { %995 = vperm.xlu0 %3339, %v4560_v49   ;;  %v4578_v42 = vmax.f32 %v791_v30, %v835_v46 }
 0x2e1   :  { %1575 = vperm.xlu1 %3335, %v4357_v20  }
 0x2e2   :  { %v4572_v18 = vpop.permute.xlu1 %955  ;;  %v4574_v0 = vpop.permute.xlu0 %959 }
 0x2e3   :  { %1003 = vperm.xlu0 %3339, %v4568_v7  }
 0x2e5   :  { %1583 = vperm.xlu1 %3335, %v4367_v34  }
 0x2e6   :  { %v4580_v45 = vpop.permute.xlu1 %963  ;;  %v4582_v59 = vpop.permute.xlu0 %971 }
 0x2e7   :  { %1011 = vperm.xlu0 %3339, %v4578_v42  }
 0x2e9   :  { %3337 = vset.pattern.permute.xlu1 %v6371_v41 }
 0x2ea   :  { %v4586_v20 = vpop.permute.xlu1 %967  ;;  %v4588_v10 = vpop.permute.xlu0 %979  ;;  %896 = vperm.xlu1 %3337, %v4545_v8  }
 0x2eb   :  { %3342 = vset.pattern.permute.xlu0 %v6283_v21 }
 0x2ec   :  { %1091 = vperm.xlu0 %3342, %v4491_v27  }
 0x2ee   :  { %v4593_v34 = vpop.permute.xlu1 %975  ;;  %906 = vperm.xlu1 %3337, %v4560_v49  }
 0x2ef   :  { %v4596_v50 = vpop.permute.xlu0 %1055 }
 0x2f0   :  { %1099 = vperm.xlu0 %3342, %v4502_v11  }
 0x2f2   :  { %v4599_v25 = vpop.permute.xlu1 %983  ;;  %916 = vperm.xlu1 %3337, %v4568_v7  }
 0x2f3   :  { %v4602_v12 = vpop.permute.xlu0 %1067 }
 0x2f4   :  { %1107 = vperm.xlu0 %3342, %v4512_v58  }
 0x2f6   :  { %926 = vperm.xlu1 %3337, %v4578_v42  }
 0x2f7   :  { %v4606_v33 = vpop.permute.xlu1 %1059  ;;  %v4608_v51 = vpop.permute.xlu0 %1075 }
 0x2f8   :  { %1115 = vperm.xlu0 %3342, %v4526_v54  }
 0x2fa   :  { %3340 = vset.pattern.permute.xlu1 %v6287_v19 }
 0x2fb   :  { %v4612_v29 = vpop.permute.xlu1 %1063  ;;  %v4614_v56 = vpop.permute.xlu0 %1083  ;;  %991 = vperm.xlu1 %3340, %v4491_v27  }
 0x2fc   :  { %6376 = vst [vmem:[#allocation11_spill] sm:$0xff] %v4614_v56  ;;  %3343 = vset.pattern.permute.xlu0 %v6285_v36 }
 0x2fd   :  { %1187 = vperm.xlu0 %3343, %v4545_v8  }
 0x2ff   :  { %v4619_v31 = vpop.permute.xlu1 %1071  ;;  %999 = vperm.xlu1 %3340, %v4502_v11  }
 0x300   :  { %v4622_v17 = vpop.permute.xlu0 %1159 }
 0x301   :  { %1195 = vperm.xlu0 %3343, %v4560_v49  }
 0x303   :  { %v4625_v47 = vpop.permute.xlu1 %1079  ;;  %1007 = vperm.xlu1 %3340, %v4512_v58  }
 0x304   :  { %v4628_v24 = vpop.permute.xlu0 %1171 }
 0x305   :  { %1203 = vperm.xlu0 %3343, %v4568_v7  }
 0x307   :  { %1015 = vperm.xlu1 %3340, %v4526_v54  }
 0x308   :  { %v4632_v55 = vpop.permute.xlu1 %1155  ;;  %v4634_v40 = vpop.permute.xlu0 %1179 }
 0x309   :  { %1211 = vperm.xlu0 %3343, %v4578_v42  }
 0x30b   :  { %3341 = vset.pattern.permute.xlu1 %v6283_v21 }
 0x30c   :  { %v4638_v28 = vpop.permute.xlu1 %1163  ;;  %1087 = vperm.xlu1 %3341, %v4545_v8  }
 0x30d   :  { %v4641_v37 = vpop.permute.xlu0 %1255  ;;  %3346 = vset.pattern.permute.xlu0 %v6305_v38 }
 0x30e   :  { %1291 = vperm.xlu0 %3346, %v4491_v27  }
 0x310   :  { %v4645_v3 = vpop.permute.xlu1 %1167  ;;  %1095 = vperm.xlu1 %3341, %v4560_v49  }
 0x311   :  { %v4648_v53 = vpop.permute.xlu0 %1267 }
 0x312   :  { %6377 = vst [vmem:[#allocation12_spill] sm:$0xff] %v4648_v53  ;;  %1299 = vperm.xlu0 %3346, %v4502_v11  }
 0x314   :  { %v4651_v35 = vpop.permute.xlu1 %1175  ;;  %1103 = vperm.xlu1 %3341, %v4568_v7  }
 0x315   :  { %6378 = vst [vmem:[#allocation13_spill] sm:$0xff] %v4651_v35  ;;  %v4654_v14 = vpop.permute.xlu0 %1275 }
 0x316   :  { %6379 = vst [vmem:[#allocation14_spill] sm:$0xff] %v4654_v14  ;;  %1307 = vperm.xlu0 %3346, %v4512_v58   ;;  %v1023_v14 = vmul.f32 %v4697_v16, %v4574_v0 }
 0x318   :  { %v4657_v15 = vpop.permute.xlu1 %1183  ;;  %1111 = vperm.xlu1 %3341, %v4578_v42  }
 0x319   :  { %6380 = vst [vmem:[#allocation23_spill] sm:$0xff] %v4657_v15  ;;  %v4660_v13 = vpop.permute.xlu0 %1283 }
 0x31a   :  { %6381 = vst [vmem:[#allocation24_spill] sm:$0xff] %v4660_v13  ;;  %1315 = vperm.xlu0 %3346, %v4526_v54   ;;  %v4709_v13 = vrot.slane %v853_v23, %v6390_v1 }
 0x31c   :  { %3344 = vset.pattern.permute.xlu1 %v6285_v36 }
 0x31d   :  { %v1260_v39 = vpop.permute.xlu1 %1259  ;;  %1191 = vperm.xlu1 %3344, %v4491_v27  }
 0x31e   :  { %v1360_v32 = vpop.permute.xlu0 %1359  ;;  %3347 = vset.pattern.permute.xlu0 %v6291_v57 }
 0x31f   :  { %1387 = vperm.xlu0 %3347, %v4545_v8  }
 0x321   :  { %v4667_v30 = vpop.permute.xlu1 %1263  ;;  %1199 = vperm.xlu1 %3344, %v4502_v11  }
 0x322   :  { %6382 = vst [vmem:[#allocation25_spill] sm:$0xff] %v4667_v30  ;;  %v4670_v46 = vpop.permute.xlu0 %1371 }
 0x323   :  { %1395 = vperm.xlu0 %3347, %v4560_v49  }
 0x325   :  { %v4673_v21 = vpop.permute.xlu1 %1271  ;;  %1207 = vperm.xlu1 %3344, %v4512_v58  }
 0x326   :  { %v4676_v36 = vpop.permute.xlu0 %1379 }
 0x327   :  { %1403 = vperm.xlu0 %3347, %v4568_v7  }
 0x329   :  { %v4679_v19 = vpop.permute.xlu1 %1279  ;;  %1215 = vperm.xlu1 %3344, %v4526_v54  }
 0x32b   :  { %v4682_v52 = vpop.permute.xlu0 %1455  ;;  %1411 = vperm.xlu0 %3347, %v4578_v42  }
 0x32c   :  { %6383 = vst [vmem:[#allocation26_spill] sm:$0xff] %v4682_v52  ;;  %v6394_v52 = vld [vmem:[#allocation7_spill] sm:$0xff] }
 0x32d   :  { %3345 = vset.pattern.permute.xlu1 %v6305_v38 }
 0x32e   :  { %v4686_v57 = vpop.permute.xlu1 %1355  ;;  %1287 = vperm.xlu1 %3345, %v4545_v8  }
 0x32f   :  { %v4689_v5 = vpop.permute.xlu0 %1467  ;;  %3350 = vset.pattern.permute.xlu0 %v6385_v62  ;;  %v1028_v62 = vmul.f32 %v4697_v16, %v4588_v10  ;;  %v938_v10 = vmul.f32 %v4705_v22, %v4518_v44  ;;  %v940_v44 = vmul.f32 %v4705_v22, %v4529_v63  ;;  %v943_v63 = vmul.f32 %v4705_v22, %v4543_v6 }
 0x330   :  { %6384 = vst [vmem:[#allocation27_spill] sm:$0xff] %v4689_v5  ;;  %1491 = vperm.xlu0 %3350, %v4491_v27   ;;  %v6391_v5 = vld [vmem:[#allocation6_spill] sm:$0xff] }
 0x331   :  { %v4712_v15 = vrot.slane %v853_v23, %v6391_v5  ;;  %v4727_v5 = vrot.slane %v853_v23, %v6394_v52  ;;  %v1026_v52 = vmul.f32 %v4697_v16, %v4582_v59 }
 0x332   :  { %v4699_v61 = vpop.permute.xlu1 %1363  ;;  %1295 = vperm.xlu1 %3345, %v4560_v49  }
 0x333   :  { %6387 = vst [vmem:[#allocation28_spill] sm:$0xff] %v4699_v61  ;;  %v4702_v38 = vpop.permute.xlu0 %1475  ;;  %v1123_v61 = vmul.f32 %v4709_v13, %v4606_v33  ;;  %v1223_v0 = vmul.f32 %v4712_v15, %v4622_v17  ;;  %v1323_v53 = vmul.f32 %v4727_v5, %v1260_v39  ;;  %v6398_v17 = vmov 5  }
 0x334   :  { %6388 = vst [vmem:[#allocation29_spill] sm:$0xff] %v4702_v38  ;;  %1499 = vperm.xlu0 %3350, %v4502_v11   ;;  %v939_v38 = vmul.f32 %v4705_v22, %v4516_v26  ;;  %v1328_v6 = vmul.f32 %v4727_v5, %v4679_v19 }
 0x336   :  { %v4716_v56 = vpop.permute.xlu1 %1367  ;;  %1303 = vperm.xlu1 %3345, %v4568_v7   ;;  %v1039_v41 = vadd.f32 %v1023_v14, %v939_v38 }
 0x337   :  { %6392 = vst [vmem:[#allocation30_spill] sm:$0xff] %v4716_v56  ;;  %v4719_v35 = vpop.permute.xlu0 %1483 }
 0x338   :  { %6393 = vst [vmem:[#allocation31_spill] sm:$0xff] %v4719_v35  ;;  %1507 = vperm.xlu0 %3350, %v4512_v58   ;;  %v6396_v35 = vld [vmem:[#allocation8_spill] sm:$0xff]  ;;  %v1139_v26 = vadd.f32 %v1123_v61, %v1039_v41  ;;  %v942_v61 = vmul.f32 %v4705_v22, %v4541_v9  ;;  %v1126_v41 = vmul.f32 %v4709_v13, %v4619_v31  ;;  %v6401_v9 = vld [vmem:[#allocation10_spill] sm:$0xff] }
 0x339   :  { %v4735_v30 = vrot.slane %v853_v23, %v6396_v35  ;;  %v4765_v31 = vrot.slane %v853_v23, %v6401_v9 }
 0x33a   :  { %v4731_v56 = vpop.permute.xlu1 %1375  ;;  %1311 = vperm.xlu1 %3345, %v4578_v42   ;;  %v1239_v38 = vadd.f32 %v1223_v0, %v1139_v26  ;;  %v6399_v26 = vmov 7  }
 0x33b   :  { %6395 = vst [vmem:[#allocation32_spill] sm:$0xff] %v4731_v56  ;;  %v4747_v56 = vld [vmem:[%s6256_s12] sm:$0xff]  ;;  %v1423_v59 = vmul.f32 %v4735_v30, %v1360_v32  ;;  %v1426_v19 = vmul.f32 %v4735_v30, %v4670_v46  ;;  %v1124_v46 = vmul.f32 %v4709_v13, %v4612_v29 }
 0x33c   :  { %v1560_v33 = vpop.permute.xlu0 %1559  ;;  %1515 = vperm.xlu0 %3350, %v4526_v54   ;;  %v1339_v39 = vadd.f32 %v1323_v53, %v1239_v38  ;;  %v4769_v53 = vrot.slane %v4747_v56, %v6389_v60  ;;  %v4773_v32 = vrot.slane %v4747_v56, %v6386_v2  ;;  %v1226_v38 = vmul.f32 %v4712_v15, %v4628_v24 }
 0x33d   :  { %v1128_v2 = vmul.f32 %v4709_v13, %v4625_v47  ;;  %v1326_v24 = vmul.f32 %v4727_v5, %v4673_v21  ;;  %v1228_v21 = vmul.f32 %v4712_v15, %v4634_v40 }
 0x33e   :  { %v4741_v14 = vpop.permute.xlu1 %1383  ;;  %3348 = vset.pattern.permute.xlu1 %v6398_v17  ;;  %v6400_v17 = vld [vmem:[#allocation9_spill] sm:$0xff]  ;;  %v1439_v9 = vadd.f32 %v1423_v59, %v1339_v39  ;;  %v941_v59 = vmul.f32 %v4705_v22, %v4531_v48 }
 0x33f   :  { %6397 = vst [vmem:[#allocation33_spill] sm:$0xff] %v4741_v14  ;;  %1391 = vperm.xlu1 %3348, %v4491_v27   ;;  %v4759_v35 = vrot.slane %v853_v23, %v6400_v17  ;;  %v1042_v14 = vadd.f32 %v1026_v52, %v942_v61  ;;  %v4779_v52 = vrot.slane %v4747_v56, %v6390_v1 }
 0x340   :  { %v4755_v0 = vpop.permute.xlu0 %1571  ;;  %3351 = vset.pattern.permute.xlu0 %v6399_v26  ;;  %v944_v23 = vmul.f32 %v4705_v22, %v4556_v4  ;;  %v1022_v4 = vmul.f32 %v4697_v16, %v4572_v18  ;;  %v1025_v18 = vmul.f32 %v4697_v16, %v4586_v20  ;;  %v4823_v20 = vmul.f32 %v4705_v22, %v4558_v43 }
 0x341   :  { %1587 = vperm.xlu0 %3351, %v4545_v8   ;;  %v1142_v61 = vadd.f32 %v1126_v41, %v1042_v14  ;;  %v1024_v14 = vmul.f32 %v4697_v16, %v4580_v45  ;;  %v4814_v45 = vld [vmem:[%s6257_s11] ss:$0 sm:$0xff] }
 0x342   :  { %v1044_v41 = vadd.f32 %v1028_v62, %v944_v23  ;;  %v1122_v62 = vmul.f32 %v4709_v13, %v4596_v50  ;;  %6402 = vst [vmem:[#allocation34_spill] sm:$0xff] %v4814_v45  ;;  %v1038_v50 = vadd.f32 %v1022_v4, %v938_v10  ;;  %v1041_v43 = vadd.f32 %v1025_v18, %v941_v59 }
 0x343   :  { %v1460_v60 = vpop.permute.xlu1 %1459  ;;  %1399 = vperm.xlu1 %3348, %v4502_v11   ;;  %v1242_v47 = vadd.f32 %v1226_v38, %v1142_v61  ;;  %v1222_v38 = vmul.f32 %v4712_v15, %v4632_v55  ;;  %v1125_v10 = vmul.f32 %v4709_v13, %v4602_v12  ;;  %v1428_v59 = vmul.f32 %v4735_v30, %v4676_v36 }
 0x344   :  { %v1523_v1 = vmul.f32 %v4759_v35, %v1460_v60  ;;  %v4791_v17 = vpop.permute.xlu0 %1579  ;;  %v1623_v60 = vmul.f32 %v4765_v31, %v1560_v33  ;;  %v1029_v18 = vmul.f32 %v4697_v16, %v4599_v25 }
 0x345   :  { %1595 = vperm.xlu0 %3351, %v4560_v49   ;;  %v1342_v48 = vadd.f32 %v1326_v24, %v1242_v47  ;;  %v1141_v36 = vadd.f32 %v1125_v10, %v1041_v43  ;;  %v1628_v43 = vmul.f32 %v4765_v31, %v4791_v17 }
 0x346   :  { %v1539_v39 = vadd.f32 %v1523_v1, %v1439_v9  ;;  %v1144_v1 = vadd.f32 %v1128_v2, %v1044_v41  ;;  %v1027_v9 = vmul.f32 %v4697_v16, %v4593_v34  ;;  %v1040_v2 = vadd.f32 %v1024_v14, %v940_v44 }
 0x347   :  { %v4816_v40 = vpop.permute.xlu1 %1463  ;;  %1407 = vperm.xlu1 %3348, %v4512_v58   ;;  %v1138_v41 = vadd.f32 %v1122_v62, %v1038_v50  ;;  %v1322_v34 = vmul.f32 %v4727_v5, %v4641_v37  ;;  %v1442_v44 = vadd.f32 %v1426_v19, %v1342_v48  ;;  %v1225_v37 = vmul.f32 %v4712_v15, %v4645_v3 }
 0x348   :  { %v1639_v33 = vadd.f32 %v1623_v60, %v1539_v39  ;;  %v1244_v61 = vadd.f32 %v1228_v21, %v1144_v1  ;;  %v1043_v21 = vadd.f32 %v1027_v9, %v943_v63  ;;  %v1422_v39 = vmul.f32 %v4735_v30, %v4686_v57  ;;  %v6404_v9 = vld [vmem:[#allocation12_spill] sm:$0xff] }
 0x349   :  { %v4829_v23 = vpop.permute.xlu0 %901  ;;  %1603 = vperm.xlu0 %3351, %v4568_v7   ;;  %v1238_v60 = vadd.f32 %v1222_v38, %v1138_v41  ;;  %v1626_v63 = vmul.f32 %v4765_v31, %v4755_v0  ;;  %v1127_v57 = vmul.f32 %v4709_v13, %v4608_v51  ;;  %v1224_v62 = vmul.f32 %v4712_v15, %v4638_v28  ;;  %v6405_v38 = vld [vmem:[#allocation25_spill] sm:$0xff] }
 0x34a   :  { %v1662_v24 = vadd.f32 %v4814_v45, %v1639_v33  ;;  %v1344_v4 = vadd.f32 %v1328_v6, %v1244_v61  ;;  %v6403_v48 = vmov 6   ;;  %v1140_v50 = vadd.f32 %v1124_v46, %v1040_v2  ;;  %v6410_v46 = vld [vmem:[#allocation30_spill] sm:$0xff] }
 0x34b   :  { %v1472_v55 = vpop.permute.xlu1 %1471  ;;  %1415 = vperm.xlu1 %3348, %v4526_v54   ;;  %v1338_v1 = vadd.f32 %v1322_v34, %v1238_v60  ;;  %v1325_v25 = vmul.f32 %v4727_v5, %v6404_v9  ;;  %v1324_v51 = vmul.f32 %v4727_v5, %v6405_v38  ;;  %v6406_v19 = vmov 0   ;;  %v6407_v34 = vld [vmem:[#allocation26_spill] sm:$0xff] }
 0x34c   :  { %v1678_v47 = vmax.f32 %v1662_v24, 0.0  ;;  %v1526_v14 = vmul.f32 %v4759_v35, %v1472_v55  ;;  %v1444_v33 = vadd.f32 %v1428_v59, %v1344_v4  ;;  %v1241_v24 = vadd.f32 %v1225_v37, %v1141_v36  ;;  %v6408_v4 = vld [vmem:[#allocation28_spill] sm:$0xff]  ;;  %v6411_v36 = vld [vmem:[#allocation11_spill] sm:$0xff] }
 0x34d   :  { %v4845_v12 = vpop.permute.xlu0 %911  ;;  %1611 = vperm.xlu0 %3351, %v4578_v42   ;;  %v1438_v61 = vadd.f32 %v1422_v39, %v1338_v1  ;;  %v1240_v2 = vadd.f32 %v1224_v62, %v1140_v50  ;;  %v1522_v55 = vmul.f32 %v4759_v35, %v6407_v34  ;;  %v1425_v60 = vmul.f32 %v4735_v30, %v6410_v46  ;;  %v6412_v50 = vld [vmem:[#allocation14_spill] sm:$0xff]  ;;  %v1753_v34 = vld [vmem:[#allocation2] sm:$0xff] }
 0x34e   :  { %1736 = vst.msk [vmem:[#allocation2 + $0x21] sm:$0xff] %vm148_vm2, %v1678_v47  ;;  %v1542_v29 = vadd.f32 %v1526_v14, %v1442_v44  ;;  %v1424_v47 = vmul.f32 %v4735_v30, %v6408_v4  ;;  %v6409_v44 = vld [vmem:[#allocation13_spill] sm:$0xff]  ;;  %v6413_v46 = vld [vmem:[#allocation23_spill] sm:$0xff] }
 0x34f   :  { %v1480_v3 = vpop.permute.xlu1 %1479  ;;  %3349 = vset.pattern.permute.xlu1 %v6403_v48  ;;  %v1227_v14 = vmul.f32 %v4712_v15, %v6409_v44  ;;  %v1340_v59 = vadd.f32 %v1324_v51, %v1240_v2  ;;  %v1538_v62 = vadd.f32 %v1522_v55, %v1438_v61  ;;  %v1789_v55 = vld [vmem:[#allocation2 + $0x1] sm:$0xff]  ;;  %v1045_v44 = vadd.f32 %v1029_v18, %v4823_v20 }
 0x350   :  { %v1642_v6 = vadd.f32 %v1626_v63, %v1542_v29  ;;  %v1528_v0 = vmul.f32 %v4759_v35, %v1480_v3  ;;  %1487 = vperm.xlu1 %3349, %v4545_v8   ;;  %v1143_v8 = vadd.f32 %v1127_v57, %v1043_v21  ;;  %v1524_v57 = vmul.f32 %v4759_v35, %v4816_v40 }
 0x351   :  { %v4868_v28 = vpop.permute.xlu0 %921  ;;  %3353 = vset.pattern.permute.xlu0 %v6406_v19  ;;  %v1327_v40 = vmul.f32 %v4727_v5, %v6412_v50  ;;  %v1440_v9 = vadd.f32 %v1424_v47, %v1340_v59  ;;  %v1773_v20 = vmul.f32 %v4769_v53, %v1753_v34  ;;  %v1809_v18 = vmul.f32 %v4773_v32, %v1789_v55 }
 0x352   :  { %v1665_v41 = vadd.f32 %v4814_v45, %v1642_v6  ;;  %v1544_v10 = vadd.f32 %v1528_v0, %v1444_v33  ;;  %v1129_v6 = vmul.f32 %v4709_v13, %v6411_v36  ;;  %v1341_v33 = vadd.f32 %v1325_v25, %v1241_v24 }
 0x353   :  { %v1243_v61 = vadd.f32 %v1227_v14, %v1143_v8  ;;  %v1229_v8 = vmul.f32 %v4712_v15, %v6413_v46  ;;  %v6414_v14 = vld [vmem:[#allocation32_spill] sm:$0xff] }
 0x354   :  { %v1681_v39 = vmax.f32 %v1665_v41, 0.0  ;;  %v1644_v37 = vadd.f32 %v1628_v43, %v1544_v10  ;;  %v1556_v17 = vpop.permute.xlu1 %1555  ;;  %1495 = vperm.xlu1 %3349, %v4560_v49   ;;  %v1441_v43 = vadd.f32 %v1425_v60, %v1341_v33  ;;  %v1540_v10 = vadd.f32 %v1524_v57, %v1440_v9  ;;  %v1841_v33 = vld [vmem:[#allocation2 + $0x2] sm:$0xff] }
 0x355   :  { %v4883_v21 = vld [vmem:[#allocation2 + $0x20] sm:$0xff]  ;;  %v1622_v1 = vmul.f32 %v4765_v31, %v1556_v17  ;;  %v4892_v3 = vpop.permute.xlu0 %931  ;;  %v1427_v60 = vmul.f32 %v4735_v30, %v6414_v14 }
 0x356   :  { %v4885_v63 = vld [vmem:[#allocation2 + $0x21] sm:$0xff]  ;;  %v1775_v49 = vmul.f32 %v4769_v53, %v4883_v21  ;;  %1739 = vst.msk [vmem:[#allocation2 + $0x51] sm:$0xff] %vm148_vm2, %v1681_v39  ;;  %v1667_v38 = vadd.f32 %v4814_v45, %v1644_v37 }
 0x357   :  { %v4887_v29 = vld [vmem:[#allocation2 + $0x22] sm:$0xff]  ;;  %v1811_v0 = vmul.f32 %v4773_v32, %v4885_v63  ;;  %v1638_v51 = vadd.f32 %v1622_v1, %v1538_v62  ;;  %v1145_v62 = vadd.f32 %v1129_v6, %v1045_v44  ;;  %v1343_v1 = vadd.f32 %v1327_v40, %v1243_v61 }
 0x358   :  { %v1863_v25 = vmul.f32 %v4779_v52, %v4887_v29  ;;  %v1564_v24 = vpop.permute.xlu1 %1563  ;;  %1503 = vperm.xlu1 %3349, %v4568_v7   ;;  %v1683_v2 = vmax.f32 %v1667_v38, 0.0  ;;  %v6416_v7 = vld [vmem:[#allocation27_spill] sm:$0xff]  ;;  %v6417_v38 = vld [vmem:[#allocation24_spill] sm:$0xff] }
 0x359   :  { %v1827_v41 = vadd.f32 %v1811_v0, %v1775_v49  ;;  %v1661_v4 = vadd.f32 %v4814_v45, %v1638_v51  ;;  %v1624_v47 = vmul.f32 %v4765_v31, %v1564_v24  ;;  %v1525_v17 = vmul.f32 %v4759_v35, %v6416_v7  ;;  %v6419_v24 = vld [vmem:[#allocation33_spill] sm:$0xff] }
 0x35a   :  { %v4916_v37 = vpop.permute.xlu0 %987  ;;  %1741 = vst.msk [vmem:[#allocation2 + $0x71] sm:$0xff] %vm148_vm2, %v1683_v2  ;;  %v1245_v9 = vadd.f32 %v1229_v8, %v1145_v62  ;;  %v1329_v6 = vmul.f32 %v4727_v5, %v6417_v38  ;;  %v1443_v40 = vadd.f32 %v1427_v60, %v1343_v1  ;;  %v1825_v2 = vadd.f32 %v1809_v18, %v1773_v20  ;;  %v6420_v8 = vld [vmem:[#allocation6_spill] sm:$0xff] }
 0x35b   :  { %v4914_v39 = vadd.f32 %v1863_v25, %v1827_v41  ;;  %v1677_v59 = vmax.f32 %v1661_v4, 0.0  ;;  %v1640_v57 = vadd.f32 %v1624_v47, %v1540_v10  ;;  %v1541_v0 = vadd.f32 %v1525_v17, %v1441_v43  ;;  %v6418_v25 = vld [vmem:[#allocation29_spill] sm:$0xff] }
 0x35c   :  { %v1568_v36 = vpop.permute.xlu1 %1567  ;;  %1511 = vperm.xlu1 %3349, %v4578_v42   ;;  %v1527_v42 = vmul.f32 %v4759_v35, %v6418_v25  ;;  %v1429_v10 = vmul.f32 %v4735_v30, %v6419_v24  ;;  %v1861_v43 = vmul.f32 %v4779_v52, %v1841_v33  ;;  %v1345_v47 = vadd.f32 %v1329_v6, %v1245_v9  ;;  %v6422_v9 = vld [vmem:[#allocation7_spill] sm:$0xff] }
 0x35d   :  { %6415 = vst [vmem:[#allocation12_spill] sm:$0xff] %v4914_v39  ;;  %1735 = vst.msk [vmem:[#allocation2 + $0x11] sm:$0xff] %vm148_vm2, %v1677_v59  ;;  %v1663_v49 = vadd.f32 %v4814_v45, %v1640_v57  ;;  %v1625_v50 = vmul.f32 %v4765_v31, %v1568_v36  ;;  %v4945_v14 = vrot.slane %v4747_v56, %v6420_v8  ;;  %v6421_v36 = vld [vmem:[#allocation31_spill] sm:$0xff] }
 0x35e   :  { %v4929_v51 = vpop.permute.xlu0 %995  ;;  %v1543_v44 = vadd.f32 %v1527_v42, %v1443_v40  ;;  %v1445_v60 = vadd.f32 %v1429_v10, %v1345_v47  ;;  %v1877_v7 = vadd.f32 %v1861_v43, %v1825_v2  ;;  %v1529_v33 = vmul.f32 %v4759_v35, %v6421_v36  ;;  %v6423_v42 = vld [vmem:[#allocation8_spill] sm:$0xff] }
 0x35f   :  { %v1679_v61 = vmax.f32 %v1663_v49, 0.0  ;;  %v1641_v41 = vadd.f32 %v1625_v50, %v1541_v0  ;;  %v4959_v38 = vrot.slane %v4747_v56, %v6422_v9  ;;  %v4965_v24 = vrot.slane %v4747_v56, %v6423_v42 }
 0x360   :  { %v1576_v34 = vpop.permute.xlu1 %1575  ;;  %3352 = vset.pattern.permute.xlu1 %v6399_v26  ;;  %v1545_v25 = vadd.f32 %v1529_v33, %v1445_v60  ;;  %v6428_v36 = vmov 1  }
 0x361   :  { %1737 = vst.msk [vmem:[#allocation2 + $0x31] sm:$0xff] %vm148_vm2, %v1679_v61  ;;  %v1664_v55 = vadd.f32 %v4814_v45, %v1641_v41  ;;  %v1627_v4 = vmul.f32 %v4765_v31, %v1576_v34  ;;  %1591 = vperm.xlu1 %3352, %v4491_v27   ;;  %6424 = vst [vmem:[#allocation25_spill] sm:$0xff] %v4965_v24  ;;  %v6425_v34 = vld [vmem:[#allocation9_spill] sm:$0xff] }
 0x362   :  { %v4941_v46 = vpop.permute.xlu0 %1003 }
 0x363   :  { %v1680_v62 = vmax.f32 %v1664_v55, 0.0  ;;  %v1643_v1 = vadd.f32 %v1627_v4, %v1543_v44  ;;  %v4973_v55 = vrot.slane %v4747_v56, %v6425_v34 }
 0x364   :  { %v1754_v17 = vld [vmem:[#allocation2 + $0x10] sm:$0xff]  ;;  %v1584_v20 = vpop.permute.xlu1 %1583 }
 0x365   :  { %v1790_v59 = vld [vmem:[#allocation2 + $0x11] sm:$0xff]  ;;  %v1774_v18 = vmul.f32 %v4769_v53, %v1754_v17  ;;  %1599 = vperm.xlu1 %3352, %v4502_v11   ;;  %v1913_v49 = vmul.f32 %v4945_v14, %v1754_v17  ;;  %1738 = vst.msk [vmem:[#allocation2 + $0x41] sm:$0xff] %vm148_vm2, %v1680_v62  ;;  %v1666_v0 = vadd.f32 %v4814_v45, %v1643_v1 }
 0x366   :  { %v1842_v57 = vld [vmem:[#allocation2 + $0x12] sm:$0xff]  ;;  %v1810_v27 = vmul.f32 %v4773_v32, %v1790_v59  ;;  %v4955_v50 = vpop.permute.xlu0 %1011  ;;  %v1629_v11 = vmul.f32 %v4765_v31, %v1584_v20  ;;  %v1965_v2 = vmul.f32 %v4959_v38, %v1790_v59  ;;  %v2070_v1 = vmul.f32 %v4973_v55, %v4883_v21 }
 0x367   :  { %v1862_v40 = vmul.f32 %v4779_v52, %v1842_v57  ;;  %v1929_v61 = vadd.f32 %v1913_v49, %v1877_v7  ;;  %v1682_v41 = vmax.f32 %v1666_v0, 0.0  ;;  %v2017_v47 = vmul.f32 %v4965_v24, %v1842_v57  ;;  %v6426_v59 = vld [vmem:[#allocation10_spill] sm:$0xff] }
 0x368   :  { %v1826_v6 = vadd.f32 %v1810_v27, %v1774_v18  ;;  %v1645_v4 = vadd.f32 %v1629_v11, %v1545_v25  ;;  %v4985_v62 = vrot.slane %v4747_v56, %v6426_v59  ;;  %v1914_v57 = vmul.f32 %v4945_v14, %v4883_v21  ;;  %v5000_v56 = vld [vmem:[%s6256_s12 + $0x8] ss:$0 sm:$0xff] }
 0x369   :  { %1607 = vperm.xlu1 %3352, %v4512_v58   ;;  %v4969_v43 = vpop.permute.xlu1 %896  ;;  %1740 = vst.msk [vmem:[#allocation2 + $0x61] sm:$0xff] %vm148_vm2, %v1682_v41  ;;  %v1981_v60 = vadd.f32 %v1965_v2, %v1929_v61  ;;  %6429 = vst [vmem:[#allocation28_spill] sm:$0xff] %v5000_v56  ;;  %v1966_v21 = vmul.f32 %v4959_v38, %v4885_v63  ;;  %v5015_v61 = vld [vmem:[%s6258_s13] ss:$0 sm:$0xff]  ;;  %v2018_v25 = vmul.f32 %v4965_v24, %v4887_v29 }
 0x36a   :  { %v1878_v10 = vadd.f32 %v1862_v40, %v1826_v6  ;;  %v1668_v7 = vadd.f32 %v4814_v45, %v1645_v4  ;;  %6427 = vst [vmem:[#allocation26_spill] sm:$0xff] %v4985_v62  ;;  %v2122_v49 = vmul.f32 %v4985_v62, %v4885_v63  ;;  %v2174_v40 = vmul.f32 %v5000_v56, %v4887_v29 }
 0x36b   :  { %v4977_v44 = vpop.permute.xlu0 %1091  ;;  %v2033_v58 = vadd.f32 %v2017_v47, %v1981_v60  ;;  %6430 = vst [vmem:[#allocation13_spill] sm:$0xff] %v5015_v61  ;;  %v6433_v60 = vld [vmem:[#allocation15_spill] sm:$0xff] }
 0x36c   :  { %v1684_v20 = vmax.f32 %v1668_v7, 0.0  ;;  %v1930_v33 = vadd.f32 %v1914_v57, %v1878_v10  ;;  %v6435_v57 = vld [vmem:[#allocation18_spill] sm:$0xff] }
 0x36d   :  { %1615 = vperm.xlu1 %3352, %v4526_v54   ;;  %v4981_v17 = vpop.permute.xlu1 %906  ;;  %v2086_v27 = vadd.f32 %v2070_v1, %v2033_v58  ;;  %v6434_v58 = vld [vmem:[#allocation17_spill] sm:$0xff] }
 0x36e   :  { %1742 = vst.msk [vmem:[#allocation2 + $0x81] sm:$0xff] %vm148_vm2, %v1684_v20  ;;  %v1982_v41 = vadd.f32 %v1966_v21, %v1930_v33 }
 0x36f   :  { %v4991_v18 = vpop.permute.xlu0 %1099  ;;  %v2138_v6 = vadd.f32 %v2122_v49, %v2086_v27  ;;  %v6436_v27 = vld [vmem:[#allocation19_spill] sm:$0xff] }
 0x370   :  { %v5021_v63 = vadd.f32 %v2018_v25, %v1982_v41  ;;  %v6437_v41 = vmov 2   ;;  %v6438_v25 = vmov 3  }
 0x371   :  { %v4994_v54 = vpop.permute.xlu1 %916  ;;  %3354 = vset.pattern.permute.xlu1 %v6428_v36  ;;  %v2190_v10 = vadd.f32 %v2174_v40, %v2138_v6 }
 0x372   :  { %6432 = vst [vmem:[#allocation11_spill] sm:$0xff] %v5021_v63 }
 0x373   :  { %v5006_v0 = vpop.permute.xlu0 %1107  ;;  %v2213_v4 = vadd.f32 %v5015_v61, %v2190_v10 }
 0x375   :  { %v5010_v11 = vpop.permute.xlu1 %926  ;;  %v2229_v7 = vmul.f32 %v2213_v4, %v6433_v60  ;;  %v2261_v1 = vmul.f32 %v2213_v4, %v6434_v58 }
 0x377   :  { %v5019_v2 = vpop.permute.xlu0 %1115  ;;  %v2245_v20 = vadd.f32 %v2229_v7, %v6435_v57  ;;  %v2277_v33 = vadd.f32 %v2261_v1, %v6436_v27  ;;  %v6440_v1 = vmov 4  }
 0x378   :  { %6431 = vst [vmem:[#allocation30_spill] sm:$0xff] %v5019_v2 }
 0x379   :  { %v2293_v29 = vmax.f32 %v2245_v20, %v2277_v33  ;;  %v6441_v20 = vmov 5  }
 0x37a   :  { %v5024_v47 = vpop.permute.xlu1 %991 }
 0x37b   :  { %2312 = vperm.xlu0 %3353, %v2293_v29   ;;  %2411 = vperm.xlu1 %3354, %v2293_v29  }
 0x37c   :  { %v5030_v49 = vpop.permute.xlu0 %1187 }
 0x37e   :  { %v5032_v21 = vpop.permute.xlu1 %999 }
 0x37f   :  { %3355 = vset.pattern.permute.xlu0 %v6437_v41  ;;  %3356 = vset.pattern.permute.xlu1 %v6438_v25 }
 0x380   :  { %v5034_v6 = vpop.permute.xlu0 %1195  ;;  %2511 = vperm.xlu0 %3355, %v2293_v29   ;;  %2611 = vperm.xlu1 %3356, %v2293_v29  }
 0x382   :  { %v5036_v40 = vpop.permute.xlu1 %1007 }
 0x384   :  { %v5040_v10 = vpop.permute.xlu0 %1203  ;;  %3357 = vset.pattern.permute.xlu0 %v6440_v1  ;;  %3358 = vset.pattern.permute.xlu1 %v6441_v20 }
 0x385   :  { %2711 = vperm.xlu0 %3357, %v2293_v29   ;;  %2811 = vperm.xlu1 %3358, %v2293_v29  }
 0x386   :  { %v5042_v4 = vpop.permute.xlu1 %1015 }
 0x387   :  { %6439 = vst [vmem:[#allocation14_spill] sm:$0xff] %v5042_v4 }
 0x388   :  { %v5044_v7 = vpop.permute.xlu0 %1211 }
 0x389   :  { %3359 = vset.pattern.permute.xlu0 %v6403_v48  ;;  %3360 = vset.pattern.permute.xlu1 %v6399_v26 }
 0x38a   :  { %2911 = vperm.xlu0 %3359, %v2293_v29   ;;  %3011 = vperm.xlu1 %3360, %v2293_v29  }
 0x38b   :  { %v1088_v33 = vpop.permute.xlu1 %1087 }
 0x38d   :  { %v5048_v27 = vpop.permute.xlu0 %1291 }
 0x38e   :  { %6442 = vst [vmem:[#allocation23_spill] sm:$0xff] %v5048_v27  ;;  %3362 = vset.pattern.permute.xlu0 %v6428_v36  ;;  %3361 = vset.pattern.permute.xlu1 %v6406_v19  ;;  %v6457_v27 = vld [vmem:[#allocation3_spill] sm:$0xff] }
 0x38f   :  { %v1096_v57 = vpop.permute.xlu1 %1095 }
 0x391   :  { %v5052_v59 = vpop.permute.xlu0 %1299 }
 0x392   :  { %6443 = vst [vmem:[#allocation32_spill] sm:$0xff] %v5052_v59  ;;  %v946_v59 = vmul.f32 %v4705_v22, %v4969_v43 }
 0x393   :  { %v5054_v58 = vpop.permute.xlu1 %1103 }
 0x395   :  { %v5058_v1 = vpop.permute.xlu0 %1307 }
 0x396   :  { %6444 = vst [vmem:[#allocation27_spill] sm:$0xff] %v5058_v1 }
 0x397   :  { %v5060_v20 = vpop.permute.xlu1 %1111 }
 0x399   :  { %v5062_v60 = vpop.permute.xlu0 %1315 }
 0x39a   :  { %6445 = vst [vmem:[#allocation24_spill] sm:$0xff] %v5062_v60 }
 0x39c   :  { %v5064_v48 = vpop.permute.xlu1 %1191 }
 0x39e   :  { %v5066_v26 = vpop.permute.xlu0 %1387 }
 0x3a0   :  { %v5068_v29 = vpop.permute.xlu1 %1199 }
 0x3a1   :  { %6446 = vst [vmem:[#allocation29_spill] sm:$0xff] %v5068_v29 }
 0x3a2   :  { %v5070_v41 = vpop.permute.xlu0 %1395 }
 0x3a4   :  { %v5072_v25 = vpop.permute.xlu1 %1207 }
 0x3a5   :  { %6447 = vst [vmem:[#allocation33_spill] sm:$0xff] %v5072_v25  ;;  %v1130_v25 = vmul.f32 %v4709_v13, %v1088_v33  ;;  %v1758_v33 = vld [vmem:[#allocation2 + $0x50] sm:$0xff] }
 0x3a6   :  { %v5074_v61 = vpop.permute.xlu0 %1403 }
 0x3a7   :  { %6448 = vst [vmem:[#allocation6_spill] sm:$0xff] %v5074_v61  ;;  %v6461_v61 = vld [vmem:[#allocation5_spill] sm:$0xff] }
 0x3a8   :  { %v5076_v36 = vpop.permute.xlu1 %1215 }
 0x3a9   :  { %6449 = vst [vmem:[#allocation31_spill] sm:$0xff] %v5076_v36  ;;  %v5095_v36 = vld [vmem:[%s6259_s14] sm:$0xff] }
 0x3aa   :  { %v5078_v19 = vpop.permute.xlu0 %1411  ;;  %6455 = vst [vmem:[#allocation37_spill] sm:$0xff] %v5095_v36  ;;  %v5116_v43 = vrot.slane %v5095_v36, %v6461_v61  ;;  %v5134_v61 = vrot.slane %v5095_v36, %v6425_v34 }
 0x3ab   :  { %6450 = vst [vmem:[#allocation7_spill] sm:$0xff] %v5078_v19  ;;  %v2057_v19 = vld [vmem:[#allocation2 + $0x90] sm:$0xff] }
 0x3ac   :  { %6462 = vst [vmem:[#allocation5_spill] sm:$0xff] %v5116_v43  ;;  %6466 = vst [vmem:[#allocation42_spill] sm:$0xff] %v5134_v61 }
 0x3ad   :  { %v1288_v63 = vpop.permute.xlu1 %1287 }
 0x3af   :  { %v5080_v39 = vpop.permute.xlu0 %1491 }
 0x3b0   :  { %6451 = vst [vmem:[#allocation8_spill] sm:$0xff] %v5080_v39  ;;  %v1030_v39 = vmul.f32 %v4697_v16, %v4916_v37  ;;  %v5120_v37 = vrot.slane %v5095_v36, %v6420_v8  ;;  %v5137_v8 = vmul.f32 %v4973_v55, %v2057_v19  ;;  %v949_v19 = vmul.f32 %v4705_v22, %v4845_v12 }
 0x3b1   :  { %v1296_v24 = vpop.permute.xlu1 %1295  ;;  %v5166_v12 = vmul.f32 %v4945_v14, %v1758_v33 }
 0x3b2   :  { %6463 = vst [vmem:[#allocation39_spill] sm:$0xff] %v5120_v37  ;;  %v1046_v29 = vadd.f32 %v1030_v39, %v946_v59  ;;  %6467 = vst [vmem:[#allocation43_spill] sm:$0xff] %v5137_v8  ;;  %v947_v39 = vmul.f32 %v4705_v22, %v4829_v23  ;;  %v5141_v59 = vld [vmem:[#allocation2 + $0x52] sm:$0xff]  ;;  %v5154_v23 = vmul.f32 %v4705_v22, %v4868_v28 }
 0x3b3   :  { %v5084_v62 = vpop.permute.xlu0 %1499  ;;  %v1134_v37 = vmul.f32 %v4709_v13, %v5054_v58 }
 0x3b4   :  { %6452 = vst [vmem:[#allocation9_spill] sm:$0xff] %v5084_v62 }
 0x3b5   :  { %v5082_v56 = vpop.permute.xlu1 %1303 }
 0x3b7   :  { %v5088_v1 = vpop.permute.xlu0 %1507 }
 0x3b8   :  { %6453 = vst [vmem:[#allocation35_spill] sm:$0xff] %v5088_v1  ;;  %v5106_v1 = vrot.slane %v5095_v36, %v6457_v27  ;;  %v948_v27 = vmul.f32 %v4705_v22, %v4981_v17  ;;  %v1146_v17 = vadd.f32 %v1130_v25, %v1046_v29  ;;  %v1330_v25 = vmul.f32 %v4727_v5, %v1288_v63  ;;  %v2053_v29 = vld [vmem:[#allocation2 + $0x50] sm:$0xff] }
 0x3b9   :  { %v5086_v60 = vpop.permute.xlu1 %1311  ;;  %v1034_v63 = vmul.f32 %v4697_v16, %v4941_v46 }
 0x3ba   :  { %6458 = vst [vmem:[#allocation3_spill] sm:$0xff] %v5106_v1  ;;  %v1761_v1 = vld [vmem:[#allocation2 + $0xa0] sm:$0xff] }
 0x3bb   :  { %v5112_v45 = vpop.permute.xlu0 %1515 }
 0x3be   :  { %v5090_v2 = vpop.permute.xlu1 %1391 }
 0x3bf   :  { %6454 = vst [vmem:[#allocation36_spill] sm:$0xff] %v5090_v2  ;;  %v6459_v2 = vld [vmem:[#allocation4_spill] sm:$0xff] }
 0x3c0   :  { %v5110_v4 = vrot.slane %v5095_v36, %v6459_v2  ;;  %v5126_v2 = vrot.slane %v5095_v36, %v6422_v9  ;;  %v1032_v9 = vmul.f32 %v4697_v16, %v4929_v51  ;;  %v950_v51 = vmul.f32 %v4705_v22, %v4994_v54  ;;  %v1588_v54 = vpop.permute.xlu0 %1587 }
 0x3c2   :  { %v5102_v62 = vpop.permute.xlu1 %1399  ;;  %6460 = vst [vmem:[#allocation4_spill] sm:$0xff] %v5110_v4  ;;  %6464 = vst [vmem:[#allocation40_spill] sm:$0xff] %v5126_v2  ;;  %v5130_v4 = vrot.slane %v5095_v36, %v6423_v42  ;;  %v1132_v2 = vmul.f32 %v4709_v13, %v1096_v57  ;;  %v1048_v61 = vadd.f32 %v1032_v9, %v948_v27  ;;  %v5175_v9 = vld [vmem:[#allocation2 + $0x30] sm:$0xff] }
 0x3c3   :  { %6456 = vst [vmem:[#allocation38_spill] sm:$0xff] %v5102_v62  ;;  %v1794_v62 = vld [vmem:[#allocation2 + $0x51] sm:$0xff]  ;;  %v1230_v57 = vmul.f32 %v4712_v15, %v5030_v49  ;;  %v5163_v36 = vmul.f32 %v4779_v52, %v5141_v59  ;;  %v5173_v27 = vmul.f32 %v4705_v22, %v4892_v3  ;;  %v952_v3 = vmul.f32 %v4705_v22, %v5010_v11 }
 0x3c4   :  { %6465 = vst [vmem:[#allocation41_spill] sm:$0xff] %v5130_v4  ;;  %v1778_v4 = vmul.f32 %v4769_v53, %v1758_v33  ;;  %v1814_v34 = vmul.f32 %v4773_v32, %v1794_v62  ;;  %v5169_v28 = vmul.f32 %v4959_v38, %v1794_v62  ;;  %v1148_v49 = vadd.f32 %v1132_v2, %v1048_v61 }
 0x3c5   :  { %v1246_v8 = vadd.f32 %v1230_v57, %v1146_v17  ;;  %v1036_v62 = vmul.f32 %v4697_v16, %v4955_v50  ;;  %v1050_v46 = vadd.f32 %v1034_v63, %v950_v51  ;;  %v1232_v2 = vmul.f32 %v4712_v15, %v5034_v6  ;;  %v1596_v57 = vpop.permute.xlu0 %1595 }
 0x3c6   :  { %v5146_v42 = vpop.permute.xlu1 %1407  ;;  %6468 = vst [vmem:[#allocation44_spill] sm:$0xff] %v5169_v28  ;;  %v5183_v43 = vadd.f32 %v1814_v34, %v1778_v4  ;;  %v5190_v28 = vmul.f32 %v4973_v55, %v2053_v29  ;;  %v1332_v61 = vmul.f32 %v4727_v5, %v1296_v24  ;;  %v5197_v4 = vmul.f32 %v4769_v53, %v5175_v9 }
 0x3c7   :  { %v1346_v58 = vadd.f32 %v1330_v25, %v1246_v8  ;;  %v1031_v50 = vmul.f32 %v4697_v16, %v5024_v47  ;;  %v1033_v22 = vmul.f32 %v4697_v16, %v5032_v21  ;;  %v1136_v11 = vmul.f32 %v4709_v13, %v5060_v20 }
 0x3c8   :  { %v1150_v17 = vadd.f32 %v1134_v37, %v1050_v46  ;;  %v1430_v6 = vmul.f32 %v4735_v30, %v5066_v26  ;;  %v1248_v8 = vadd.f32 %v1232_v2, %v1148_v49  ;;  %v5208_v24 = vmul.f32 %v4769_v53, %v1761_v1 }
 0x3c9   :  { %v1131_v34 = vmul.f32 %v4709_v13, %v4977_v44  ;;  %v1133_v47 = vmul.f32 %v4709_v13, %v4991_v18  ;;  %v1052_v51 = vadd.f32 %v1036_v62, %v952_v3  ;;  %v1234_v21 = vmul.f32 %v4712_v15, %v5040_v10 }
 0x3ca   :  { %v5181_v33 = vpop.permute.xlu1 %1415  ;;  %v1348_v37 = vadd.f32 %v1332_v61, %v1248_v8  ;;  %v1334_v26 = vmul.f32 %v4727_v5, %v5082_v56  ;;  %v1446_v25 = vadd.f32 %v1430_v6, %v1346_v58  ;;  %v1135_v29 = vmul.f32 %v4709_v13, %v5006_v0  ;;  %v6471_v8 = vld [vmem:[#allocation34_spill] sm:$0xff] }
 0x3cb   :  { %v1047_v44 = vadd.f32 %v1031_v50, %v947_v39  ;;  %v1049_v63 = vadd.f32 %v1033_v22, %v949_v19  ;;  %v1152_v49 = vadd.f32 %v1136_v11, %v1052_v51  ;;  %v1432_v18 = vmul.f32 %v4735_v30, %v5070_v41  ;;  %v6469_v22 = vld [vmem:[#allocation29_spill] sm:$0xff] }
 0x3cc   :  { %v1250_v62 = vadd.f32 %v1234_v21, %v1150_v17  ;;  %v1630_v10 = vmul.f32 %v4765_v31, %v1588_v54  ;;  %v1035_v46 = vmul.f32 %v4697_v16, %v5036_v40  ;;  %v1236_v56 = vmul.f32 %v4712_v15, %v5044_v7  ;;  %v1604_v17 = vpop.permute.xlu0 %1603  ;;  %v6470_v7 = vld [vmem:[#allocation6_spill] sm:$0xff] }
 0x3cd   :  { %v1231_v2 = vmul.f32 %v4712_v15, %v5064_v48  ;;  %v1336_v0 = vmul.f32 %v4727_v5, %v5086_v60  ;;  %v1448_v41 = vadd.f32 %v1432_v18, %v1348_v37  ;;  %v1147_v54 = vadd.f32 %v1131_v34, %v1047_v44 }
 0x3ce   :  { %v1350_v19 = vadd.f32 %v1334_v26, %v1250_v62  ;;  %v1149_v50 = vadd.f32 %v1133_v47, %v1049_v63  ;;  %v1233_v40 = vmul.f32 %v4712_v15, %v6469_v22  ;;  %v1252_v11 = vadd.f32 %v1236_v56, %v1152_v49  ;;  %v6473_v49 = vld [vmem:[#allocation23_spill] sm:$0xff] }
 0x3cf   :  { %v1488_v20 = vpop.permute.xlu1 %1487  ;;  %v1434_v6 = vmul.f32 %v4735_v30, %v6470_v7  ;;  %v1632_v48 = vmul.f32 %v4765_v31, %v1596_v57  ;;  %v1051_v21 = vadd.f32 %v1035_v46, %v5154_v23  ;;  %v1247_v34 = vadd.f32 %v1231_v2, %v1147_v54  ;;  %v6474_v62 = vld [vmem:[#allocation7_spill] sm:$0xff]  ;;  %v6476_v46 = vld [vmem:[#allocation33_spill] sm:$0xff] }
 0x3d0   :  { %v1530_v1 = vmul.f32 %v4759_v35, %v1488_v20  ;;  %v6472_v20 = vld [vmem:[#allocation14_spill] sm:$0xff]  ;;  %v1352_v47 = vadd.f32 %v1336_v0, %v1252_v11  ;;  %v1331_v18 = vmul.f32 %v4727_v5, %v6473_v49  ;;  %v1249_v57 = vadd.f32 %v1233_v40, %v1149_v50  ;;  %v1612_v54 = vpop.permute.xlu0 %1611  ;;  %v6482_v49 = vld [vmem:[#allocation8_spill] sm:$0xff] }
 0x3d1   :  { %v1037_v37 = vmul.f32 %v4697_v16, %v6472_v20  ;;  %v1450_v44 = vadd.f32 %v1434_v6, %v1350_v19  ;;  %v1235_v16 = vmul.f32 %v4712_v15, %v6476_v46  ;;  %v1634_v56 = vmul.f32 %v4765_v31, %v1604_v17  ;;  %v6477_v19 = vld [vmem:[#allocation32_spill] sm:$0xff]  ;;  %v6478_v40 = vld [vmem:[#allocation38_spill] sm:$0xff] }
 0x3d2   :  { %v1546_v3 = vadd.f32 %v1530_v1, %v1446_v25  ;;  %v1433_v11 = vmul.f32 %v4735_v30, %v6478_v40  ;;  %v1849_v46 = vld [vmem:[#allocation2 + $0xa2] sm:$0xff] }
 0x3d3   :  { %v1496_v39 = vpop.permute.xlu1 %1495  ;;  %v1869_v40 = vmul.f32 %v4779_v52, %v1849_v46 }
 0x3d4   :  { %v1646_v58 = vadd.f32 %v1630_v10, %v1546_v3  ;;  %v1532_v61 = vmul.f32 %v4759_v35, %v1496_v39  ;;  %v1436_v10 = vmul.f32 %v4735_v30, %v6474_v62  ;;  %v6475_v3 = vld [vmem:[#allocation36_spill] sm:$0xff]  ;;  %v1435_v62 = vmul.f32 %v4735_v30, %v5146_v42 }
 0x3d5   :  { %v1431_v23 = vmul.f32 %v4735_v30, %v6475_v3  ;;  %v1797_v39 = vld [vmem:[#allocation2 + $0xa1] sm:$0xff] }
 0x3d6   :  { %v1669_v60 = vadd.f32 %v6471_v8, %v1646_v58  ;;  %v1548_v51 = vadd.f32 %v1532_v61, %v1448_v41  ;;  %v1333_v58 = vmul.f32 %v4727_v5, %v6477_v19  ;;  %v1151_v41 = vadd.f32 %v1135_v29, %v1051_v21 }
 0x3d7   :  { %v1504_v26 = vpop.permute.xlu1 %1503  ;;  %v1347_v61 = vadd.f32 %v1331_v18, %v1247_v34  ;;  %v1452_v50 = vadd.f32 %v1436_v10, %v1352_v47  ;;  %v1817_v20 = vmul.f32 %v4773_v32, %v1797_v39  ;;  %v1636_v21 = vmul.f32 %v4765_v31, %v1612_v54  ;;  %v6483_v39 = vld [vmem:[#allocation9_spill] sm:$0xff] }
 0x3d8   :  { %v1685_v25 = vmax.f32 %v1669_v60, 0.0  ;;  %v1648_v1 = vadd.f32 %v1632_v48, %v1548_v51  ;;  %v1534_v63 = vmul.f32 %v4759_v35, %v1504_v26  ;;  %v1053_v48 = vadd.f32 %v1037_v37, %v5173_v27  ;;  %v5261_v26 = vld [vmem:[#allocation2 + $0x31] sm:$0xff]  ;;  %v6481_v37 = vld [vmem:[#allocation31_spill] sm:$0xff] }
 0x3d9   :  { %v1447_v60 = vadd.f32 %v1431_v23, %v1347_v61  ;;  %v1349_v51 = vadd.f32 %v1333_v58, %v1249_v57  ;;  %v1251_v29 = vadd.f32 %v1235_v16, %v1151_v41  ;;  %v1531_v18 = vmul.f32 %v4759_v35, %v6482_v49  ;;  %v5308_v49 = vld [vmem:[#allocation2 + $0x40] sm:$0xff] }
 0x3da   :  { %1743 = vst.msk [vmem:[#allocation2 + $0xb1] sm:$0xff] %vm148_vm2, %v1685_v25  ;;  %v1671_v2 = vadd.f32 %v6471_v8, %v1648_v1  ;;  %v1550_v0 = vadd.f32 %v1534_v63, %v1450_v44  ;;  %v6479_v25 = vld [vmem:[#allocation30_spill] sm:$0xff]  ;;  %v6480_v44 = vld [vmem:[#allocation27_spill] sm:$0xff]  ;;  %v1237_v63 = vmul.f32 %v4712_v15, %v6481_v37  ;;  %v1533_v19 = vmul.f32 %v4759_v35, %v6483_v39 }
 0x3db   :  { %v1512_v22 = vpop.permute.xlu1 %1511  ;;  %v1137_v1 = vmul.f32 %v4709_v13, %v6479_v25  ;;  %v1335_v27 = vmul.f32 %v4727_v5, %v6480_v44  ;;  %v1449_v57 = vadd.f32 %v1433_v11, %v1349_v51  ;;  %v1812_v13 = vmul.f32 %v4773_v32, %v5261_v26  ;;  %v2105_v11 = vld [vmem:[#allocation2 + $0x51] sm:$0xff] }
 0x3dc   :  { %v1687_v7 = vmax.f32 %v1671_v2, 0.0  ;;  %v1650_v6 = vadd.f32 %v1634_v56, %v1550_v0  ;;  %v1536_v17 = vmul.f32 %v4759_v35, %v1512_v22  ;;  %v1547_v0 = vadd.f32 %v1531_v18, %v1447_v60  ;;  %v5292_v51 = vld [vmem:[#allocation2 + $0x32] sm:$0xff]  ;;  %v6486_v18 = vld [vmem:[#allocation35_spill] sm:$0xff] }
 0x3dd   :  { %v1153_v16 = vadd.f32 %v1137_v1, %v1053_v48  ;;  %v1351_v58 = vadd.f32 %v1335_v27, %v1251_v29  ;;  %v1833_v22 = vadd.f32 %v1817_v20, %v5208_v24  ;;  %v1549_v48 = vadd.f32 %v1533_v19, %v1449_v57  ;;  %v6484_v20 = vld [vmem:[#allocation24_spill] sm:$0xff]  ;;  %v6485_v44 = vld [vmem:[#allocation26_spill] sm:$0xff] }
 0x3de   :  { %1745 = vst.msk [vmem:[#allocation2 + $0xd1] sm:$0xff] %vm148_vm2, %v1687_v7  ;;  %v1673_v34 = vadd.f32 %v6471_v8, %v1650_v6  ;;  %v1552_v47 = vadd.f32 %v1536_v17, %v1452_v50  ;;  %v1828_v24 = vadd.f32 %v1812_v13, %v5197_v4  ;;  %v1337_v25 = vmul.f32 %v4727_v5, %v6484_v20  ;;  %v2157_v37 = vld [vmem:[#allocation2 + $0x52] sm:$0xff] }
 0x3df   :  { %v1253_v7 = vadd.f32 %v1237_v63, %v1153_v16  ;;  %v1451_v6 = vadd.f32 %v1435_v62, %v1351_v58  ;;  %v1437_v1 = vmul.f32 %v4735_v30, %v5181_v33  ;;  %v5304_v27 = vmul.f32 %v6485_v44, %v2105_v11  ;;  %v5306_v63 = vld [vmem:[#allocation2 + $0x70] sm:$0xff] }
 0x3e0   :  { %v1689_v10 = vmax.f32 %v1673_v34, 0.0  ;;  %v1652_v3 = vadd.f32 %v1636_v21, %v1552_v47  ;;  %v1592_v23 = vpop.permute.xlu1 %1591  ;;  %v1535_v57 = vmul.f32 %v4759_v35, %v6486_v18  ;;  %v1864_v30 = vmul.f32 %v4779_v52, %v5292_v51 }
 0x3e1   :  { %v1762_v56 = vld [vmem:[#allocation2 + $0xb0] sm:$0xff]  ;;  %v1631_v15 = vmul.f32 %v4765_v31, %v1592_v23  ;;  %v1353_v33 = vadd.f32 %v1337_v25, %v1253_v7  ;;  %v1885_v46 = vadd.f32 %v1869_v40, %v1833_v22  ;;  %v1780_v19 = vmul.f32 %v4769_v53, %v5306_v63  ;;  %v1845_v7 = vld [vmem:[#allocation2 + $0x42] sm:$0xff] }
 0x3e2   :  { %v5278_v2 = vld [vmem:[#allocation2 + $0xb1] sm:$0xff]  ;;  %v1782_v42 = vmul.f32 %v4769_v53, %v1762_v56  ;;  %1747 = vst.msk [vmem:[#allocation2 + $0xf1] sm:$0xff] %vm148_vm2, %v1689_v10  ;;  %v1675_v54 = vadd.f32 %v6471_v8, %v1652_v3  ;;  %v1921_v3 = vmul.f32 %v4945_v14, %v1762_v56  ;;  %v1551_v16 = vadd.f32 %v1535_v57, %v1451_v6 }
 0x3e3   :  { %v1818_v41 = vmul.f32 %v4773_v32, %v5278_v2  ;;  %v5286_v61 = vld [vmem:[#allocation2 + $0xb2] sm:$0xff]  ;;  %v1647_v50 = vadd.f32 %v1631_v15, %v1547_v0  ;;  %v6487_v15 = vld [vmem:[#allocation28_spill] sm:$0xff]  ;;  %v1880_v58 = vadd.f32 %v1864_v30, %v1828_v24  ;;  %v1916_v56 = vmul.f32 %v4945_v14, %v5308_v49  ;;  %v5347_v24 = vld [vmem:[#allocation2 + $0x60] sm:$0xff] }
 0x3e4   :  { %v1600_v60 = vpop.permute.xlu1 %1599  ;;  %v1870_v29 = vmul.f32 %v4779_v52, %v5286_v61  ;;  %v1691_v21 = vmax.f32 %v1675_v54, 0.0  ;;  %v5315_v10 = vld [vmem:[#allocation2 + $0x71] sm:$0xff]  ;;  %v5324_v39 = vmul.f32 %v6487_v15, %v2157_v37  ;;  %v1915_v22 = vmul.f32 %v4945_v14, %v5175_v9 }
 0x3e5   :  { %v1834_v17 = vadd.f32 %v1818_v41, %v1782_v42  ;;  %v1670_v34 = vadd.f32 %v6471_v8, %v1647_v50  ;;  %v1633_v47 = vmul.f32 %v4765_v31, %v1600_v60  ;;  %v1793_v42 = vld [vmem:[#allocation2 + $0x41] sm:$0xff]  ;;  %v1453_v41 = vadd.f32 %v1437_v1, %v1353_v33  ;;  %v5332_v50 = vld [vmem:[#allocation2 + $0x72] sm:$0xff] }
 0x3e6   :  { %1749 = vst.msk [vmem:[#allocation2 + $0x111] sm:$0xff] %vm148_vm2, %v1691_v21  ;;  %v1816_v54 = vmul.f32 %v4773_v32, %v5315_v10  ;;  %v1882_v6 = vadd.f32 %v5163_v36, %v5183_v43  ;;  %v1937_v60 = vadd.f32 %v1921_v3, %v1885_v46  ;;  %v6489_v1 = vld [vmem:[#allocation12_spill] sm:$0xff]  ;;  %v1968_v18 = vmul.f32 %v4959_v38, %v1793_v42 }
 0x3e7   :  { %v5313_v4 = vadd.f32 %v1870_v29, %v1834_v17  ;;  %v1686_v62 = vmax.f32 %v1670_v34, 0.0  ;;  %v1649_v5 = vadd.f32 %v1633_v47, %v1549_v48  ;;  %v1537_v17 = vmul.f32 %v4759_v35, %v5112_v45  ;;  %v6488_v29 = vld [vmem:[#allocation25_spill] sm:$0xff] }
 0x3e8   :  { %v1608_v23 = vpop.permute.xlu1 %1607  ;;  %v5342_v21 = vmul.f32 %v6488_v29, %v5141_v59  ;;  %v1777_v34 = vmul.f32 %v4769_v53, %v5308_v49  ;;  %v1813_v47 = vmul.f32 %v4773_v32, %v1793_v42  ;;  %v1868_v35 = vmul.f32 %v4779_v52, %v5332_v50 }
 0x3e9   :  { %1744 = vst.msk [vmem:[#allocation2 + $0xc1] sm:$0xff] %vm148_vm2, %v1686_v62  ;;  %v1672_v13 = vadd.f32 %v6471_v8, %v1649_v5  ;;  %v1635_v0 = vmul.f32 %v4765_v31, %v1608_v23  ;;  %v1932_v45 = vadd.f32 %v1916_v56, %v1880_v58  ;;  %v1973_v59 = vmul.f32 %v4959_v38, %v5278_v2  ;;  %v1795_v62 = vld [vmem:[#allocation2 + $0x61] sm:$0xff] }
 0x3ea   :  { %v1553_v20 = vadd.f32 %v1537_v17, %v1453_v41  ;;  %v1832_v25 = vadd.f32 %v1816_v54, %v1780_v19  ;;  %v1931_v37 = vadd.f32 %v1915_v22, %v6489_v1  ;;  %v2020_v57 = vmul.f32 %v6488_v29, %v1845_v7  ;;  %v5371_v54 = vld [vmem:[#allocation2 + $0x80] sm:$0xff] }
 0x3eb   :  { %v1688_v40 = vmax.f32 %v1672_v13, 0.0  ;;  %v1651_v11 = vadd.f32 %v1635_v0, %v1551_v16  ;;  %v1918_v5 = vmul.f32 %v4945_v14, %v5347_v24  ;;  %v1989_v46 = vadd.f32 %v1973_v59, %v1937_v60 }
 0x3ec   :  { %v1616_v48 = vpop.permute.xlu1 %1615  ;;  %v1829_v13 = vadd.f32 %v1813_v47, %v1777_v34  ;;  %v1779_v2 = vmul.f32 %v4769_v53, %v5347_v24  ;;  %v2025_v42 = vmul.f32 %v6488_v29, %v5286_v61  ;;  %v1984_v56 = vadd.f32 %v1968_v18, %v1932_v45 }
 0x3ed   :  { %1746 = vst.msk [vmem:[#allocation2 + $0xe1] sm:$0xff] %vm148_vm2, %v1688_v40  ;;  %v1674_v36 = vadd.f32 %v6471_v8, %v1651_v11  ;;  %v1637_v43 = vmul.f32 %v4765_v31, %v1616_v48  ;;  %v1815_v41 = vmul.f32 %v4773_v32, %v1795_v62  ;;  %v1934_v17 = vadd.f32 %v1918_v5, %v1882_v6 }
 0x3ee   :  { %v2041_v34 = vadd.f32 %v2025_v42, %v1989_v46  ;;  %v1970_v47 = vmul.f32 %v4959_v38, %v1795_v62  ;;  %v1920_v45 = vmul.f32 %v4945_v14, %v5371_v54  ;;  %v1967_v62 = vmul.f32 %v4959_v38, %v5261_v26  ;;  %v1952_v46 = vld [vmem:[#allocation2 + $0x81] sm:$0xff]  ;;  %v2107_v26 = vld [vmem:[#allocation2 + $0x71] sm:$0xff] }
 0x3ef   :  { %v1690_v3 = vmax.f32 %v1674_v36, 0.0  ;;  %v1653_v23 = vadd.f32 %v1637_v43, %v1553_v20  ;;  %v1847_v43 = vld [vmem:[#allocation2 + $0x62] sm:$0xff]  ;;  %v1831_v1 = vadd.f32 %v1815_v41, %v1779_v2  ;;  %v1884_v5 = vadd.f32 %v1868_v35, %v1832_v25 }
 0x3f0   :  { %v1763_v31 = vld [vmem:[#allocation2 + $0xc0] sm:$0xff]  ;;  %v1983_v35 = vadd.f32 %v1967_v62, %v1931_v37  ;;  %v1919_v25 = vmul.f32 %v4945_v14, %v5306_v63  ;;  %v1972_v41 = vmul.f32 %v4959_v38, %v1952_v46 }
 0x3f1   :  { %v1799_v30 = vld [vmem:[#allocation2 + $0xc1] sm:$0xff]  ;;  %v1783_v16 = vmul.f32 %v4769_v53, %v1763_v31  ;;  %v1922_v19 = vmul.f32 %v4945_v14, %v1763_v31  ;;  %1748 = vst.msk [vmem:[#allocation2 + $0x101] sm:$0xff] %vm148_vm2, %v1690_v3  ;;  %v1676_v58 = vadd.f32 %v6471_v8, %v1653_v23  ;;  %v2078_v11 = vmul.f32 %v4973_v55, %v1763_v31 }
 0x3f2   :  { %v1851_v33 = vld [vmem:[#allocation2 + $0xc2] sm:$0xff]  ;;  %v1819_v0 = vmul.f32 %v4773_v32, %v1799_v30  ;;  %v1865_v8 = vmul.f32 %v4779_v52, %v1845_v7  ;;  %v1974_v36 = vmul.f32 %v4959_v38, %v1799_v30  ;;  %v2130_v6 = vmul.f32 %v6485_v44, %v1799_v30 }
 0x3f3   :  { %v1871_v40 = vmul.f32 %v4779_v52, %v1851_v33  ;;  %v1938_v48 = vadd.f32 %v1922_v19, %v5313_v4  ;;  %v1692_v60 = vmax.f32 %v1676_v58, 0.0  ;;  %v2094_v59 = vadd.f32 %v2078_v11, %v2041_v34  ;;  %v2055_v19 = vld [vmem:[#allocation2 + $0x70] sm:$0xff]  ;;  %v2004_v37 = vld [vmem:[#allocation2 + $0x82] sm:$0xff] }
 0x3f4   :  { %v1835_v22 = vadd.f32 %v1819_v0, %v1783_v16  ;;  %v2036_v4 = vadd.f32 %v2020_v57, %v1984_v56  ;;  %v1881_v20 = vadd.f32 %v1865_v8, %v1829_v13  ;;  %v2026_v7 = vmul.f32 %v6488_v29, %v1851_v33  ;;  %v2103_v56 = vld [vmem:[#allocation2 + $0x31] sm:$0xff] }
 0x3f5   :  { %1750 = vst.msk [vmem:[#allocation2 + $0x121] sm:$0xff] %vm148_vm2, %v1692_v60  ;;  %v1990_v18 = vadd.f32 %v1974_v36, %v1938_v48  ;;  %v2146_v31 = vadd.f32 %v2130_v6, %v2094_v59  ;;  %v1986_v3 = vadd.f32 %v1970_v47, %v1934_v17  ;;  %v1867_v23 = vmul.f32 %v4779_v52, %v1847_v43  ;;  %v6491_v17 = vld [vmem:[#allocation13_spill] sm:$0xff]  ;;  %v6493_v59 = vld [vmem:[#allocation20_spill] sm:$0xff] }
 0x3f6   :  { %v5378_v61 = vadd.f32 %v1871_v40, %v1835_v22  ;;  %v2182_v16 = vmul.f32 %v6487_v15, %v1851_v33  ;;  %v2071_v30 = vmul.f32 %v4973_v55, %v5175_v9  ;;  %v2022_v13 = vmul.f32 %v6488_v29, %v1847_v43  ;;  %v6490_v22 = vld [vmem:[#allocation11_spill] sm:$0xff]  ;;  %v6492_v43 = vld [vmem:[#allocation16_spill] sm:$0xff] }
 0x3f7   :  { %v5392_v57 = vadd.f32 %v2026_v7, %v1990_v18  ;;  %v1936_v2 = vadd.f32 %v1920_v45, %v1884_v5  ;;  %v2089_v0 = vadd.f32 %v5190_v28, %v2036_v4  ;;  %v1883_v58 = vadd.f32 %v1867_v23, %v1831_v1  ;;  %v6494_v4 = vld [vmem:[#allocation44_spill] sm:$0xff]  ;;  %v2109_v5 = vld [vmem:[#allocation2 + $0x91] sm:$0xff] }
 0x3f8   :  { %v2198_v42 = vadd.f32 %v2182_v16, %v2146_v31  ;;  %v1933_v33 = vadd.f32 %v5166_v12, %v1881_v20  ;;  %v2019_v9 = vmul.f32 %v6488_v29, %v5292_v51  ;;  %v2087_v40 = vadd.f32 %v2071_v30, %v6490_v22  ;;  %v6495_v31 = vld [vmem:[#allocation3_spill] sm:$0xff]  ;;  %v6496_v23 = vld [vmem:[#allocation4_spill] sm:$0xff]  ;;  %v6497_v16 = vld [vmem:[#allocation22_spill] sm:$0xff] }
 0x3f9   :  { %v2038_v11 = vadd.f32 %v2022_v13, %v1986_v3  ;;  %v1971_v28 = vmul.f32 %v4959_v38, %v5315_v10  ;;  %v2075_v63 = vmul.f32 %v4973_v55, %v2055_v19  ;;  %v2127_v60 = vmul.f32 %v6485_v44, %v2107_v26  ;;  %v2155_v10 = vld [vmem:[#allocation2 + $0x32] sm:$0xff] }
 0x3fa   :  { %v2221_v48 = vadd.f32 %v6491_v17, %v2198_v42  ;;  %v2141_v12 = vadd.f32 %v5304_v27, %v2089_v0  ;;  %v2123_v34 = vmul.f32 %v6485_v44, %v2103_v56  ;;  %v2035_v51 = vadd.f32 %v2019_v9, %v1983_v35  ;;  %v2313_v47 = vpop.permute.xlu0 %2312  ;;  %v2412_v36 = vpop.permute.xlu1 %2411  ;;  %v6498_v13 = vld [vmem:[#allocation21_spill] sm:$0xff]  ;;  %v2104_v0 = vld [vmem:[#allocation2 + $0x41] sm:$0xff] }
 0x3fb   :  { %v1988_v8 = vadd.f32 %v1972_v41, %v1936_v2  ;;  %v1985_v20 = vadd.f32 %v6494_v4, %v1933_v33  ;;  %v1935_v1 = vadd.f32 %v1919_v25, %v1883_v58  ;;  %v2024_v7 = vmul.f32 %v6488_v29, %v2004_v37  ;;  %v2159_v42 = vld [vmem:[#allocation2 + $0x72] sm:$0xff] }
 0x3fc   :  { %v2237_v45 = vmul.f32 %v2221_v48, %v6492_v43  ;;  %v2269_v6 = vmul.f32 %v2221_v48, %v6493_v59  ;;  %v2139_v18 = vadd.f32 %v2123_v34, %v2087_v40  ;;  %v2091_v62 = vadd.f32 %v2075_v63, %v2038_v11  ;;  %v6499_v48 = vld [vmem:[#allocation5_spill] sm:$0xff] }
 0x3fd   :  { %v2072_v27 = vmul.f32 %v4973_v55, %v5308_v49  ;;  %v2394_v3 = vmul.f32 %v6495_v31, %v2313_v47  ;;  %v2478_v46 = vmul.f32 %v6496_v23, %v2412_v36  ;;  %v2193_v19 = vadd.f32 %v5324_v39, %v2141_v12  ;;  %v2156_v12 = vld [vmem:[#allocation2 + $0x42] sm:$0xff]  ;;  %v2161_v34 = vld [vmem:[#allocation2 + $0x92] sm:$0xff] }
 0x3fe   :  { %v2253_v30 = vadd.f32 %v2237_v45, %v6497_v16  ;;  %v2285_v2 = vadd.f32 %v2269_v6, %v6498_v13  ;;  %v2175_v26 = vmul.f32 %v6487_v15, %v2155_v10  ;;  %v2040_v25 = vadd.f32 %v2024_v7, %v1988_v8  ;;  %v6500_v8 = vld [vmem:[#allocation43_spill] sm:$0xff] }
 0x3ff   :  { %v2088_v35 = vadd.f32 %v2072_v27, %v2035_v51  ;;  %v2129_v49 = vmul.f32 %v6485_v44, %v2109_v5  ;;  %v2037_v56 = vadd.f32 %v5342_v21, %v1985_v20  ;;  %v1987_v33 = vadd.f32 %v1971_v28, %v1935_v1  ;;  %v2512_v9 = vpop.permute.xlu0 %2511  ;;  %v2612_v41 = vpop.permute.xlu1 %2611  ;;  %v6501_v45 = vld [vmem:[#allocation39_spill] sm:$0xff] }
 0x400   :  { %v5422_v58 = vmax.f32 %v2253_v30, %v2285_v2  ;;  %v2191_v22 = vadd.f32 %v2175_v26, %v2139_v18  ;;  %v2143_v40 = vadd.f32 %v2127_v60, %v2091_v62  ;;  %v2124_v11 = vmul.f32 %v6485_v44, %v2104_v0  ;;  %v6504_v2 = vld [vmem:[#allocation40_spill] sm:$0xff] }
 0x401   :  { %v2074_v39 = vmul.f32 %v4973_v55, %v5347_v24  ;;  %v2494_v37 = vadd.f32 %v2478_v46, %v2394_v3  ;;  %v2578_v63 = vmul.f32 %v6499_v48, %v2512_v9  ;;  %v2023_v21 = vmul.f32 %v6488_v29, %v5332_v50  ;;  %v2106_v24 = vld [vmem:[#allocation2 + $0x61] sm:$0xff] }
 0x402   :  { %2443 = vperm.xlu0 %3362, %v5422_v58   ;;  %2352 = vperm.xlu1 %3361, %v5422_v58   ;;  %v2216_v28 = vadd.f32 %v6491_v17, %v2193_v19  ;;  %v2179_v60 = vmul.f32 %v6487_v15, %v2159_v42  ;;  %v2140_v51 = vadd.f32 %v2124_v11, %v2088_v35  ;;  %v6502_v5 = vmov 3   ;;  %v2158_v35 = vld [vmem:[#allocation2 + $0x62] sm:$0xff]  ;;  %v6507_v11 = vld [vmem:[#allocation41_spill] sm:$0xff] }
 0x403   :  { %v2093_v47 = vadd.f32 %v6500_v8, %v2040_v25  ;;  %v2594_v36 = vadd.f32 %v2578_v63, %v2494_v37  ;;  %v2678_v6 = vmul.f32 %v6501_v45, %v2612_v41  ;;  %v2090_v10 = vadd.f32 %v2074_v39, %v2037_v56  ;;  %v2108_v25 = vld [vmem:[#allocation2 + $0x81] sm:$0xff]  ;;  %v6508_v63 = vld [vmem:[#allocation10_spill] sm:$0xff] }
 0x404   :  { %v2039_v4 = vadd.f32 %v2023_v21, %v1987_v33  ;;  %v2214_v20 = vadd.f32 %v6491_v17, %v2191_v22  ;;  %v2195_v1 = vadd.f32 %v2179_v60, %v2143_v40  ;;  %v2176_v7 = vmul.f32 %v6487_v15, %v2156_v12  ;;  %v2712_v62 = vpop.permute.xlu0 %2711  ;;  %v2812_v27 = vpop.permute.xlu1 %2811  ;;  %v6505_v42 = vld [vmem:[#allocation15_spill] sm:$0xff]  ;;  %v6506_v33 = vld [vmem:[#allocation17_spill] sm:$0xff] }
 0x405   :  { %v2181_v50 = vmul.f32 %v6487_v15, %v2161_v34  ;;  %v2694_v18 = vadd.f32 %v2678_v6, %v2594_v36  ;;  %v6503_v3 = vmov 2   ;;  %v2126_v46 = vmul.f32 %v6485_v44, %v2106_v24  ;;  %v6509_v12 = vld [vmem:[#allocation37_spill] sm:$0xff] }
 0x406   :  { %3364 = vset.pattern.permute.xlu0 %v6502_v5  ;;  %3363 = vset.pattern.permute.xlu1 %v6503_v3  ;;  %v2076_v30 = vmul.f32 %v4973_v55, %v5371_v54  ;;  %v2778_v0 = vmul.f32 %v6504_v2, %v2712_v62  ;;  %v2192_v19 = vadd.f32 %v2176_v7, %v2140_v51  ;;  %v6512_v24 = vmov 4  }
 0x407   :  { %2643 = vperm.xlu0 %3364, %v5422_v58   ;;  %2543 = vperm.xlu1 %3363, %v5422_v58   ;;  %v2145_v26 = vadd.f32 %v2129_v49, %v2093_v47  ;;  %v2232_v56 = vmul.f32 %v2216_v28, %v6505_v42  ;;  %v2264_v9 = vmul.f32 %v2216_v28, %v6506_v33  ;;  %v6511_v47 = vmov 5  }
 0x408   :  { %v2142_v41 = vadd.f32 %v2126_v46, %v2090_v10  ;;  %v2092_v22 = vadd.f32 %v2076_v30, %v2039_v4  ;;  %v2794_v40 = vadd.f32 %v2778_v0, %v2694_v18  ;;  %v2878_v39 = vmul.f32 %v6507_v11, %v2812_v27  ;;  %v2160_v10 = vld [vmem:[#allocation2 + $0x82] sm:$0xff]  ;;  %v6513_v4 = vld [vmem:[#allocation42_spill] sm:$0xff] }
 0x409   :  { %v2230_v54 = vmul.f32 %v2214_v20, %v6505_v42  ;;  %v2218_v37 = vadd.f32 %v6491_v17, %v2195_v1  ;;  %v5456_v34 = vrot.slane %v6509_v12, %v6508_v63  ;;  %v2262_v49 = vmul.f32 %v2214_v20, %v6506_v33  ;;  %v2912_v51 = vpop.permute.xlu0 %2911  ;;  %v3012_v8 = vpop.permute.xlu1 %3011  ;;  %v6514_v18 = vld [vmem:[#allocation18_spill] sm:$0xff]  ;;  %v6515_v27 = vld [vmem:[#allocation19_spill] sm:$0xff] }
 0x40a   :  { %v2178_v21 = vmul.f32 %v6487_v15, %v2158_v35  ;;  %v2128_v60 = vmul.f32 %v6485_v44, %v2108_v25  ;;  %v2894_v28 = vadd.f32 %v2878_v39, %v2794_v40  ;;  %v2215_v36 = vadd.f32 %v6491_v17, %v2192_v19  ;;  %v5477_v25 = vld [vmem:[%s6260_s15] ss:$0 sm:$0xff] }
 0x40b   :  { %6510 = vst [vmem:[#allocation29_spill] sm:$0xff] %v5456_v34  ;;  %3366 = vset.pattern.permute.xlu0 %v6511_v47  ;;  %3365 = vset.pattern.permute.xlu1 %v6512_v24  ;;  %v2197_v6 = vadd.f32 %v2181_v50, %v2145_v26  ;;  %v2978_v1 = vmul.f32 %v6513_v4, %v2912_v51  ;;  %6516 = vst [vmem:[#allocation6_spill] sm:$0xff] %v5477_v25  ;;  %v6517_v39 = vmov 7  }
 0x40c   :  { %2843 = vperm.xlu0 %3366, %v5422_v58   ;;  %2743 = vperm.xlu1 %3365, %v5422_v58   ;;  %v2194_v20 = vadd.f32 %v2178_v21, %v2142_v41  ;;  %v2144_v7 = vadd.f32 %v2128_v60, %v2092_v22  ;;  %v2248_v62 = vadd.f32 %v2232_v56, %v6514_v18 }
 0x40d   :  { %v2280_v46 = vadd.f32 %v2264_v9, %v6515_v27  ;;  %v2246_v30 = vadd.f32 %v2230_v54, %v6514_v18  ;;  %v2234_v0 = vmul.f32 %v2218_v37, %v6505_v42  ;;  %v2994_v35 = vadd.f32 %v2978_v1, %v2894_v28 }
 0x40e   :  { %v3078_v50 = vmul.f32 %v5456_v34, %v3012_v8  ;;  %v2266_v19 = vmul.f32 %v2218_v37, %v6506_v33  ;;  %v2180_v26 = vmul.f32 %v6487_v15, %v2160_v10  ;;  %v2278_v56 = vadd.f32 %v2262_v49, %v6515_v27 }
 0x40f   :  { %v2231_v9 = vmul.f32 %v2215_v36, %v6505_v42  ;;  %v2263_v41 = vmul.f32 %v2215_v36, %v6506_v33  ;;  %v2220_v22 = vadd.f32 %v6491_v17, %v2197_v6  ;;  %v6518_v54 = vmov 6  }
 0x410   :  { %v3094_v40 = vadd.f32 %v3078_v50, %v2994_v35  ;;  %3368 = vset.pattern.permute.xlu0 %v6517_v39  ;;  %3367 = vset.pattern.permute.xlu1 %v6518_v54  ;;  %v2217_v15 = vadd.f32 %v6491_v17, %v2194_v20  ;;  %v2196_v37 = vadd.f32 %v2180_v26, %v2144_v7  ;;  %v6519_v1 = vmov 0  }
 0x411   :  { %3043 = vperm.xlu0 %3368, %v5422_v58   ;;  %2943 = vperm.xlu1 %3367, %v5422_v58   ;;  %v5489_v12 = vmax.f32 %v2248_v62, %v2280_v46  ;;  %v2250_v49 = vadd.f32 %v2234_v0, %v6514_v18  ;;  %v2282_v21 = vadd.f32 %v2266_v19, %v6515_v27 }
 0x412   :  { %v3117_v63 = vadd.f32 %v5477_v25, %v3094_v40  ;;  %v2247_v60 = vadd.f32 %v2231_v9, %v6514_v18  ;;  %v2279_v28 = vadd.f32 %v2263_v41, %v6515_v27  ;;  %v2236_v51 = vmul.f32 %v2220_v22, %v6505_v42  ;;  %v5569_v40 = vld [vmem:[#allocation2 + $0xf1] sm:$0xff] }
 0x413   :  { %v2268_v8 = vmul.f32 %v2220_v22, %v6506_v33  ;;  %v5501_v58 = vmax.f32 %v2246_v30, %v2278_v56  ;;  %v2233_v36 = vmul.f32 %v2217_v15, %v6505_v42  ;;  %v2265_v6 = vmul.f32 %v2217_v15, %v6506_v33  ;;  %v5567_v22 = vld [vmem:[#allocation2 + $0xf0] sm:$0xff] }
 0x414   :  { %3133 = vst.msk [vmem:[%s6261_s16] sm:$0xff] %vm148_vm2, %v3117_v63  ;;  %v2219_v10 = vadd.f32 %v6491_v17, %v2196_v37  ;;  %v5510_v20 = vmax.f32 %v2250_v49, %v2282_v21  ;;  %v5512_v7 = vmax.f32 %v2247_v60, %v2279_v28  ;;  %v2252_v62 = vadd.f32 %v2236_v51, %v6514_v18  ;;  %v5572_v15 = vld [vmem:[#allocation2 + $0xd2] sm:$0xff]  ;;  %v5574_v37 = vld [vmem:[#allocation2 + $0xe0] sm:$0xff] }
 0x415   :  { %3370 = vset.pattern.permute.xlu0 %v6519_v1  ;;  %3369 = vset.pattern.permute.xlu1 %v6519_v1  ;;  %v2284_v46 = vadd.f32 %v2268_v8, %v6515_v27  ;;  %v2249_v30 = vadd.f32 %v2233_v36, %v6514_v18  ;;  %v2281_v17 = vadd.f32 %v2265_v6, %v6515_v27  ;;  %v5584_v28 = vld [vmem:[#allocation2 + $0x110] sm:$0xff]  ;;  %v5593_v6 = vld [vmem:[#allocation2 + $0x100] sm:$0xff] }
 0x416   :  { %2327 = vperm.xlu0 %3370, %v5489_v12   ;;  %2317 = vperm.xlu1 %3369, %v5501_v58   ;;  %v2235_v0 = vmul.f32 %v2219_v10, %v6505_v42  ;;  %v2267_v35 = vmul.f32 %v2219_v10, %v6506_v33  ;;  %v6520_v42 = vmov 1   ;;  %v1764_v33 = vld [vmem:[#allocation2 + $0xd0] sm:$0xff]  ;;  %v1786_v49 = vmul.f32 %v4769_v53, %v5567_v22 }
 0x417   :  { %v5522_v50 = vmax.f32 %v2252_v62, %v2284_v46  ;;  %v5524_v19 = vmax.f32 %v2249_v30, %v2281_v17  ;;  %v1822_v21 = vmul.f32 %v4773_v32, %v5569_v40  ;;  %v1872_v60 = vmul.f32 %v4779_v52, %v5572_v15  ;;  %v5586_v51 = vld [vmem:[#allocation2 + $0x111] sm:$0xff]  ;;  %v5600_v17 = vld [vmem:[#allocation2 + $0xe1] sm:$0xff] }
 0x418   :  { %v2251_v26 = vadd.f32 %v2235_v0, %v6514_v18  ;;  %v2283_v56 = vadd.f32 %v2267_v35, %v6515_v27  ;;  %v5560_v18 = vld [vmem:[#allocation2 + $0xd1] sm:$0xff]  ;;  %v1784_v27 = vmul.f32 %v4769_v53, %v1764_v33  ;;  %v1924_v8 = vmul.f32 %v4945_v14, %v5574_v37 }
 0x419   :  { %v1820_v41 = vmul.f32 %v4773_v32, %v5560_v18  ;;  %v5591_v36 = vld [vmem:[#allocation2 + $0xf2] sm:$0xff]  ;;  %v1838_v10 = vadd.f32 %v1822_v21, %v1786_v49  ;;  %v1788_v46 = vmul.f32 %v4769_v53, %v5584_v28  ;;  %v1824_v30 = vmul.f32 %v4773_v32, %v5586_v51  ;;  %v5614_v21 = vld [vmem:[#allocation2 + $0xe2] sm:$0xff] }
 0x41a   :  { %2337 = vperm.xlu0 %3370, %v5510_v20   ;;  %2322 = vperm.xlu1 %3369, %v5512_v7   ;;  %v5530_v9 = vmax.f32 %v2251_v26, %v2283_v56  ;;  %v1874_v0 = vmul.f32 %v4779_v52, %v5591_v36  ;;  %v1926_v26 = vmul.f32 %v4945_v14, %v5593_v6  ;;  %v5608_v56 = vld [vmem:[#allocation2 + $0x112] sm:$0xff] }
 0x41b   :  { %v1836_v63 = vadd.f32 %v1820_v41, %v1784_v27  ;;  %v1976_v27 = vmul.f32 %v4959_v38, %v5600_v17  ;;  %v1840_v49 = vadd.f32 %v1824_v30, %v1788_v46  ;;  %v2028_v30 = vmul.f32 %v6488_v29, %v5614_v21 }
 0x41c   :  { %v1890_v41 = vadd.f32 %v1874_v0, %v1838_v10  ;;  %v1821_v10 = vmul.f32 %v4773_v32, %v5600_v17  ;;  %v1923_v34 = vmul.f32 %v4945_v14, %v1764_v33  ;;  %v2133_v48 = vmul.f32 %v6485_v44, %v5569_v40 }
 0x41d   :  { %v1888_v62 = vadd.f32 %v1872_v60, %v1836_v63  ;;  %v5612_v63 = vld [vmem:[#allocation2 + $0x120] sm:$0xff] }
 0x41e   :  { %2347 = vperm.xlu0 %3370, %v5522_v50   ;;  %2332 = vperm.xlu1 %3369, %v5524_v19   ;;  %v5616_v60 = vld [vmem:[#allocation2 + $0x101] sm:$0xff]  ;;  %v1928_v46 = vmul.f32 %v4945_v14, %v5612_v63 }
 0x41f   :  { %v1940_v35 = vadd.f32 %v1924_v8, %v1888_v62  ;;  %v1942_v8 = vadd.f32 %v1926_v26, %v1890_v41  ;;  %v1978_v0 = vmul.f32 %v4959_v38, %v5616_v60  ;;  %v5632_v26 = vld [vmem:[#allocation2 + $0x102] sm:$0xff] }
 0x420   :  { %v5636_v41 = vld [vmem:[#allocation2 + $0x121] sm:$0xff]  ;;  %v2030_v2 = vmul.f32 %v6488_v29, %v5632_v26 }
 0x421   :  { %v1992_v62 = vadd.f32 %v1976_v27, %v1940_v35  ;;  %v2079_v27 = vmul.f32 %v4973_v55, %v1764_v33  ;;  %v1994_v25 = vadd.f32 %v1978_v0, %v1942_v8  ;;  %v2081_v8 = vmul.f32 %v4973_v55, %v5567_v22 }
 0x422   :  { %3371 = vset.pattern.permute.xlu0 %v6520_v42  ;;  %2342 = vperm.xlu1 %3369, %v5530_v9   ;;  %v1980_v33 = vmul.f32 %v4959_v38, %v5636_v41 }
 0x423   :  { %2415 = vperm.xlu0 %3371, %v5501_v58   ;;  %v2095_v11 = vadd.f32 %v2079_v27, %v5392_v57  ;;  %v1939_v57 = vadd.f32 %v1923_v34, %v5378_v61  ;;  %v2065_v27 = vld [vmem:[#allocation2 + $0x130] sm:$0xff]  ;;  %v2083_v61 = vmul.f32 %v4973_v55, %v5584_v28 }
 0x426   :  { %3372 = vset.pattern.permute.xlu1 %v6520_v42 }
 0x427   :  { %2427 = vperm.xlu0 %3371, %v5524_v19   ;;  %2419 = vperm.xlu1 %3372, %v5512_v7  }
 0x42b   :  { %2435 = vperm.xlu0 %3371, %v5530_v9   ;;  %2423 = vperm.xlu1 %3372, %v5489_v12  }
 0x42f   :  { %3374 = vset.pattern.permute.xlu0 %v6503_v3  ;;  %2431 = vperm.xlu1 %3372, %v5510_v20  }
 0x430   :  { %2523 = vperm.xlu0 %3374, %v5489_v12  }
 0x433   :  { %2439 = vperm.xlu1 %3372, %v5522_v50  }
 0x434   :  { %2531 = vperm.xlu0 %3374, %v5510_v20  }
 0x437   :  { %3373 = vset.pattern.permute.xlu1 %v6503_v3  ;;  %v2044_v3 = vadd.f32 %v2028_v30, %v1992_v62 }
 0x438   :  { %2539 = vperm.xlu0 %3374, %v5522_v50   ;;  %2515 = vperm.xlu1 %3373, %v5501_v58  }
 0x439   :  { %v2097_v62 = vadd.f32 %v2081_v8, %v2044_v3  ;;  %v1925_v3 = vmul.f32 %v4945_v14, %v5567_v22  ;;  %v2085_v22 = vmul.f32 %v4973_v55, %v2065_v27  ;;  %v2117_v8 = vld [vmem:[#allocation2 + $0x131] sm:$0xff] }
 0x43c   :  { %3375 = vset.pattern.permute.xlu0 %v6502_v5  ;;  %2519 = vperm.xlu1 %3373, %v5512_v7  }
 0x43d   :  { %2615 = vperm.xlu0 %3375, %v5501_v58  }
 0x440   :  { %2527 = vperm.xlu1 %3373, %v5524_v19  }
 0x441   :  { %2627 = vperm.xlu0 %3375, %v5524_v19  }
 0x444   :  { %2535 = vperm.xlu1 %3373, %v5530_v9  }
 0x445   :  { %2635 = vperm.xlu0 %3375, %v5530_v9  }
 0x448   :  { %3376 = vset.pattern.permute.xlu1 %v6502_v5  ;;  %v1785_v5 = vmul.f32 %v4769_v53, %v5574_v37 }
 0x449   :  { %3378 = vset.pattern.permute.xlu0 %v6512_v24  ;;  %2619 = vperm.xlu1 %3376, %v5512_v7  }
 0x44a   :  { %2723 = vperm.xlu0 %3378, %v5489_v12   ;;  %v1837_v4 = vadd.f32 %v1821_v10, %v1785_v5  ;;  %v1873_v5 = vmul.f32 %v4779_v52, %v5614_v21  ;;  %v2046_v10 = vadd.f32 %v2030_v2, %v1994_v25  ;;  %v1875_v25 = vmul.f32 %v4779_v52, %v5632_v26 }
 0x44c   :  { %v1889_v30 = vadd.f32 %v1873_v5, %v1837_v4  ;;  %v2027_v5 = vmul.f32 %v6488_v29, %v5572_v15 }
 0x44d   :  { %2623 = vperm.xlu1 %3376, %v5489_v12  }
 0x44e   :  { %2731 = vperm.xlu0 %3378, %v5510_v20  }
 0x451   :  { %2631 = vperm.xlu1 %3376, %v5510_v20  }
 0x452   :  { %2739 = vperm.xlu0 %3378, %v5522_v50  }
 0x455   :  { %2639 = vperm.xlu1 %3376, %v5522_v50  }
 0x456   :  { %3379 = vset.pattern.permute.xlu0 %v6511_v47 }
 0x457   :  { %2815 = vperm.xlu0 %3379, %v5501_v58  }
 0x459   :  { %3377 = vset.pattern.permute.xlu1 %v6512_v24  ;;  %v1876_v24 = vmul.f32 %v4779_v52, %v5608_v56  ;;  %v2135_v52 = vmul.f32 %v6485_v44, %v5586_v51 }
 0x45a   :  { %2715 = vperm.xlu1 %3377, %v5501_v58  }
 0x45b   :  { %2827 = vperm.xlu0 %3379, %v5524_v19   ;;  %v1892_v35 = vadd.f32 %v1876_v24, %v1840_v49  ;;  %v1787_v24 = vmul.f32 %v4769_v53, %v5593_v6  ;;  %v1823_v49 = vmul.f32 %v4773_v32, %v5616_v60  ;;  %v2131_v53 = vmul.f32 %v6485_v44, %v5560_v18  ;;  %v5658_v32 = vld [vmem:[#allocation2 + $0x122] sm:$0xff] }
 0x45c   :  { %v2032_v2 = vmul.f32 %v6488_v29, %v5658_v32 }
 0x45d   :  { %v1944_v42 = vadd.f32 %v1928_v46, %v1892_v35  ;;  %v1975_v46 = vmul.f32 %v4959_v38, %v5560_v18  ;;  %v2147_v0 = vadd.f32 %v2131_v53, %v2095_v11  ;;  %v1839_v45 = vadd.f32 %v1823_v49, %v1787_v24  ;;  %v5675_v11 = vld [vmem:[%s6256_s12 + $0x8] ss:$0 sm:$0xff] }
 0x45e   :  { %2719 = vperm.xlu1 %3377, %v5512_v7   ;;  %v2183_v34 = vmul.f32 %v5675_v11, %v5572_v15  ;;  %v2099_v18 = vadd.f32 %v2083_v61, %v2046_v10  ;;  %v1927_v10 = vmul.f32 %v4945_v14, %v5584_v28  ;;  %v2137_v15 = vmul.f32 %v6485_v44, %v2117_v8 }
 0x45f   :  { %2835 = vperm.xlu0 %3379, %v5530_v9   ;;  %v1996_v35 = vadd.f32 %v1980_v33, %v1944_v42  ;;  %v1991_v4 = vadd.f32 %v1975_v46, %v1939_v57  ;;  %v2149_v42 = vadd.f32 %v2133_v48, %v2097_v62  ;;  %v1941_v33 = vadd.f32 %v1925_v3, %v1889_v30  ;;  %v5700_v30 = vld [vmem:[%s6258_s13] ss:$0 sm:$0xff] }
 0x460   :  { %v2199_v24 = vadd.f32 %v2183_v34, %v2147_v0  ;;  %v1891_v53 = vadd.f32 %v1875_v25, %v1839_v45  ;;  %v2185_v57 = vmul.f32 %v5675_v11, %v5591_v36  ;;  %v1977_v48 = vmul.f32 %v4959_v38, %v5569_v40  ;;  %v2169_v45 = vld [vmem:[#allocation2 + $0x132] sm:$0xff] }
 0x461   :  { %v2048_v49 = vadd.f32 %v2032_v2, %v1996_v35  ;;  %v2043_v62 = vadd.f32 %v2027_v5, %v1991_v4  ;;  %v2151_v0 = vadd.f32 %v2135_v52, %v2099_v18  ;;  %v2080_v14 = vmul.f32 %v4973_v55, %v5574_v37 }
 0x462   :  { %2727 = vperm.xlu1 %3377, %v5524_v19   ;;  %v2201_v46 = vadd.f32 %v2185_v57, %v2149_v42  ;;  %v2222_v40 = vadd.f32 %v5700_v30, %v2199_v24  ;;  %v1993_v28 = vadd.f32 %v1977_v48, %v1941_v33  ;;  %v2187_v27 = vmul.f32 %v5675_v11, %v5608_v56 }
 0x463   :  { %3382 = vset.pattern.permute.xlu0 %v6518_v54  ;;  %v2101_v35 = vadd.f32 %v2085_v22, %v2048_v49  ;;  %v1943_v61 = vadd.f32 %v1927_v10, %v1891_v53  ;;  %v2189_v3 = vmul.f32 %v5675_v11, %v2169_v45  ;;  %v2096_v2 = vadd.f32 %v2080_v14, %v2043_v62 }
 0x464   :  { %2923 = vperm.xlu0 %3382, %v5489_v12   ;;  %v2029_v34 = vmul.f32 %v6488_v29, %v5591_v36  ;;  %v1979_v4 = vmul.f32 %v4959_v38, %v5586_v51  ;;  %v2224_v37 = vadd.f32 %v5700_v30, %v2201_v46  ;;  %v2203_v25 = vadd.f32 %v2187_v27, %v2151_v0 }
 0x465   :  { %v2132_v42 = vmul.f32 %v6485_v44, %v5600_v17  ;;  %v2238_v18 = vmul.f32 %v2222_v40, %v6492_v43  ;;  %v2270_v22 = vmul.f32 %v2222_v40, %v6493_v59  ;;  %v2153_v24 = vadd.f32 %v2137_v15, %v2101_v35 }
 0x466   :  { %2735 = vperm.xlu1 %3377, %v5530_v9   ;;  %v2045_v49 = vadd.f32 %v2029_v34, %v1993_v28  ;;  %v1995_v36 = vadd.f32 %v1979_v4, %v1943_v61  ;;  %v2184_v38 = vmul.f32 %v5675_v11, %v5614_v21  ;;  %v2082_v51 = vmul.f32 %v4973_v55, %v5593_v6 }
 0x467   :  { %v2148_v8 = vadd.f32 %v2132_v42, %v2096_v2  ;;  %v2240_v17 = vmul.f32 %v2224_v37, %v6492_v43  ;;  %v2272_v5 = vmul.f32 %v2224_v37, %v6493_v59  ;;  %v2226_v33 = vadd.f32 %v5700_v30, %v2203_v25 }
 0x468   :  { %2931 = vperm.xlu0 %3382, %v5510_v20   ;;  %v2031_v53 = vmul.f32 %v6488_v29, %v5608_v56  ;;  %v2254_v57 = vadd.f32 %v2238_v18, %v6497_v16  ;;  %v2286_v52 = vadd.f32 %v2270_v22, %v6498_v13  ;;  %v2205_v48 = vadd.f32 %v2189_v3, %v2153_v24 }
 0x469   :  { %v2098_v21 = vadd.f32 %v2082_v51, %v2045_v49  ;;  %v2200_v62 = vadd.f32 %v2184_v38, %v2148_v8  ;;  %v2134_v10 = vmul.f32 %v6485_v44, %v5616_v60  ;;  %v2256_v46 = vadd.f32 %v2240_v17, %v6497_v16  ;;  %v6522_v17 = vld [vmem:[#allocation5_spill] sm:$0xff] }
 0x46a   :  { %3380 = vset.pattern.permute.xlu1 %v6511_v47  ;;  %v2047_v6 = vadd.f32 %v2031_v53, %v1995_v36  ;;  %v2288_v0 = vadd.f32 %v2272_v5, %v6498_v13  ;;  %v2242_v29 = vmul.f32 %v2226_v33, %v6492_v43  ;;  %v2084_v56 = vmul.f32 %v4973_v55, %v5612_v63  ;;  %v6523_v53 = vld [vmem:[#allocation39_spill] sm:$0xff] }
 0x46b   :  { %2819 = vperm.xlu1 %3380, %v5512_v7   ;;  %v5742_v15 = vmax.f32 %v2254_v57, %v2286_v52  ;;  %v2274_v45 = vmul.f32 %v2226_v33, %v6493_v59  ;;  %v2228_v40 = vadd.f32 %v5700_v30, %v2205_v48  ;;  %v2150_v60 = vadd.f32 %v2134_v10, %v2098_v21  ;;  %v6524_v10 = vld [vmem:[#allocation40_spill] sm:$0xff] }
 0x46c   :  { %2939 = vperm.xlu0 %3382, %v5522_v50   ;;  %v2100_v35 = vadd.f32 %v2084_v56, %v2047_v6  ;;  %v2223_v14 = vadd.f32 %v5700_v30, %v2200_v62  ;;  %v2186_v28 = vmul.f32 %v5675_v11, %v5632_v26  ;;  %v5751_v55 = vmax.f32 %v2256_v46, %v2288_v0 }
 0x46d   :  { %v2136_v63 = vmul.f32 %v6485_v44, %v5636_v41  ;;  %v2290_v27 = vadd.f32 %v2274_v45, %v6498_v13  ;;  %v2244_v61 = vmul.f32 %v2228_v40, %v6492_v43  ;;  %v2276_v3 = vmul.f32 %v2228_v40, %v6493_v59  ;;  %v6525_v40 = vld [vmem:[#allocation41_spill] sm:$0xff] }
 0x46e   :  { %v2202_v2 = vadd.f32 %v2186_v28, %v2150_v60  ;;  %v2239_v26 = vmul.f32 %v2223_v14, %v6492_v43  ;;  %v2271_v41 = vmul.f32 %v2223_v14, %v6493_v59  ;;  %v2188_v42 = vmul.f32 %v5675_v11, %v5658_v32 }
 0x46f   :  { %2823 = vperm.xlu1 %3380, %v5489_v12   ;;  %v2152_v37 = vadd.f32 %v2136_v63, %v2100_v35  ;;  %v2260_v22 = vadd.f32 %v2244_v61, %v6497_v16  ;;  %v2292_v24 = vadd.f32 %v2276_v3, %v6498_v13  ;;  %v6526_v14 = vmov 1   ;;  %v6528_v3 = vld [vmem:[#allocation29_spill] sm:$0xff] }
 0x470   :  { %3383 = vset.pattern.permute.xlu0 %v6517_v39  ;;  %v2225_v49 = vadd.f32 %v5700_v30, %v2202_v2  ;;  %v2287_v11 = vadd.f32 %v2271_v41, %v6498_v13 }
 0x471   :  { %3015 = vperm.xlu0 %3383, %v5501_v58   ;;  %v2204_v36 = vadd.f32 %v2188_v42, %v2152_v37  ;;  %v5776_v32 = vmax.f32 %v2260_v22, %v2292_v24 }
 0x472   :  { %v2241_v33 = vmul.f32 %v2225_v49, %v6492_v43  ;;  %v2273_v48 = vmul.f32 %v2225_v49, %v6493_v59 }
 0x473   :  { %2831 = vperm.xlu1 %3380, %v5510_v20   ;;  %v2227_v21 = vadd.f32 %v5700_v30, %v2204_v36 }
 0x474   :  { %v2289_v56 = vadd.f32 %v2273_v48, %v6498_v13 }
 0x475   :  { %3027 = vperm.xlu0 %3383, %v5524_v19   ;;  %v2243_v45 = vmul.f32 %v2227_v21, %v6492_v43  ;;  %v2275_v30 = vmul.f32 %v2227_v21, %v6493_v59 }
 0x477   :  { %2839 = vperm.xlu1 %3380, %v5522_v50   ;;  %v2259_v43 = vadd.f32 %v2243_v45, %v6497_v16  ;;  %v2291_v59 = vadd.f32 %v2275_v30, %v6498_v13 }
 0x479   :  { %3035 = vperm.xlu0 %3383, %v5530_v9  }
 0x47b   :  { %3381 = vset.pattern.permute.xlu1 %v6518_v54 }
 0x47c   :  { %2915 = vperm.xlu1 %3381, %v5501_v58   ;;  %v2258_v58 = vadd.f32 %v2242_v29, %v6497_v16  ;;  %v2257_v29 = vadd.f32 %v2241_v33, %v6497_v16 }
 0x47d   :  { %3385 = vset.pattern.permute.xlu0 %v6519_v1 }
 0x47e   :  { %2357 = vperm.xlu0 %3385, %v5742_v15   ;;  %v5768_v18 = vmax.f32 %v2258_v58, %v2290_v27  ;;  %v6527_v27 = vld [vmem:[#allocation42_spill] sm:$0xff]  ;;  %v5799_v61 = vmax.f32 %v2257_v29, %v2289_v56 }
 0x480   :  { %2919 = vperm.xlu1 %3381, %v5512_v7   ;;  %6521 = vst [vmem:[#allocation34_spill] sm:$0xff] %v5768_v18 }
 0x481   :  { %v2444_v34 = vpop.permute.xlu0 %2443  ;;  %v2353_v4 = vpop.permute.xlu1 %2352 }
 0x482   :  { %2367 = vperm.xlu0 %3385, %v5751_v55   ;;  %v2486_v25 = vmul.f32 %v6496_v23, %v2444_v34  ;;  %v2402_v44 = vmul.f32 %v6495_v31, %v2353_v4 }
 0x484   :  { %2927 = vperm.xlu1 %3381, %v5524_v19   ;;  %v2502_v51 = vadd.f32 %v2486_v25, %v2402_v44  ;;  %v2255_v19 = vadd.f32 %v2239_v26, %v6497_v16  ;;  %v5810_v25 = vmax.f32 %v2259_v43, %v2291_v59 }
 0x486   :  { %v2644_v8 = vpop.permute.xlu0 %2643  ;;  %2377 = vperm.xlu0 %3385, %v5768_v18   ;;  %v2544_v38 = vpop.permute.xlu1 %2543  ;;  %v5787_v0 = vmax.f32 %v2255_v19, %v2287_v11 }
 0x487   :  { %v2586_v5 = vmul.f32 %v6522_v17, %v2544_v38  ;;  %v2686_v57 = vmul.f32 %v6523_v53, %v2644_v8  ;;  %v6531_v8 = vmov 3  }
 0x488   :  { %2935 = vperm.xlu1 %3381, %v5530_v9  }
 0x489   :  { %v2602_v52 = vadd.f32 %v2586_v5, %v2502_v51 }
 0x48a   :  { %2387 = vperm.xlu0 %3385, %v5776_v32  }
 0x48b   :  { %v2844_v6 = vpop.permute.xlu0 %2843  ;;  %v2702_v62 = vadd.f32 %v2686_v57, %v2602_v52  ;;  %v2744_v9 = vpop.permute.xlu1 %2743  ;;  %v6532_v57 = vmov 4  }
 0x48c   :  { %v2786_v46 = vmul.f32 %v6524_v10, %v2744_v9  ;;  %3384 = vset.pattern.permute.xlu1 %v6517_v39  ;;  %v2886_v60 = vmul.f32 %v6525_v40, %v2844_v6 }
 0x48d   :  { %3019 = vperm.xlu1 %3384, %v5512_v7  }
 0x48e   :  { %v2802_v35 = vadd.f32 %v2786_v46, %v2702_v62  ;;  %3388 = vset.pattern.permute.xlu0 %v6526_v14 }
 0x48f   :  { %2451 = vperm.xlu0 %3388, %v5787_v0  }
 0x490   :  { %v3044_v28 = vpop.permute.xlu0 %3043  ;;  %v2902_v58 = vadd.f32 %v2886_v60, %v2802_v35  ;;  %v2944_v63 = vpop.permute.xlu1 %2943 }
 0x491   :  { %v2986_v7 = vmul.f32 %v6527_v27, %v2944_v63  ;;  %3023 = vperm.xlu1 %3384, %v5489_v12   ;;  %v3086_v2 = vmul.f32 %v6528_v3, %v3044_v28  ;;  %v6529_v12 = vld [vmem:[#allocation6_spill] sm:$0xff] }
 0x493   :  { %v3002_v34 = vadd.f32 %v2986_v7, %v2902_v58  ;;  %2459 = vperm.xlu0 %3388, %v5799_v61  }
 0x495   :  { %v3102_v4 = vadd.f32 %v3086_v2, %v3002_v34  ;;  %v5805_v37 = vpop.permute.xlu0 %2327  ;;  %3031 = vperm.xlu1 %3384, %v5510_v20   ;;  %v5808_v26 = vpop.permute.xlu1 %2317  ;;  %v6530_v20 = vmov 2  }
 0x497   :  { %v3125_v44 = vadd.f32 %v6529_v12, %v3102_v4  ;;  %2467 = vperm.xlu0 %3388, %v5810_v25  }
 0x499   :  { %3141 = vst.msk [vmem:[%s6261_s16 + $0x40] sm:$0xff] %vm148_vm2, %v3125_v44  ;;  %v5818_v16 = vpop.permute.xlu0 %2337  ;;  %3039 = vperm.xlu1 %3384, %v5522_v50   ;;  %v5821_v13 = vpop.permute.xlu1 %2322 }
 0x49b   :  { %3389 = vset.pattern.permute.xlu0 %v6530_v20 }
 0x49c   :  { %2547 = vperm.xlu0 %3389, %v5742_v15  }
 0x49d   :  { %v5825_v41 = vpop.permute.xlu0 %2347  ;;  %3386 = vset.pattern.permute.xlu1 %v6519_v1  ;;  %v5828_v42 = vpop.permute.xlu1 %2332 }
 0x49e   :  { %2362 = vperm.xlu1 %3386, %v5787_v0  }
 0x4a0   :  { %2555 = vperm.xlu0 %3389, %v5751_v55  }
 0x4a1   :  { %v5832_v22 = vpop.permute.xlu1 %2342 }
 0x4a2   :  { %v5834_v24 = vpop.permute.xlu0 %2415  ;;  %2372 = vperm.xlu1 %3386, %v5799_v61  }
 0x4a4   :  { %2563 = vperm.xlu0 %3389, %v5768_v18  }
 0x4a6   :  { %v5838_v50 = vpop.permute.xlu0 %2427  ;;  %2382 = vperm.xlu1 %3386, %v5810_v25   ;;  %v5841_v49 = vpop.permute.xlu1 %2419 }
 0x4a8   :  { %2571 = vperm.xlu0 %3389, %v5776_v32  }
 0x4aa   :  { %v5844_v1 = vpop.permute.xlu0 %2435  ;;  %3387 = vset.pattern.permute.xlu1 %v6526_v14  ;;  %v5847_v36 = vpop.permute.xlu1 %2423 }
 0x4ab   :  { %2447 = vperm.xlu1 %3387, %v5742_v15  }
 0x4ac   :  { %3392 = vset.pattern.permute.xlu0 %v6531_v8 }
 0x4ad   :  { %2651 = vperm.xlu0 %3392, %v5787_v0  }
 0x4ae   :  { %v5852_v38 = vpop.permute.xlu1 %2431 }
 0x4af   :  { %v5854_v51 = vpop.permute.xlu0 %2523  ;;  %2455 = vperm.xlu1 %3387, %v5751_v55  }
 0x4b1   :  { %2659 = vperm.xlu0 %3392, %v5799_v61  }
 0x4b2   :  { %v5858_v5 = vpop.permute.xlu1 %2439 }
 0x4b3   :  { %v5860_v19 = vpop.permute.xlu0 %2531  ;;  %2463 = vperm.xlu1 %3387, %v5768_v18  }
 0x4b5   :  { %2667 = vperm.xlu0 %3392, %v5810_v25  }
 0x4b7   :  { %v5864_v11 = vpop.permute.xlu0 %2539  ;;  %2471 = vperm.xlu1 %3387, %v5776_v32   ;;  %v2516_v33 = vpop.permute.xlu1 %2515 }
 0x4b9   :  { %3393 = vset.pattern.permute.xlu0 %v6532_v57 }
 0x4ba   :  { %2747 = vperm.xlu0 %3393, %v5742_v15  }
 0x4bb   :  { %3390 = vset.pattern.permute.xlu1 %v6530_v20  ;;  %v5870_v52 = vpop.permute.xlu1 %2519  ;;  %v2479_v20 = vmul.f32 %v6496_v23, %v5834_v24  ;;  %v2482_v24 = vmul.f32 %v6496_v23, %v5838_v50  ;;  %v2484_v50 = vmul.f32 %v6496_v23, %v5844_v1 }
 0x4bc   :  { %v2616_v48 = vpop.permute.xlu0 %2615  ;;  %2551 = vperm.xlu1 %3390, %v5787_v0  }
 0x4be   :  { %2755 = vperm.xlu0 %3393, %v5751_v55  }
 0x4bf   :  { %v5874_v21 = vpop.permute.xlu1 %2527 }
 0x4c0   :  { %v5876_v6 = vpop.permute.xlu0 %2627  ;;  %2559 = vperm.xlu1 %3390, %v5799_v61  }
 0x4c2   :  { %2763 = vperm.xlu0 %3393, %v5768_v18  }
 0x4c3   :  { %v5880_v62 = vpop.permute.xlu1 %2535 }
 0x4c4   :  { %v5882_v9 = vpop.permute.xlu0 %2635  ;;  %2567 = vperm.xlu1 %3390, %v5810_v25  }
 0x4c6   :  { %2771 = vperm.xlu0 %3393, %v5776_v32  }
 0x4c8   :  { %3391 = vset.pattern.permute.xlu1 %v6531_v8  ;;  %v5887_v46 = vpop.permute.xlu1 %2619  ;;  %v2395_v8 = vmul.f32 %v6495_v31, %v5808_v26  ;;  %v2398_v26 = vmul.f32 %v6495_v31, %v5828_v42  ;;  %v2682_v42 = vmul.f32 %v6523_v53, %v5876_v6 }
 0x4c9   :  { %v5889_v29 = vpop.permute.xlu0 %2723  ;;  %2647 = vperm.xlu1 %3391, %v5742_v15  }
 0x4ca   :  { %3396 = vset.pattern.permute.xlu0 %v6511_v47 }
 0x4cb   :  { %2851 = vperm.xlu0 %3396, %v5787_v0  }
 0x4cc   :  { %v5894_v56 = vpop.permute.xlu1 %2623 }
 0x4cd   :  { %v5896_v45 = vpop.permute.xlu0 %2731  ;;  %2655 = vperm.xlu1 %3391, %v5751_v55  }
 0x4ce   :  { %6533 = vst [vmem:[#allocation14_spill] sm:$0xff] %v5896_v45 }
 0x4cf   :  { %2859 = vperm.xlu0 %3396, %v5799_v61  }
 0x4d0   :  { %v5900_v30 = vpop.permute.xlu1 %2631 }
 0x4d1   :  { %v5902_v60 = vpop.permute.xlu0 %2739  ;;  %2663 = vperm.xlu1 %3391, %v5768_v18  }
 0x4d2   :  { %6534 = vst [vmem:[#allocation23_spill] sm:$0xff] %v5902_v60  ;;  %v2679_v60 = vmul.f32 %v6523_v53, %v2616_v48 }
 0x4d3   :  { %2867 = vperm.xlu0 %3396, %v5810_v25  }
 0x4d4   :  { %v5906_v35 = vpop.permute.xlu1 %2639 }
 0x4d5   :  { %6535 = vst [vmem:[#allocation7_spill] sm:$0xff] %v5906_v35  ;;  %2671 = vperm.xlu1 %3391, %v5776_v32  }
 0x4d6   :  { %v2816_v14 = vpop.permute.xlu0 %2815 }
 0x4d7   :  { %3397 = vset.pattern.permute.xlu0 %v6518_v54 }
 0x4d8   :  { %2947 = vperm.xlu0 %3397, %v5742_v15  }
 0x4d9   :  { %3394 = vset.pattern.permute.xlu1 %v6532_v57  ;;  %v2716_v28 = vpop.permute.xlu1 %2715  ;;  %v2579_v57 = vmul.f32 %v6522_v17, %v2516_v33  ;;  %v2582_v33 = vmul.f32 %v6522_v17, %v5874_v21  ;;  %v2400_v21 = vmul.f32 %v6495_v31, %v5832_v22 }
 0x4da   :  { %v5912_v58 = vpop.permute.xlu0 %2827  ;;  %2751 = vperm.xlu1 %3394, %v5787_v0  }
 0x4dc   :  { %2955 = vperm.xlu0 %3397, %v5751_v55  }
 0x4dd   :  { %v5916_v63 = vpop.permute.xlu1 %2719 }
 0x4de   :  { %v5918_v7 = vpop.permute.xlu0 %2835  ;;  %2759 = vperm.xlu1 %3394, %v5799_v61  }
 0x4e0   :  { %2963 = vperm.xlu0 %3397, %v5768_v18  }
 0x4e1   :  { %v2728_v43 = vpop.permute.xlu1 %2727 }
 0x4e2   :  { %2767 = vperm.xlu1 %3394, %v5810_v25  }
 0x4e3   :  { %v5923_v59 = vpop.permute.xlu0 %2923 }
 0x4e4   :  { %6536 = vst [vmem:[#allocation36_spill] sm:$0xff] %v5923_v59  ;;  %2971 = vperm.xlu0 %3397, %v5776_v32  }
 0x4e5   :  { %v2736_v2 = vpop.permute.xlu1 %2735 }
 0x4e6   :  { %3395 = vset.pattern.permute.xlu1 %v6511_v47 }
 0x4e7   :  { %v5927_v34 = vpop.permute.xlu0 %2931  ;;  %2847 = vperm.xlu1 %3395, %v5742_v15  }
 0x4e8   :  { %6537 = vst [vmem:[#allocation33_spill] sm:$0xff] %v5927_v34  ;;  %3400 = vset.pattern.permute.xlu0 %v6517_v39 }
 0x4e9   :  { %3051 = vperm.xlu0 %3400, %v5787_v0  }
 0x4ea   :  { %v5932_v4 = vpop.permute.xlu1 %2819 }
 0x4eb   :  { %v5934_v44 = vpop.permute.xlu0 %2939  ;;  %2855 = vperm.xlu1 %3395, %v5751_v55  }
 0x4ec   :  { %6538 = vst [vmem:[#allocation32_spill] sm:$0xff] %v5934_v44  ;;  %v2495_v44 = vadd.f32 %v2479_v20, %v2395_v8  ;;  %v2498_v8 = vadd.f32 %v2482_v24, %v2398_v26  ;;  %v2500_v24 = vadd.f32 %v2484_v50, %v2400_v21 }
 0x4ed   :  { %3059 = vperm.xlu0 %3400, %v5799_v61  }
 0x4ee   :  { %v5940_v47 = vpop.permute.xlu1 %2823  ;;  %v2595_v45 = vadd.f32 %v2579_v57, %v2495_v44 }
 0x4ef   :  { %2863 = vperm.xlu1 %3395, %v5768_v18   ;;  %v2779_v18 = vmul.f32 %v6524_v10, %v2716_v28  ;;  %v2598_v28 = vadd.f32 %v2582_v33, %v2498_v8  ;;  %v2480_v8 = vmul.f32 %v6496_v23, %v5841_v49  ;;  %v2401_v49 = vmul.f32 %v6495_v31, %v5825_v41 }
 0x4f0   :  { %v3016_v34 = vpop.permute.xlu0 %3015  ;;  %v2695_v20 = vadd.f32 %v2679_v60, %v2595_v45  ;;  %v2584_v45 = vmul.f32 %v6522_v17, %v5880_v62  ;;  %v2684_v62 = vmul.f32 %v6523_v53, %v5882_v9  ;;  %v2680_v41 = vmul.f32 %v6523_v53, %v5887_v46 }
 0x4f1   :  { %3067 = vperm.xlu0 %3400, %v5810_v25   ;;  %v2698_v6 = vadd.f32 %v2682_v42, %v2598_v28  ;;  %v2585_v46 = vmul.f32 %v6522_v17, %v5864_v11  ;;  %v2781_v11 = vmul.f32 %v6524_v10, %v5889_v29 }
 0x4f2   :  { %v5948_v59 = vpop.permute.xlu1 %2831  ;;  %v2795_v44 = vadd.f32 %v2779_v18, %v2695_v20  ;;  %v2782_v18 = vmul.f32 %v6524_v10, %v2728_v43  ;;  %v2600_v22 = vadd.f32 %v2584_v45, %v2500_v24  ;;  %v2397_v43 = vmul.f32 %v6495_v31, %v5805_v37 }
 0x4f3   :  { %2871 = vperm.xlu1 %3395, %v5776_v32   ;;  %v2396_v37 = vmul.f32 %v6495_v31, %v5821_v13 }
 0x4f4   :  { %v5954_v35 = vpop.permute.xlu0 %3027  ;;  %v2798_v9 = vadd.f32 %v2782_v18, %v2698_v6  ;;  %v2700_v21 = vadd.f32 %v2684_v62, %v2600_v22  ;;  %v2583_v18 = vmul.f32 %v6522_v17, %v5860_v19  ;;  %v2884_v6 = vmul.f32 %v6525_v40, %v5918_v7 }
 0x4f5   :  { %v2496_v45 = vadd.f32 %v2480_v8, %v2396_v37  ;;  %v2683_v62 = vmul.f32 %v6523_v53, %v5900_v30 }
 0x4f6   :  { %v5960_v48 = vpop.permute.xlu1 %2839 }
 0x4f7   :  { %3398 = vset.pattern.permute.xlu1 %v6518_v54  ;;  %v2879_v54 = vmul.f32 %v6525_v40, %v2816_v14  ;;  %v3079_v14 = vmul.f32 %v6528_v3, %v3016_v34  ;;  %v2784_v34 = vmul.f32 %v6524_v10, %v2736_v2  ;;  %v2882_v2 = vmul.f32 %v6525_v40, %v5912_v58 }
 0x4f8   :  { %v5965_v57 = vpop.permute.xlu0 %3035  ;;  %2951 = vperm.xlu1 %3398, %v5787_v0   ;;  %v2481_v0 = vmul.f32 %v6496_v23, %v5847_v36  ;;  %v2581_v36 = vmul.f32 %v6522_v17, %v5854_v51  ;;  %v2580_v51 = vmul.f32 %v6522_v17, %v5870_v52  ;;  %v2485_v52 = vmul.f32 %v6496_v23, %v5858_v5 }
 0x4f9   :  { %v2895_v1 = vadd.f32 %v2879_v54, %v2795_v44  ;;  %v2399_v44 = vmul.f32 %v6495_v31, %v5818_v16  ;;  %v2681_v16 = vmul.f32 %v6523_v53, %v5894_v56  ;;  %v2800_v24 = vadd.f32 %v2784_v34, %v2700_v21  ;;  %v6539_v34 = vld [vmem:[#allocation7_spill] sm:$0xff] }
 0x4fa   :  { %v2898_v56 = vadd.f32 %v2882_v2, %v2798_v9  ;;  %v2780_v5 = vmul.f32 %v6524_v10, %v5916_v63  ;;  %v2880_v63 = vmul.f32 %v6525_v40, %v5932_v4  ;;  %v3084_v4 = vmul.f32 %v6528_v3, %v5965_v57  ;;  %v6541_v2 = vld [vmem:[#allocation34_spill] sm:$0xff] }
 0x4fb   :  { %v2916_v60 = vpop.permute.xlu1 %2915  ;;  %v2900_v7 = vadd.f32 %v2884_v6, %v2800_v24 }
 0x4fc   :  { %v2979_v26 = vmul.f32 %v6527_v27, %v2916_v60  ;;  %2959 = vperm.xlu1 %3398, %v5799_v61   ;;  %v2483_v61 = vmul.f32 %v6496_v23, %v5852_v38  ;;  %v2497_v38 = vadd.f32 %v2481_v0, %v2397_v43 }
 0x4fd   :  { %v5980_v33 = vpop.permute.xlu0 %2357 }
 0x4fe   :  { %v2995_v20 = vadd.f32 %v2979_v26, %v2895_v1  ;;  %v2499_v13 = vadd.f32 %v2483_v61, %v2399_v44  ;;  %v2597_v54 = vadd.f32 %v2581_v36, %v2497_v38  ;;  %v2596_v1 = vadd.f32 %v2580_v51, %v2496_v45  ;;  %v6540_v51 = vld [vmem:[#allocation14_spill] sm:$0xff] }
 0x4ff   :  { %v2920_v50 = vpop.permute.xlu1 %2919  ;;  %v2783_v57 = vmul.f32 %v6524_v10, %v6540_v51 }
 0x500   :  { %v3095_v28 = vadd.f32 %v3079_v14, %v2995_v20  ;;  %2967 = vperm.xlu1 %3398, %v5810_v25   ;;  %v2697_v0 = vadd.f32 %v2681_v16, %v2597_v54  ;;  %v2696_v19 = vadd.f32 %v2680_v41, %v2596_v1  ;;  %v2599_v8 = vadd.f32 %v2583_v18, %v2499_v13  ;;  %v6066_v13 = vld [vmem:[%s6260_s15] ss:$0 sm:$0xff] }
 0x501   :  { %v6003_v42 = vpop.permute.xlu0 %2367  ;;  %v2980_v36 = vmul.f32 %v6527_v27, %v2920_v50  ;;  %v2885_v1 = vmul.f32 %v6525_v40, %v5960_v48 }
 0x502   :  { %v3118_v25 = vadd.f32 %v6529_v12, %v3095_v28  ;;  %v2796_v61 = vadd.f32 %v2780_v5, %v2696_v19  ;;  %v2797_v30 = vadd.f32 %v2781_v11, %v2697_v0  ;;  %v2699_v9 = vadd.f32 %v2683_v62, %v2599_v8 }
 0x503   :  { %v2928_v60 = vpop.permute.xlu1 %2927  ;;  %v2685_v28 = vmul.f32 %v6523_v53, %v6539_v34 }
 0x504   :  { %3134 = vst.msk [vmem:[%s6261_s16 + $0x8] sm:$0xff] %vm148_vm2, %v3118_v25  ;;  %v2982_v58 = vmul.f32 %v6527_v27, %v2928_v60  ;;  %3399 = vset.pattern.permute.xlu1 %v6517_v39  ;;  %v3082_v39 = vmul.f32 %v6528_v3, %v5954_v35  ;;  %v2501_v35 = vadd.f32 %v2485_v52, %v2401_v49  ;;  %v6542_v25 = vld [vmem:[#allocation36_spill] sm:$0xff] }
 0x505   :  { %v6026_v26 = vpop.permute.xlu0 %2377  ;;  %3047 = vperm.xlu1 %3399, %v5742_v15   ;;  %v2881_v15 = vmul.f32 %v6525_v40, %v5940_v47  ;;  %v2896_v37 = vadd.f32 %v2880_v63, %v2796_v61  ;;  %v2981_v45 = vmul.f32 %v6527_v27, %v6542_v25  ;;  %v2799_v52 = vadd.f32 %v2783_v57, %v2699_v9 }
 0x506   :  { %v2998_v22 = vadd.f32 %v2982_v58, %v2898_v56  ;;  %v2601_v49 = vadd.f32 %v2585_v46, %v2501_v35 }
 0x507   :  { %v2936_v14 = vpop.permute.xlu1 %2935  ;;  %v2897_v38 = vadd.f32 %v2881_v15, %v2797_v30  ;;  %v2996_v21 = vadd.f32 %v2980_v36, %v2896_v37 }
 0x508   :  { %v3098_v20 = vadd.f32 %v3082_v39, %v2998_v22  ;;  %v2984_v43 = vmul.f32 %v6527_v27, %v2936_v14  ;;  %v2701_v60 = vadd.f32 %v2685_v28, %v2601_v49  ;;  %v6544_v39 = vld [vmem:[#allocation33_spill] sm:$0xff] }
 0x509   :  { %v6043_v29 = vpop.permute.xlu0 %2387  ;;  %3055 = vperm.xlu1 %3399, %v5751_v55   ;;  %v2997_v58 = vadd.f32 %v2981_v45, %v2897_v38  ;;  %v2983_v22 = vmul.f32 %v6527_v27, %v6544_v39  ;;  %v2403_v45 = vmul.f32 %v6495_v31, %v5980_v33  ;;  %v2407_v33 = vmul.f32 %v6495_v31, %v6026_v26 }
 0x50a   :  { %v3121_v44 = vadd.f32 %v6529_v12, %v3098_v20  ;;  %v3000_v47 = vadd.f32 %v2984_v43, %v2900_v7  ;;  %v2883_v12 = vmul.f32 %v6525_v40, %v5948_v59  ;;  %v6543_v59 = vld [vmem:[#allocation23_spill] sm:$0xff] }
 0x50b   :  { %v2785_v56 = vmul.f32 %v6524_v10, %v6543_v59  ;;  %v2405_v59 = vmul.f32 %v6495_v31, %v6003_v42 }
 0x50c   :  { %3137 = vst.msk [vmem:[%s6261_s16 + $0x20] sm:$0xff] %vm148_vm2, %v3121_v44  ;;  %v3100_v55 = vadd.f32 %v3084_v4, %v3000_v47  ;;  %v3020_v50 = vpop.permute.xlu1 %3019  ;;  %v2899_v46 = vadd.f32 %v2883_v12, %v2799_v52 }
 0x50d   :  { %v3080_v16 = vmul.f32 %v6528_v3, %v3020_v50  ;;  %3063 = vperm.xlu1 %3399, %v6541_v2   ;;  %v2801_v19 = vadd.f32 %v2785_v56, %v2701_v60 }
 0x50e   :  { %v3123_v54 = vadd.f32 %v6066_v13, %v3100_v55  ;;  %v2452_v41 = vpop.permute.xlu0 %2451  ;;  %v2999_v14 = vadd.f32 %v2983_v22, %v2899_v46 }
 0x50f   :  { %v3096_v24 = vadd.f32 %v3080_v16, %v2996_v21  ;;  %v2901_v63 = vadd.f32 %v2885_v1, %v2801_v19  ;;  %v2488_v9 = vmul.f32 %v6496_v23, %v2452_v41 }
 0x510   :  { %3139 = vst.msk [vmem:[%s6261_s16 + $0x30] sm:$0xff] %vm148_vm2, %v3123_v54  ;;  %v3024_v18 = vpop.permute.xlu1 %3023 }
 0x511   :  { %v3119_v5 = vadd.f32 %v6066_v13, %v3096_v24  ;;  %v3081_v0 = vmul.f32 %v6528_v3, %v3024_v18  ;;  %3071 = vperm.xlu1 %3399, %v5776_v32   ;;  %v6545_v32 = vld [vmem:[#allocation32_spill] sm:$0xff] }
 0x512   :  { %v2460_v6 = vpop.permute.xlu0 %2459  ;;  %v2985_v7 = vmul.f32 %v6527_v27, %v6545_v32 }
 0x513   :  { %3135 = vst.msk [vmem:[%s6261_s16 + $0x10] sm:$0xff] %vm148_vm2, %v3119_v5  ;;  %v3097_v11 = vadd.f32 %v3081_v0, %v2997_v58  ;;  %v2490_v38 = vmul.f32 %v6496_v23, %v2460_v6 }
 0x514   :  { %v3032_v62 = vpop.permute.xlu1 %3031  ;;  %v3001_v61 = vadd.f32 %v2985_v7, %v2901_v63 }
 0x515   :  { %v3120_v48 = vadd.f32 %v6066_v13, %v3097_v11  ;;  %v3083_v15 = vmul.f32 %v6528_v3, %v3032_v62  ;;  %v2409_v11 = vmul.f32 %v6495_v31, %v6043_v29 }
 0x516   :  { %v2468_v20 = vpop.permute.xlu0 %2467 }
 0x517   :  { %3136 = vst.msk [vmem:[%s6261_s16 + $0x18] sm:$0xff] %vm148_vm2, %v3120_v48  ;;  %v3099_v43 = vadd.f32 %v3083_v15, %v2999_v14  ;;  %v2492_v12 = vmul.f32 %v6496_v23, %v2468_v20 }
 0x518   :  { %v3040_v35 = vpop.permute.xlu1 %3039 }
 0x519   :  { %v3122_v8 = vadd.f32 %v6066_v13, %v3099_v43  ;;  %v3085_v36 = vmul.f32 %v6528_v3, %v3040_v35 }
 0x51b   :  { %3138 = vst.msk [vmem:[%s6261_s16 + $0x28] sm:$0xff] %vm148_vm2, %v3122_v8  ;;  %v3101_v30 = vadd.f32 %v3085_v36, %v3001_v61  ;;  %v2548_v4 = vpop.permute.xlu0 %2547 }
 0x51c   :  { %v2587_v60 = vmul.f32 %v6522_v17, %v2548_v4 }
 0x51d   :  { %v3124_v44 = vadd.f32 %v6066_v13, %v3101_v30  ;;  %v2363_v47 = vpop.permute.xlu1 %2362 }
 0x51e   :  { %v2404_v34 = vmul.f32 %v6495_v31, %v2363_v47 }
 0x51f   :  { %3140 = vst.msk [vmem:[%s6261_s16 + $0x38] sm:$0xff] %vm148_vm2, %v3124_v44  ;;  %v2556_v28 = vpop.permute.xlu0 %2555 }
 0x520   :  { %v2504_v37 = vadd.f32 %v2488_v9, %v2404_v34  ;;  %v2589_v46 = vmul.f32 %v6522_v17, %v2556_v28 }
 0x521   :  { %v2373_v49 = vpop.permute.xlu1 %2372 }
 0x522   :  { %v2406_v55 = vmul.f32 %v6495_v31, %v2373_v49 }
 0x523   :  { %v2564_v50 = vpop.permute.xlu0 %2563 }
 0x524   :  { %v2506_v51 = vadd.f32 %v2490_v38, %v2406_v55  ;;  %v2591_v22 = vmul.f32 %v6522_v17, %v2564_v50 }
 0x525   :  { %v2383_v57 = vpop.permute.xlu1 %2382 }
 0x526   :  { %v2408_v21 = vmul.f32 %v6495_v31, %v2383_v57 }
 0x527   :  { %v2572_v16 = vpop.permute.xlu0 %2571 }
 0x528   :  { %v6111_v2 = vadd.f32 %v2492_v12, %v2408_v21  ;;  %v2593_v48 = vmul.f32 %v6522_v17, %v2572_v16 }
 0x52a   :  { %v2448_v25 = vpop.permute.xlu1 %2447 }
 0x52b   :  { %v2487_v54 = vmul.f32 %v6496_v23, %v2448_v25 }
 0x52c   :  { %v2652_v41 = vpop.permute.xlu0 %2651 }
 0x52d   :  { %v2503_v52 = vadd.f32 %v2487_v54, %v2403_v45  ;;  %v2688_v25 = vmul.f32 %v6523_v53, %v2652_v41 }
 0x52e   :  { %v2456_v24 = vpop.permute.xlu1 %2455 }
 0x52f   :  { %v2489_v56 = vmul.f32 %v6496_v23, %v2456_v24  ;;  %v6120_v58 = vadd.f32 %v2587_v60, %v2503_v52 }
 0x530   :  { %v2660_v18 = vpop.permute.xlu0 %2659 }
 0x531   :  { %v2505_v1 = vadd.f32 %v2489_v56, %v2405_v59  ;;  %v2690_v56 = vmul.f32 %v6523_v53, %v2660_v18 }
 0x532   :  { %v2464_v5 = vpop.permute.xlu1 %2463 }
 0x533   :  { %v2491_v0 = vmul.f32 %v6496_v23, %v2464_v5  ;;  %v6126_v6 = vadd.f32 %v2589_v46, %v2505_v1 }
 0x534   :  { %v2668_v39 = vpop.permute.xlu0 %2667 }
 0x535   :  { %v2507_v42 = vadd.f32 %v2491_v0, %v2407_v33  ;;  %v2692_v41 = vmul.f32 %v6523_v53, %v2668_v39 }
 0x536   :  { %v2472_v19 = vpop.permute.xlu1 %2471 }
 0x537   :  { %v2493_v62 = vmul.f32 %v6496_v23, %v2472_v19  ;;  %v6132_v63 = vadd.f32 %v2591_v22, %v2507_v42 }
 0x539   :  { %v2509_v14 = vadd.f32 %v2493_v62, %v2409_v11  ;;  %v2748_v26 = vpop.permute.xlu0 %2747 }
 0x53b   :  { %v2552_v15 = vpop.permute.xlu1 %2551  ;;  %v6135_v20 = vadd.f32 %v2593_v48, %v2509_v14 }
 0x53c   :  { %v2588_v55 = vmul.f32 %v6522_v17, %v2552_v15 }
 0x53d   :  { %v6137_v32 = vpop.permute.xlu0 %2755 }
 0x53e   :  { %v2604_v12 = vadd.f32 %v2588_v55, %v2504_v37 }
 0x53f   :  { %v2560_v7 = vpop.permute.xlu1 %2559 }
 0x540   :  { %v2590_v21 = vmul.f32 %v6522_v17, %v2560_v7  ;;  %v2704_v52 = vadd.f32 %v2688_v25, %v2604_v12 }
 0x541   :  { %v6139_v43 = vpop.permute.xlu0 %2763 }
 0x542   :  { %v2606_v54 = vadd.f32 %v2590_v21, %v2506_v51 }
 0x543   :  { %v2568_v35 = vpop.permute.xlu1 %2567 }
 0x544   :  { %v2592_v60 = vmul.f32 %v6522_v17, %v2568_v35  ;;  %v2706_v33 = vadd.f32 %v2690_v56, %v2606_v54 }
 0x545   :  { %v6141_v8 = vpop.permute.xlu0 %2771 }
 0x546   :  { %v2608_v1 = vadd.f32 %v2592_v60, %v6111_v2 }
 0x548   :  { %v2648_v31 = vpop.permute.xlu1 %2647  ;;  %v2708_v2 = vadd.f32 %v2692_v41, %v2608_v1 }
 0x549   :  { %v2687_v51 = vmul.f32 %v6523_v53, %v2648_v31 }
 0x54a   :  { %v2852_v29 = vpop.permute.xlu0 %2851 }
 0x54b   :  { %v2888_v5 = vmul.f32 %v6525_v40, %v2852_v29  ;;  %v2703_v39 = vadd.f32 %v2687_v51, %v6120_v58  ;;  %v2789_v58 = vmul.f32 %v6524_v10, %v6137_v32 }
 0x54c   :  { %v2656_v23 = vpop.permute.xlu1 %2655 }
 0x54d   :  { %v2689_v18 = vmul.f32 %v6523_v53, %v2656_v23 }
 0x54e   :  { %v2860_v61 = vpop.permute.xlu0 %2859 }
 0x54f   :  { %v2890_v62 = vmul.f32 %v6525_v40, %v2860_v61 }
 0x550   :  { %v2664_v36 = vpop.permute.xlu1 %2663 }
 0x551   :  { %v2691_v21 = vmul.f32 %v6523_v53, %v2664_v36 }
 0x552   :  { %v2868_v4 = vpop.permute.xlu0 %2867 }
 0x553   :  { %v2892_v61 = vmul.f32 %v6525_v40, %v2868_v4  ;;  %v2707_v56 = vadd.f32 %v2691_v21, %v6132_v63 }
 0x554   :  { %v6143_v30 = vpop.permute.xlu1 %2671 }
 0x557   :  { %v6145_v47 = vpop.permute.xlu0 %2947 }
 0x559   :  { %v2752_v44 = vpop.permute.xlu1 %2751 }
 0x55a   :  { %v2788_v45 = vmul.f32 %v6524_v10, %v2752_v44  ;;  %v2787_v44 = vmul.f32 %v6524_v10, %v2748_v26 }
 0x55b   :  { %v6147_v34 = vpop.permute.xlu0 %2955 }
 0x55c   :  { %v2804_v46 = vadd.f32 %v2788_v45, %v2704_v52  ;;  %v2803_v25 = vadd.f32 %v2787_v44, %v2703_v39 }
 0x55d   :  { %v2760_v9 = vpop.permute.xlu1 %2759 }
 0x55e   :  { %v2790_v37 = vmul.f32 %v6524_v10, %v2760_v9  ;;  %v2904_v42 = vadd.f32 %v2888_v5, %v2804_v46  ;;  %v2705_v9 = vadd.f32 %v2689_v18, %v6126_v6  ;;  %v2987_v46 = vmul.f32 %v6527_v27, %v6145_v47 }
 0x55f   :  { %v6149_v38 = vpop.permute.xlu0 %2963 }
 0x560   :  { %v2806_v17 = vadd.f32 %v2790_v37, %v2706_v33  ;;  %v2805_v52 = vadd.f32 %v2789_v58, %v2705_v9  ;;  %v2791_v33 = vmul.f32 %v6524_v10, %v6139_v43  ;;  %v2991_v18 = vmul.f32 %v6527_v27, %v6149_v38 }
 0x561   :  { %v2768_v28 = vpop.permute.xlu1 %2767 }
 0x562   :  { %v2792_v22 = vmul.f32 %v6524_v10, %v2768_v28  ;;  %v2906_v31 = vadd.f32 %v2890_v62, %v2806_v17 }
 0x563   :  { %v6152_v57 = vpop.permute.xlu0 %2971 }
 0x564   :  { %v2808_v7 = vadd.f32 %v2792_v22, %v2708_v2  ;;  %v2793_v22 = vmul.f32 %v6524_v10, %v6141_v8 }
 0x566   :  { %v2848_v49 = vpop.permute.xlu1 %2847  ;;  %v2908_v4 = vadd.f32 %v2892_v61, %v2808_v7 }
 0x567   :  { %v2887_v23 = vmul.f32 %v6525_v40, %v2848_v49 }
 0x568   :  { %v3052_v59 = vpop.permute.xlu0 %3051 }
 0x569   :  { %v3088_v48 = vmul.f32 %v6528_v3, %v3052_v59  ;;  %v2903_v60 = vadd.f32 %v2887_v23, %v2803_v25 }
 0x56a   :  { %v2856_v50 = vpop.permute.xlu1 %2855 }
 0x56b   :  { %v2889_v26 = vmul.f32 %v6525_v40, %v2856_v50  ;;  %v2693_v50 = vmul.f32 %v6523_v53, %v6143_v30  ;;  %v3003_v41 = vadd.f32 %v2987_v46, %v2903_v60  ;;  %v2989_v30 = vmul.f32 %v6527_v27, %v6147_v34 }
 0x56c   :  { %v3060_v11 = vpop.permute.xlu0 %3059 }
 0x56d   :  { %v3090_v28 = vmul.f32 %v6528_v3, %v3060_v11  ;;  %v2905_v37 = vadd.f32 %v2889_v26, %v2805_v52  ;;  %v2709_v51 = vadd.f32 %v2693_v50, %v6135_v20 }
 0x56e   :  { %v6155_v16 = vpop.permute.xlu1 %2863 }
 0x56f   :  { %v2891_v63 = vmul.f32 %v6525_v40, %v6155_v16  ;;  %v3005_v43 = vadd.f32 %v2989_v30, %v2905_v37  ;;  %v2809_v11 = vadd.f32 %v2793_v22, %v2709_v51 }
 0x570   :  { %v3068_v45 = vpop.permute.xlu0 %3067 }
 0x571   :  { %v3092_v32 = vmul.f32 %v6528_v3, %v3068_v45 }
 0x572   :  { %v6160_v24 = vpop.permute.xlu1 %2871 }
 0x573   :  { %v2893_v34 = vmul.f32 %v6525_v40, %v6160_v24  ;;  %v2993_v24 = vmul.f32 %v6527_v27, %v6152_v57 }
 0x575   :  { %v2909_v62 = vadd.f32 %v2893_v34, %v2809_v11 }
 0x577   :  { %v2952_v0 = vpop.permute.xlu1 %2951 }
 0x578   :  { %v2988_v19 = vmul.f32 %v6527_v27, %v2952_v0  ;;  %v2807_v0 = vadd.f32 %v2791_v33, %v2707_v56 }
 0x57a   :  { %v3004_v14 = vadd.f32 %v2988_v19, %v2904_v42  ;;  %v2907_v42 = vadd.f32 %v2891_v63, %v2807_v0 }
 0x57b   :  { %v2960_v15 = vpop.permute.xlu1 %2959 }
 0x57c   :  { %v3104_v35 = vadd.f32 %v3088_v48, %v3004_v14  ;;  %v2990_v29 = vmul.f32 %v6527_v27, %v2960_v15  ;;  %v3007_v48 = vadd.f32 %v2991_v18, %v2907_v42  ;;  %v3009_v15 = vadd.f32 %v2993_v24, %v2909_v62 }
 0x57e   :  { %v3127_v55 = vadd.f32 %v6066_v13, %v3104_v35  ;;  %v3006_v12 = vadd.f32 %v2990_v29, %v2906_v31 }
 0x57f   :  { %v2968_v54 = vpop.permute.xlu1 %2967 }
 0x580   :  { %3143 = vst.msk [vmem:[%s6261_s16 + $0x50] sm:$0xff] %vm148_vm2, %v3127_v55  ;;  %v3106_v6 = vadd.f32 %v3090_v28, %v3006_v12  ;;  %v2992_v49 = vmul.f32 %v6527_v27, %v2968_v54 }
 0x582   :  { %v3129_v36 = vadd.f32 %v6066_v13, %v3106_v6  ;;  %v3008_v59 = vadd.f32 %v2992_v49, %v2908_v4 }
 0x584   :  { %3145 = vst.msk [vmem:[%s6261_s16 + $0x60] sm:$0xff] %vm148_vm2, %v3129_v36  ;;  %v3108_v1 = vadd.f32 %v3092_v32, %v3008_v59  ;;  %v3048_v5 = vpop.permute.xlu1 %3047 }
 0x585   :  { %v3087_v53 = vmul.f32 %v6528_v3, %v3048_v5 }
 0x586   :  { %v3131_v47 = vadd.f32 %v6066_v13, %v3108_v1 }
 0x587   :  { %v3103_v17 = vadd.f32 %v3087_v53, %v3003_v41 }
 0x588   :  { %3147 = vst.msk [vmem:[%s6261_s16 + $0x70] sm:$0xff] %vm148_vm2, %v3131_v47  ;;  %v3056_v16 = vpop.permute.xlu1 %3055 }
 0x589   :  { %v3126_v19 = vadd.f32 %v6066_v13, %v3103_v17  ;;  %v3089_v20 = vmul.f32 %v6528_v3, %v3056_v16 }
 0x58b   :  { %3142 = vst.msk [vmem:[%s6261_s16 + $0x48] sm:$0xff] %vm148_vm2, %v3126_v19  ;;  %v3105_v10 = vadd.f32 %v3089_v20, %v3005_v43 }
 0x58c   :  { %v3064_v8 = vpop.permute.xlu1 %3063 }
 0x58d   :  { %v3128_v2 = vadd.f32 %v6066_v13, %v3105_v10  ;;  %v3091_v40 = vmul.f32 %v6528_v3, %v3064_v8 }
 0x58f   :  { %3144 = vst.msk [vmem:[%s6261_s16 + $0x58] sm:$0xff] %vm148_vm2, %v3128_v2  ;;  %v3107_v38 = vadd.f32 %v3091_v40, %v3007_v48 }
 0x590   :  { %v3072_v14 = vpop.permute.xlu1 %3071 }
 0x591   :  { %v3130_v39 = vadd.f32 %v6066_v13, %v3107_v38  ;;  %v3093_v7 = vmul.f32 %v6528_v3, %v3072_v14 }
 0x593   :  { %3146 = vst.msk [vmem:[%s6261_s16 + $0x68] sm:$0xff] %vm148_vm2, %v3130_v39  ;;  %v3109_v35 = vadd.f32 %v3093_v7, %v3009_v15 }
 0x595   :  { %v3132_v27 = vadd.f32 %v6066_v13, %v3109_v35 }
 0x597   :  { %3148 = vst.msk [vmem:[%s6261_s16 + $0x78] sm:$0xff] %vm148_vm2, %v3132_v27 }

</bundles_post_ra>
